<compile_context>
chip_gen: v5e
topology: v5e:2x2
jax: 0.10.0
libtpu: 0.0.40
codegen_flags: <defaults>
</compile_context>

<pallas_src>
import functools

import jax
import jax.numpy as jnp
from jax import lax
from jax.experimental import pallas as pl
from jax.experimental.pallas import tpu as pltpu

ALPHA = 0.01                        # LeakyReLU negative slope
VMEM_LIMIT = 48 * 1024 * 1024       # explicit scoped-VMEM budget (fits v5e/v6e/v7x)


def _round_up(x, m):
    return ((x + m - 1) // m) * m


# ----------------------------------------------------------------------------
# Kernel 1: GRU over the metapath sequence + per-edge attention scores,
#           tiled over edges.
# ----------------------------------------------------------------------------
def gru_score_kernel(x_ref, wih_t_ref, whh_t_ref, bih_ref, bhh_ref,
                     attn_bd_ref, h_ref, s_ref):
    """
    x_ref:       (L, TE, D)  bf16  seq-major metapath node features (one E-tile)
    wih_t_ref:   (D,  3*HD)  bf16  weight_ih_l0^T
    whh_t_ref:   (HD, 3*HD)  bf16  weight_hh_l0^T
    bih_ref:     (1,  3*HD)  f32
    bhh_ref:     (1,  3*HD)  f32
    attn_bd_ref: (HD, Hm)    bf16  block-diagonal attention vectors (zero-padded)
    h_ref:       (TE, HD)    bf16  hidden state after the last timestep
    s_ref:       (TE, Hm)    f32   LeakyReLU(per-head attention score)
    """
    L, TE, D = x_ref.shape
    HD = whh_t_ref.shape[0]

    wih = wih_t_ref[...]
    whh = whh_t_ref[...]
    bih = bih_ref[...]
    bhh = bhh_ref[...]

    # Input projection for all L timesteps fused into ONE MXU matmul; it is
    # independent of the recurrence so only the (TE,HD)x(HD,3HD) recurrent
    # matmul sits on the serial chain.  L is small & static -> fully unrolled.
    x_all = jnp.concatenate([x_ref[t] for t in range(L)], axis=0)    # (L*TE, D)
    gi_all = jnp.dot(x_all, wih, preferred_element_type=jnp.float32) + bih

    h = jnp.zeros((TE, HD), jnp.float32)
    for t in range(L):
        gi = gi_all[t * TE:(t + 1) * TE]
        gh = jnp.dot(h.astype(jnp.bfloat16), whh,
                     preferred_element_type=jnp.float32) + bhh
        r = jax.nn.sigmoid(gi[:, 0:HD] + gh[:, 0:HD])
        z = jax.nn.sigmoid(gi[:, HD:2 * HD] + gh[:, HD:2 * HD])
        n = jnp.tanh(gi[:, 2 * HD:3 * HD] + r * gh[:, 2 * HD:3 * HD])
        h = (1.0 - z) * n + z * h

    hb = h.astype(jnp.bfloat16)
    h_ref[...] = hb
    # All-head attention scores, computed ONCE per edge (fused epilogue).
    s = jnp.dot(hb, attn_bd_ref[...], preferred_element_type=jnp.float32)
    s_ref[...] = jnp.where(s > 0, s, ALPHA * s)                      # LeakyReLU


# ----------------------------------------------------------------------------
# Kernel 1b: global-max-shifted softmax numerators + pre-weighted hidden,
#            tiled over edges.
# ----------------------------------------------------------------------------
def softmax_weight_kernel(hid_ref, s_ref, gmax_ref, w_ref, p_ref, *,
                          num_edges, num_heads, out_dim, tile_e):
    """
    hid_ref:  (TE, HD) bf16   GRU hidden per edge
    s_ref:    (TE, Hm) f32    LeakyReLU scores
    gmax_ref: (1,  Hm) f32    per-head max over VALID edges (global shift)
    w_ref:    (TE, HD) bf16   hidden * exp(score - gmax)   (per head)
    p_ref:    (TE, Hm) bf16   exp(score - gmax); 0 for padded edges
    """
    TE, _ = hid_ref.shape
    H, D = num_heads, out_dim

    eid = pl.program_id(0) * tile_e + lax.broadcasted_iota(jnp.int32, (TE, 1), 0)
    valid = eid < num_edges

    # Softmax shift-invariance with a GLOBAL per-head max: p <= 1 for every
    # valid edge (no overflow).  Scores far below the global max underflow to
    # 0, which is mathematically benign for the edge softmax.
    p = jnp.exp(s_ref[...] - gmax_ref[...])
    p = jnp.where(valid, p, 0.0)                     # padded edges -> exactly 0
    p_ref[...] = p.astype(p_ref.dtype)

    p_full = jnp.concatenate(
        [jnp.broadcast_to(p[:, h:h + 1], (TE, D)) for h in range(H)], axis=-1)
    w_ref[...] = (hid_ref[...].astype(jnp.float32) * p_full).astype(w_ref.dtype)


# ----------------------------------------------------------------------------
# Kernel 2: per-node-tile aggregation as two lane-dense MXU matmuls over
#           E-chunks, with f32 VMEM accumulators and fused ELU.
# ----------------------------------------------------------------------------
def agg_kernel(dst_ref, w_ref, p_ref, out_ref, numer_acc, denom_acc, *,
               num_heads, out_dim, tile_n):
    """
    dst_ref:   (1,  EC) int32  destination node id of each edge in this chunk
    w_ref:     (EC, HD) bf16   p-weighted hidden
    p_ref:     (EC, Hm) bf16   softmax numerators
    out_ref:   (TN, HD) bf16   aggregated + ELU'd node features (lane-dense)
    numer_acc: (TN, HD) f32    scratch accumulator
    denom_acc: (TN, Hm) f32    scratch accumulator
    """
    e_idx = pl.program_id(1)

    @pl.when(e_idx == 0)
    def _():
        numer_acc[...] = jnp.zeros_like(numer_acc)
        denom_acc[...] = jnp.zeros_like(denom_acc)

    H, D = num_heads, out_dim
    TN = tile_n
    node_id = (pl.program_id(0) * TN +
               lax.broadcasted_iota(jnp.int32, (TN, 1), 0))
    # dst mask built in-kernel: no dense (N, E) one-hot in HBM.
    onehot = (dst_ref[...] == node_id).astype(jnp.bfloat16)          # (TN, EC)

    numer_acc[...] += jnp.dot(onehot, w_ref[...],
                              preferred_element_type=jnp.float32)    # (TN, HD)
    denom_acc[...] += jnp.dot(onehot, p_ref[...],
                              preferred_element_type=jnp.float32)    # (TN, Hm)

    @pl.when(e_idx == pl.num_programs(1) - 1)
    def _():
        denom = denom_acc[...]
        inv = jnp.where(denom > 0, pl.reciprocal(denom, approx=True),
                        jnp.float32(0.0))
        inv_full = jnp.concatenate(
            [jnp.broadcast_to(inv[:, h:h + 1], (TN, D)) for h in range(H)],
            axis=-1)
        val = numer_acc[...] * inv_full
        # ELU fused into the store (removed from the combine stage).
        out_ref[...] = jnp.where(val > 0, val, jnp.exp(val) - 1.0
                                 ).astype(out_ref.dtype)


# ----------------------------------------------------------------------------
# Kernel 3a: node-tiled accumulation of the per-metapath beta logits
#            (tanh(fc1) mean over nodes, dotted with fc2).
# ----------------------------------------------------------------------------
def beta_logits_kernel(*refs, num_metapaths, num_nodes, tile_n):
    M = num_metapaths
    out_refs = refs[:M]
    w1t_ref, b1_ref, w2_ref, logits_ref, acc_ref = refs[M:M + 5]

    i = pl.program_id(0)

    @pl.when(i == 0)
    def _():
        acc_ref[...] = jnp.zeros_like(acc_ref)

    node_id = i * tile_n + lax.broadcasted_iota(jnp.int32, (tile_n, 1), 0)
    valid = node_id < num_nodes                       # mask padded node rows
    w1t = w1t_ref[...]
    b1 = b1_ref[...]
    for m in range(M):
        o = out_refs[m][...].astype(jnp.float32)                     # (TN, HD)
        fc1 = jnp.tanh(jnp.dot(o, w1t, preferred_element_type=jnp.float32) + b1)
        fc1 = jnp.where(valid, fc1, jnp.float32(0.0))
        acc_ref[m:m + 1, :] = (acc_ref[m:m + 1, :] +
                               jnp.sum(fc1, axis=0, keepdims=True))

    @pl.when(i == pl.num_programs(0) - 1)
    def _():
        mean = acc_ref[...] * (1.0 / num_nodes)                      # (M, A)
        logits_ref[...] = jnp.sum(mean * w2_ref[...], axis=1, keepdims=True)


# ----------------------------------------------------------------------------
# Kernel 3b: node-tiled beta-weighted combination (beta scalars in SMEM).
# ----------------------------------------------------------------------------
def combine_kernel(beta_ref, *refs, num_metapaths):
    M = num_metapaths
    out_refs = refs[:M]
    h_ref = refs[M]
    h = jnp.zeros(h_ref.shape, jnp.float32)
    for m in range(M):
        h = h + beta_ref[m] * out_refs[m][...].astype(jnp.float32)
    h_ref[...] = h


# ----------------------------------------------------------------------------
# Wrappers (JAX glue: gather, padding, layout)
# ----------------------------------------------------------------------------
def magnn_metapath_specific_forward(features, emi, dst, num_nodes, n_pad, tile_n,
                                    W_ih, W_hh, b_ih, b_hh, attn, num_heads,
                                    out_dim, tile_e=1024):
    E, L = emi.shape
    H, D = num_heads, out_dim
    HD = H * D
    Hm = _round_up(H, 8)

    # One E tile size shared by the GRU grid and kernel-2's E-chunk axis
    # (te is a multiple of 128 or equals e_pad -> all lane constraints hold).
    te = min(_round_up(E, 128), tile_e)
    e_pad = _round_up(E, te)

    # F.embedding gather + seq-major permute + bf16 + padding along E
    edata = features[emi]                                          # (E, L, D)
    x = jnp.transpose(edata, (1, 0, 2)).astype(jnp.bfloat16)       # (L, E, D)
    x = jnp.pad(x, ((0, 0), (0, e_pad - E), (0, 0)))

    # padded edges get dst = -1 -> never match any node row
    dst_p = jnp.pad(dst.astype(jnp.int32), (0, e_pad - E),
                    constant_values=-1).reshape(1, e_pad)

    # block-diagonal attention matrix (HD, Hm); Hm padded to >= 8 heads
    attn_bd = (attn.reshape(H, D, 1).astype(jnp.float32) *
               jnp.eye(H, Hm, dtype=jnp.float32).reshape(H, 1, Hm)
               ).reshape(HD, Hm).astype(jnp.bfloat16)

    # --- Kernel 1: GRU + attention scores (tiled over E, bf16 MXU) ---
    hidden, scores = pl.pallas_call(
        gru_score_kernel,
        out_shape=(jax.ShapeDtypeStruct((e_pad, HD), jnp.bfloat16),
                   jax.ShapeDtypeStruct((e_pad, Hm), jnp.float32)),
        grid=(e_pad // te,),
        in_specs=[
            pl.BlockSpec((L, te, D), lambda e: (0, e, 0)),
            pl.BlockSpec((D, 3 * HD), lambda e: (0, 0)),
            pl.BlockSpec((HD, 3 * HD), lambda e: (0, 0)),
            pl.BlockSpec((1, 3 * HD), lambda e: (0, 0)),
            pl.BlockSpec((1, 3 * HD), lambda e: (0, 0)),
            pl.BlockSpec((HD, Hm), lambda e: (0, 0)),
        ],
        out_specs=[pl.BlockSpec((te, HD), lambda e: (e, 0)),
                   pl.BlockSpec((te, Hm), lambda e: (e, 0))],
        compiler_params=pltpu.CompilerParams(
            dimension_semantics=("parallel",), vmem_limit_bytes=VMEM_LIMIT),
    )(x,
      W_ih.T.astype(jnp.bfloat16),
      W_hh.T.astype(jnp.bfloat16),
      b_ih.reshape(1, 3 * HD).astype(jnp.float32),
      b_hh.reshape(1, 3 * HD).astype(jnp.float32),
      attn_bd)

    # tiny XLA reduce: per-head global max over VALID edges -> softmax shift
    gmax = jnp.max(scores[:E], axis=0, keepdims=True)              # (1, Hm)

    # --- Kernel 1b: p = exp(s - gmax), w = hidden * p (tiled over E) ---
    w, p = pl.pallas_call(
        functools.partial(softmax_weight_kernel, num_edges=E, num_heads=H,
                          out_dim=D, tile_e=te),
        out_shape=(jax.ShapeDtypeStruct((e_pad, HD), jnp.bfloat16),
                   jax.ShapeDtypeStruct((e_pad, Hm), jnp.bfloat16)),
        grid=(e_pad // te,),
        in_specs=[pl.BlockSpec((te, HD), lambda e: (e, 0)),
                  pl.BlockSpec((te, Hm), lambda e: (e, 0)),
                  pl.BlockSpec((1, Hm), lambda e: (0, 0))],
        out_specs=[pl.BlockSpec((te, HD), lambda e: (e, 0)),
                   pl.BlockSpec((te, Hm), lambda e: (e, 0))],
        compiler_params=pltpu.CompilerParams(
            dimension_semantics=("parallel",), vmem_limit_bytes=VMEM_LIMIT),
    )(hidden, scores, gmax)

    # --- Kernel 2: edge_softmax + sum aggregation + fused ELU ---
    out = pl.pallas_call(
        functools.partial(agg_kernel, num_heads=H, out_dim=D, tile_n=tile_n),
        out_shape=jax.ShapeDtypeStruct((n_pad, HD), jnp.bfloat16),
        grid=(n_pad // tile_n, e_pad // te),
        in_specs=[
            pl.BlockSpec((1, te), lambda n, e: (0, e)),
            pl.BlockSpec((te, HD), lambda n, e: (e, 0)),
            pl.BlockSpec((te, Hm), lambda n, e: (e, 0)),
        ],
        out_specs=pl.BlockSpec((tile_n, HD), lambda n, e: (n, 0)),
        scratch_shapes=[pltpu.VMEM((tile_n, HD), jnp.float32),
                        pltpu.VMEM((tile_n, Hm), jnp.float32)],
        compiler_params=pltpu.CompilerParams(
            dimension_semantics=("parallel", "arbitrary"),
            vmem_limit_bytes=VMEM_LIMIT),
    )(dst_p, w, p)

    return out                              # (n_pad, HD) bf16, ELU applied


def magnn_ctr_ntype_forward(features, emi_list, num_nodes, metapath_params,
                            fc1_W, fc1_b, fc2_W, num_heads, out_dim,
                            tile_n=128):
    H, D = num_heads, out_dim
    HD = H * D
    A = fc1_W.shape[0]
    M = len(emi_list)

    tn = min(_round_up(num_nodes, 8), tile_n)
    n_pad = _round_up(num_nodes, tn)

    outs = []     # list of (n_pad, HD) bf16, already ELU'd
    for emi, p in zip(emi_list, metapath_params):
        dst = emi[:, -1]   # center / destination node of each metapath instance
        outs.append(magnn_metapath_specific_forward(
            features, emi, dst, num_nodes, n_pad, tn,
            p['W_ih'], p['W_hh'], p['b_ih'], p['b_hh'], p['attn'], H, D))

    # --- Kernel 3a: node-tiled accumulation of the beta logits ---
    logits = pl.pallas_call(
        functools.partial(beta_logits_kernel, num_metapaths=M,
                          num_nodes=num_nodes, tile_n=tn),
        out_shape=jax.ShapeDtypeStruct((M, 1), jnp.float32),
        grid=(n_pad // tn,),
        in_specs=([pl.BlockSpec((tn, HD), lambda n: (n, 0)) for _ in range(M)] +
                  [pl.BlockSpec((HD, A), lambda n: (0, 0)),
                   pl.BlockSpec((1, A), lambda n: (0, 0)),
                   pl.BlockSpec((1, A), lambda n: (0, 0))]),
        out_specs=pl.BlockSpec((M, 1), lambda n: (0, 0)),
        scratch_shapes=[pltpu.VMEM((M, A), jnp.float32)],
        compiler_params=pltpu.CompilerParams(
            dimension_semantics=("arbitrary",), vmem_limit_bytes=VMEM_LIMIT),
    )(*outs,
      fc1_W.T.astype(jnp.float32),
      fc1_b.reshape(1, A).astype(jnp.float32),
      fc2_W.reshape(1, A).astype(jnp.float32))

    beta = jax.nn.softmax(logits[:, 0])                 # (M,) tiny XLA softmax

    # --- Kernel 3b: node-tiled beta-weighted combination ---
    h = pl.pallas_call(
        functools.partial(combine_kernel, num_metapaths=M),
        out_shape=jax.ShapeDtypeStruct((n_pad, HD), jnp.float32),
        grid=(n_pad // tn,),
        in_specs=([pl.BlockSpec(memory_space=pltpu.MemorySpace.SMEM)] +
                  [pl.BlockSpec((tn, HD), lambda n: (n, 0)) for _ in range(M)]),
        out_specs=pl.BlockSpec((tn, HD), lambda n: (n, 0)),
        compiler_params=pltpu.CompilerParams(
            dimension_semantics=("parallel",), vmem_limit_bytes=VMEM_LIMIT),
    )(beta, *outs)

    return h[:num_nodes]                                           # (N, HD)


# ----------------------------------------------------------------------------
# Pure-JAX reference (for correctness check)
# ----------------------------------------------------------------------------
def _reference_metapath(features, emi, dst, N, p, H, D):
    E, L = emi.shape
    HD = H * D
    W_ih, W_hh, b_ih, b_hh, attn = p['W_ih'], p['W_hh'], p['b_ih'], p['b_hh'], p['attn']
    edata = features[emi]
    x = jnp.transpose(edata, (1, 0, 2))
    h = jnp.zeros((E, HD), jnp.float32)
    hp = lax.Precision.HIGHEST
    for t in range(L):
        gi = jnp.dot(x[t], W_ih.T, precision=hp) + b_ih
        gh = jnp.dot(h, W_hh.T, precision=hp) + b_hh
        r = jax.nn.sigmoid(gi[:, :HD] + gh[:, :HD])
        z = jax.nn.sigmoid(gi[:, HD:2 * HD] + gh[:, HD:2 * HD])
        n = jnp.tanh(gi[:, 2 * HD:] + r * gh[:, 2 * HD:])
        h = (1.0 - z) * n + z * h
    eft = h.reshape(E, H, D)
    a = jnp.sum(eft * attn, axis=-1)                               # (E, H)
    a = jnp.where(a > 0, a, ALPHA * a)
    m = jax.ops.segment_max(a, dst, num_segments=N)
    exp_a = jnp.exp(a - m[dst])
    denom = jax.ops.segment_sum(exp_a, dst, num_segments=N)
    alpha_e = exp_a / denom[dst]
    ret = jax.ops.segment_sum(eft * alpha_e[:, :, None], dst, num_segments=N)
    return ret.reshape(N, HD)


def reference_ctr_forward(features, emi_list, N, params_list, fc1_W, fc1_b,
                          fc2_W, H, D):
    outs, logits = [], []
    for emi, p in zip(emi_list, params_list):
        dst = emi[:, -1]
        mo = jax.nn.elu(_reference_metapath(features, emi, dst, N, p, H, D))
        outs.append(mo)
        fc1 = jnp.tanh(mo @ fc1_W.T + fc1_b)
        logits.append(jnp.mean(fc1, axis=0) @ fc2_W.T)              # (1,)
    beta = jax.nn.softmax(jnp.concatenate(logits))                  # (M,)
    outs = jnp.stack(outs, axis=0)                                  # (M, N, HD)
    return jnp.sum(beta[:, None, None] * outs, axis=0)


if __name__ == "__main__":
    # small, TPU-friendly shapes
    N = 8          # graph nodes
    D = 32         # out_dim
    H = 4          # num_heads
    HD = H * D     # 128
    A = 32         # attn_vec_dim
    M = 2          # num_metapaths
    E_list = [16, 24]
    L_list = [3, 4]

    key = jax.random.PRNGKey(0)
    k_feat, k_emi, k_mp, k_fc = jax.random.split(key, 4)

    features = jax.random.normal(k_feat, (N, D), jnp.float32)

    emi_keys = jax.random.split(k_emi, M)
    emi_list = [jax.random.randint(emi_keys[i], (E_list[i], L_list[i]), 0, N)
                for i in range(M)]

    # per-metapath GRU params (PyTorch default: uniform(-1/sqrt(HD), 1/sqrt(HD)))
    kb = 1.0 / jnp.sqrt(jnp.float32(HD))
    std_attn = 1.414 * jnp.sqrt(2.0 / (H * D + D))   # xavier_normal gain=1.414
    mp_keys = jax.random.split(k_mp, M)
    metapath_params = []
    for i in range(M):
        ks = jax.random.split(mp_keys[i], 5)
        metapath_params.append(dict(
            W_ih=jax.random.uniform(ks[0], (3 * HD, D), jnp.float32, -kb, kb),
            W_hh=jax.random.uniform(ks[1], (3 * HD, HD), jnp.float32, -kb, kb),
            b_ih=jax.random.uniform(ks[2], (3 * HD,), jnp.float32, -kb, kb),
            b_hh=jax.random.uniform(ks[3], (3 * HD,), jnp.float32, -kb, kb),
            attn=std_attn * jax.random.normal(ks[4], (1, H, D), jnp.float32),
        ))

    # ctr-ntype attention params
    kf = jax.random.split(k_fc, 3)
    std_fc1 = 1.414 * jnp.sqrt(2.0 / (HD + A))
    std_fc2 = 1.414 * jnp.sqrt(2.0 / (A + 1))
    fc1_W = std_fc1 * jax.random.normal(kf[0], (A, HD), jnp.float32)
    fc1_b = jax.random.uniform(kf[1], (A,), jnp.float32, -0.1, 0.1)
    fc2_W = std_fc2 * jax.random.normal(kf[2], (1, A), jnp.float32)

    out = magnn_ctr_ntype_forward(features, emi_list, N, metapath_params,
                                  fc1_W, fc1_b, fc2_W, H, D)
    out = jax.block_until_ready(out)

    ref = reference_ctr_forward(features, emi_list, N, metapath_params,
                                fc1_W, fc1_b, fc2_W, H, D)
    ref = jax.block_until_ready(ref)

    assert out.shape == (N, HD)
    max_err = float(jnp.max(jnp.abs(out - ref)))
    assert max_err < 5e-2, f"mismatch vs reference: {max_err}"

    print("KERNEL_OK")
</pallas_src>

<mosaic_0001>
module attributes {stable_mosaic.version = 11 : i64} {
  func.func @gru_score_kernel(%arg0: i32, %arg1: memref<3x128x32xbf16, #tpu.memory_space<vmem>>, %arg2: memref<32x384xbf16, #tpu.memory_space<vmem>>, %arg3: memref<128x384xbf16, #tpu.memory_space<vmem>>, %arg4: memref<1x384xf32, #tpu.memory_space<vmem>>, %arg5: memref<1x384xf32, #tpu.memory_space<vmem>>, %arg6: memref<128x8xbf16, #tpu.memory_space<vmem>>, %arg7: memref<128x128xbf16, #tpu.memory_space<vmem>>, %arg8: memref<128x8xf32, #tpu.memory_space<vmem>>) attributes {dimension_semantics = [#tpu.dimension_semantics<parallel>], iteration_bounds = array<i64: 1>, scalar_prefetch = 0 : i64, scratch_operands = 0 : i64, tpu.core_type = #tpu.core_type<tc>, window_params = [{transform_indices = @transform_0, window_bounds = array<i64: 3, 128, 32>}, {pipeline_mode = #tpu.pipeline_mode<synchronous>, transform_indices = @transform_1, window_bounds = array<i64: 32, 384>}, {pipeline_mode = #tpu.pipeline_mode<synchronous>, transform_indices = @transform_2, window_bounds = array<i64: 128, 384>}, {pipeline_mode = #tpu.pipeline_mode<synchronous>, transform_indices = @transform_3, window_bounds = array<i64: 1, 384>}, {pipeline_mode = #tpu.pipeline_mode<synchronous>, transform_indices = @transform_4, window_bounds = array<i64: 1, 384>}, {pipeline_mode = #tpu.pipeline_mode<synchronous>, transform_indices = @transform_5, window_bounds = array<i64: 128, 8>}, {transform_indices = @transform_6, window_bounds = array<i64: 128, 128>}, {transform_indices = @transform_7, window_bounds = array<i64: 128, 8>}]} {
    %c0 = arith.constant 0 : index
    %c0_0 = arith.constant 0 : index
    %0 = vector.load %arg2[%c0, %c0_0] : memref<32x384xbf16, #tpu.memory_space<vmem>>, vector<32x384xbf16>
    %c0_1 = arith.constant 0 : index
    %c0_2 = arith.constant 0 : index
    %1 = vector.load %arg3[%c0_1, %c0_2] : memref<128x384xbf16, #tpu.memory_space<vmem>>, vector<128x384xbf16>
    %c0_3 = arith.constant 0 : index
    %c0_4 = arith.constant 0 : index
    %2 = vector.load %arg4[%c0_3, %c0_4] : memref<1x384xf32, #tpu.memory_space<vmem>>, vector<1x384xf32>
    %c0_5 = arith.constant 0 : index
    %c0_6 = arith.constant 0 : index
    %3 = vector.load %arg5[%c0_5, %c0_6] : memref<1x384xf32, #tpu.memory_space<vmem>>, vector<1x384xf32>
    %c0_7 = arith.constant 0 : index
    %c0_8 = arith.constant 0 : index
    %c0_9 = arith.constant 0 : index
    %4 = vector.load %arg1[%c0_7, %c0_8, %c0_9] : memref<3x128x32xbf16, #tpu.memory_space<vmem>>, vector<1x128x32xbf16>
    %5 = vector.shape_cast %4 : vector<1x128x32xbf16> to vector<128x32xbf16>
    %c1 = arith.constant 1 : index
    %c0_10 = arith.constant 0 : index
    %c0_11 = arith.constant 0 : index
    %6 = vector.load %arg1[%c1, %c0_10, %c0_11] : memref<3x128x32xbf16, #tpu.memory_space<vmem>>, vector<1x128x32xbf16>
    %7 = vector.shape_cast %6 : vector<1x128x32xbf16> to vector<128x32xbf16>
    %c2 = arith.constant 2 : index
    %c0_12 = arith.constant 0 : index
    %c0_13 = arith.constant 0 : index
    %8 = vector.load %arg1[%c2, %c0_12, %c0_13] : memref<3x128x32xbf16, #tpu.memory_space<vmem>>, vector<1x128x32xbf16>
    %9 = vector.shape_cast %8 : vector<1x128x32xbf16> to vector<128x32xbf16>
    %10 = tpu.concatenate %5, %7, %9 in 0 : vector<128x32xbf16>, vector<128x32xbf16>, vector<128x32xbf16> -> vector<384x32xbf16>
    %cst = arith.constant dense<0.000000e+00> : vector<384x384xf32>
    %11 = tpu.matmul %10, %0, %cst {dimension_numbers = #tpu.dot_dimension_numbers<[1], [0], [0], [1], [0, 0, 1, 1], [], []>} : vector<384x32xbf16>, vector<32x384xbf16>, vector<384x384xf32> -> vector<384x384xf32>
    %12 = vector.broadcast %2 : vector<1x384xf32> to vector<384x384xf32>
    %13 = arith.addf %11, %12 : vector<384x384xf32>
    %cst_14 = arith.constant 0.000000e+00 : f32
    %14 = vector.broadcast %cst_14 : f32 to vector<128x128xf32>
    %15 = vector.extract_strided_slice %13 {offsets = [0, 0], sizes = [128, 384], strides = [1, 1]} : vector<384x384xf32> to vector<128x384xf32>
    %16 = arith.truncf %14 : vector<128x128xf32> to vector<128x128xbf16>
    %cst_15 = arith.constant dense<0.000000e+00> : vector<128x384xf32>
    %17 = tpu.matmul %16, %1, %cst_15 {dimension_numbers = #tpu.dot_dimension_numbers<[1], [0], [0], [1], [0, 0, 1, 1], [], []>} : vector<128x128xbf16>, vector<128x384xbf16>, vector<128x384xf32> -> vector<128x384xf32>
    %18 = vector.broadcast %3 : vector<1x384xf32> to vector<128x384xf32>
    %19 = arith.addf %17, %18 : vector<128x384xf32>
    %20 = vector.extract_strided_slice %15 {offsets = [0, 0], sizes = [128, 128], strides = [1, 1]} : vector<128x384xf32> to vector<128x128xf32>
    %21 = vector.extract_strided_slice %19 {offsets = [0, 0], sizes = [128, 128], strides = [1, 1]} : vector<128x384xf32> to vector<128x128xf32>
    %22 = arith.addf %20, %21 : vector<128x128xf32>
    %23 = arith.negf %22 : vector<128x128xf32>
    %24 = math.exp %23 : vector<128x128xf32>
    %cst_16 = arith.constant 1.000000e+00 : f32
    %25 = vector.broadcast %cst_16 : f32 to vector<128x128xf32>
    %26 = arith.addf %25, %24 : vector<128x128xf32>
    %27 = arith.divf %25, %26 : vector<128x128xf32>
    %28 = vector.extract_strided_slice %15 {offsets = [0, 128], sizes = [128, 128], strides = [1, 1]} : vector<128x384xf32> to vector<128x128xf32>
    %29 = vector.extract_strided_slice %19 {offsets = [0, 128], sizes = [128, 128], strides = [1, 1]} : vector<128x384xf32> to vector<128x128xf32>
    %30 = arith.addf %28, %29 : vector<128x128xf32>
    %31 = arith.negf %30 : vector<128x128xf32>
    %32 = math.exp %31 : vector<128x128xf32>
    %cst_17 = arith.constant 1.000000e+00 : f32
    %33 = vector.broadcast %cst_17 : f32 to vector<128x128xf32>
    %34 = arith.addf %33, %32 : vector<128x128xf32>
    %35 = arith.divf %33, %34 : vector<128x128xf32>
    %36 = vector.extract_strided_slice %15 {offsets = [0, 256], sizes = [128, 128], strides = [1, 1]} : vector<128x384xf32> to vector<128x128xf32>
    %37 = vector.extract_strided_slice %19 {offsets = [0, 256], sizes = [128, 128], strides = [1, 1]} : vector<128x384xf32> to vector<128x128xf32>
    %38 = arith.mulf %27, %37 : vector<128x128xf32>
    %39 = arith.addf %36, %38 : vector<128x128xf32>
    %40 = math.tanh %39 : vector<128x128xf32>
    %cst_18 = arith.constant 1.000000e+00 : f32
    %41 = vector.broadcast %cst_18 : f32 to vector<128x128xf32>
    %42 = arith.subf %41, %35 : vector<128x128xf32>
    %43 = arith.mulf %42, %40 : vector<128x128xf32>
    %44 = arith.mulf %35, %14 : vector<128x128xf32>
    %45 = arith.addf %43, %44 : vector<128x128xf32>
    %46 = vector.extract_strided_slice %13 {offsets = [128, 0], sizes = [128, 384], strides = [1, 1]} : vector<384x384xf32> to vector<128x384xf32>
    %47 = arith.truncf %45 : vector<128x128xf32> to vector<128x128xbf16>
    %cst_19 = arith.constant dense<0.000000e+00> : vector<128x384xf32>
    %48 = tpu.matmul %47, %1, %cst_19 {dimension_numbers = #tpu.dot_dimension_numbers<[1], [0], [0], [1], [0, 0, 1, 1], [], []>} : vector<128x128xbf16>, vector<128x384xbf16>, vector<128x384xf32> -> vector<128x384xf32>
    %49 = vector.broadcast %3 : vector<1x384xf32> to vector<128x384xf32>
    %50 = arith.addf %48, %49 : vector<128x384xf32>
    %51 = vector.extract_strided_slice %46 {offsets = [0, 0], sizes = [128, 128], strides = [1, 1]} : vector<128x384xf32> to vector<128x128xf32>
    %52 = vector.extract_strided_slice %50 {offsets = [0, 0], sizes = [128, 128], strides = [1, 1]} : vector<128x384xf32> to vector<128x128xf32>
    %53 = arith.addf %51, %52 : vector<128x128xf32>
    %54 = arith.negf %53 : vector<128x128xf32>
    %55 = math.exp %54 : vector<128x128xf32>
    %cst_20 = arith.constant 1.000000e+00 : f32
    %56 = vector.broadcast %cst_20 : f32 to vector<128x128xf32>
    %57 = arith.addf %56, %55 : vector<128x128xf32>
    %58 = arith.divf %56, %57 : vector<128x128xf32>
    %59 = vector.extract_strided_slice %46 {offsets = [0, 128], sizes = [128, 128], strides = [1, 1]} : vector<128x384xf32> to vector<128x128xf32>
    %60 = vector.extract_strided_slice %50 {offsets = [0, 128], sizes = [128, 128], strides = [1, 1]} : vector<128x384xf32> to vector<128x128xf32>
    %61 = arith.addf %59, %60 : vector<128x128xf32>
    %62 = arith.negf %61 : vector<128x128xf32>
    %63 = math.exp %62 : vector<128x128xf32>
    %cst_21 = arith.constant 1.000000e+00 : f32
    %64 = vector.broadcast %cst_21 : f32 to vector<128x128xf32>
    %65 = arith.addf %64, %63 : vector<128x128xf32>
    %66 = arith.divf %64, %65 : vector<128x128xf32>
    %67 = vector.extract_strided_slice %46 {offsets = [0, 256], sizes = [128, 128], strides = [1, 1]} : vector<128x384xf32> to vector<128x128xf32>
    %68 = vector.extract_strided_slice %50 {offsets = [0, 256], sizes = [128, 128], strides = [1, 1]} : vector<128x384xf32> to vector<128x128xf32>
    %69 = arith.mulf %58, %68 : vector<128x128xf32>
    %70 = arith.addf %67, %69 : vector<128x128xf32>
    %71 = math.tanh %70 : vector<128x128xf32>
    %cst_22 = arith.constant 1.000000e+00 : f32
    %72 = vector.broadcast %cst_22 : f32 to vector<128x128xf32>
    %73 = arith.subf %72, %66 : vector<128x128xf32>
    %74 = arith.mulf %73, %71 : vector<128x128xf32>
    %75 = arith.mulf %66, %45 : vector<128x128xf32>
    %76 = arith.addf %74, %75 : vector<128x128xf32>
    %77 = vector.extract_strided_slice %13 {offsets = [256, 0], sizes = [128, 384], strides = [1, 1]} : vector<384x384xf32> to vector<128x384xf32>
    %78 = arith.truncf %76 : vector<128x128xf32> to vector<128x128xbf16>
    %cst_23 = arith.constant dense<0.000000e+00> : vector<128x384xf32>
    %79 = tpu.matmul %78, %1, %cst_23 {dimension_numbers = #tpu.dot_dimension_numbers<[1], [0], [0], [1], [0, 0, 1, 1], [], []>} : vector<128x128xbf16>, vector<128x384xbf16>, vector<128x384xf32> -> vector<128x384xf32>
    %80 = vector.broadcast %3 : vector<1x384xf32> to vector<128x384xf32>
    %81 = arith.addf %79, %80 : vector<128x384xf32>
    %82 = vector.extract_strided_slice %77 {offsets = [0, 0], sizes = [128, 128], strides = [1, 1]} : vector<128x384xf32> to vector<128x128xf32>
    %83 = vector.extract_strided_slice %81 {offsets = [0, 0], sizes = [128, 128], strides = [1, 1]} : vector<128x384xf32> to vector<128x128xf32>
    %84 = arith.addf %82, %83 : vector<128x128xf32>
    %85 = arith.negf %84 : vector<128x128xf32>
    %86 = math.exp %85 : vector<128x128xf32>
    %cst_24 = arith.constant 1.000000e+00 : f32
    %87 = vector.broadcast %cst_24 : f32 to vector<128x128xf32>
    %88 = arith.addf %87, %86 : vector<128x128xf32>
    %89 = arith.divf %87, %88 : vector<128x128xf32>
    %90 = vector.extract_strided_slice %77 {offsets = [0, 128], sizes = [128, 128], strides = [1, 1]} : vector<128x384xf32> to vector<128x128xf32>
    %91 = vector.extract_strided_slice %81 {offsets = [0, 128], sizes = [128, 128], strides = [1, 1]} : vector<128x384xf32> to vector<128x128xf32>
    %92 = arith.addf %90, %91 : vector<128x128xf32>
    %93 = arith.negf %92 : vector<128x128xf32>
    %94 = math.exp %93 : vector<128x128xf32>
    %cst_25 = arith.constant 1.000000e+00 : f32
    %95 = vector.broadcast %cst_25 : f32 to vector<128x128xf32>
    %96 = arith.addf %95, %94 : vector<128x128xf32>
    %97 = arith.divf %95, %96 : vector<128x128xf32>
    %98 = vector.extract_strided_slice %77 {offsets = [0, 256], sizes = [128, 128], strides = [1, 1]} : vector<128x384xf32> to vector<128x128xf32>
    %99 = vector.extract_strided_slice %81 {offsets = [0, 256], sizes = [128, 128], strides = [1, 1]} : vector<128x384xf32> to vector<128x128xf32>
    %100 = arith.mulf %89, %99 : vector<128x128xf32>
    %101 = arith.addf %98, %100 : vector<128x128xf32>
    %102 = math.tanh %101 : vector<128x128xf32>
    %cst_26 = arith.constant 1.000000e+00 : f32
    %103 = vector.broadcast %cst_26 : f32 to vector<128x128xf32>
    %104 = arith.subf %103, %97 : vector<128x128xf32>
    %105 = arith.mulf %104, %102 : vector<128x128xf32>
    %106 = arith.mulf %97, %76 : vector<128x128xf32>
    %107 = arith.addf %105, %106 : vector<128x128xf32>
    %108 = arith.truncf %107 : vector<128x128xf32> to vector<128x128xbf16>
    %c0_27 = arith.constant 0 : index
    %c0_28 = arith.constant 0 : index
    %109 = vector.load %arg7[%c0_27, %c0_28] : memref<128x128xbf16, #tpu.memory_space<vmem>>, vector<128x128xbf16>
    tpu.vector_store %arg7[%c0_27, %c0_28], %108 {strides = array<i32>} : memref<128x128xbf16, #tpu.memory_space<vmem>>, vector<128x128xbf16>,
    %c0_29 = arith.constant 0 : index
    %c0_30 = arith.constant 0 : index
    %110 = vector.load %arg6[%c0_29, %c0_30] : memref<128x8xbf16, #tpu.memory_space<vmem>>, vector<128x8xbf16>
    %cst_31 = arith.constant dense<0.000000e+00> : vector<128x8xf32>
    %111 = tpu.matmul %108, %110, %cst_31 {dimension_numbers = #tpu.dot_dimension_numbers<[1], [0], [0], [1], [0, 0, 1, 1], [], []>} : vector<128x128xbf16>, vector<128x8xbf16>, vector<128x8xf32> -> vector<128x8xf32>
    %cst_32 = arith.constant 0.000000e+00 : f32
    %112 = vector.broadcast %cst_32 : f32 to vector<128x8xf32>
    %113 = arith.cmpf ogt, %111, %112 : vector<128x8xf32>
    %cst_33 = arith.constant 0.00999999977 : f32
    %114 = vector.broadcast %cst_33 : f32 to vector<128x8xf32>
    %115 = arith.mulf %114, %111 : vector<128x8xf32>
    %116 = arith.select %113, %111, %115 : vector<128x8xi1>, vector<128x8xf32>
    %c0_34 = arith.constant 0 : index
    %c0_35 = arith.constant 0 : index
    %117 = vector.load %arg8[%c0_34, %c0_35] : memref<128x8xf32, #tpu.memory_space<vmem>>, vector<128x8xf32>
    tpu.vector_store %arg8[%c0_34, %c0_35], %116 {strides = array<i32>} : memref<128x8xf32, #tpu.memory_space<vmem>>, vector<128x8xf32>,
    return
  }
  func.func @transform_0(%arg0: i32) -> (i32, i32, i32) {
    %c0_i32 = arith.constant 0 : i32
    %c0_i32_0 = arith.constant 0 : i32
    %c0_i32_1 = arith.constant 0 : i32
    return %c0_i32, %arg0, %c0_i32_0 : i32, i32, i32
  }
  func.func @transform_1(%arg0: i32) -> (i32, i32) {
    %c0_i32 = arith.constant 0 : i32
    %c0_i32_0 = arith.constant 0 : i32
    %c0_i32_1 = arith.constant 0 : i32
    return %c0_i32, %c0_i32_0 : i32, i32
  }
  func.func @transform_2(%arg0: i32) -> (i32, i32) {
    %c0_i32 = arith.constant 0 : i32
    %c0_i32_0 = arith.constant 0 : i32
    %c0_i32_1 = arith.constant 0 : i32
    return %c0_i32, %c0_i32_0 : i32, i32
  }
  func.func @transform_3(%arg0: i32) -> (i32, i32) {
    %c0_i32 = arith.constant 0 : i32
    %c0_i32_0 = arith.constant 0 : i32
    %c0_i32_1 = arith.constant 0 : i32
    return %c0_i32, %c0_i32_0 : i32, i32
  }
  func.func @transform_4(%arg0: i32) -> (i32, i32) {
    %c0_i32 = arith.constant 0 : i32
    %c0_i32_0 = arith.constant 0 : i32
    %c0_i32_1 = arith.constant 0 : i32
    return %c0_i32, %c0_i32_0 : i32, i32
  }
  func.func @transform_5(%arg0: i32) -> (i32, i32) {
    %c0_i32 = arith.constant 0 : i32
    %c0_i32_0 = arith.constant 0 : i32
    %c0_i32_1 = arith.constant 0 : i32
    return %c0_i32, %c0_i32_0 : i32, i32
  }
  func.func @transform_6(%arg0: i32) -> (i32, i32) {
    %c0_i32 = arith.constant 0 : i32
    %c0_i32_0 = arith.constant 0 : i32
    return %arg0, %c0_i32 : i32, i32
  }
  func.func @transform_7(%arg0: i32) -> (i32, i32) {
    %c0_i32 = arith.constant 0 : i32
    %c0_i32_0 = arith.constant 0 : i32
    return %arg0, %c0_i32 : i32, i32
  }
}

</mosaic_0001>

<bundles_post_ra>
// kernel: tpu_custom_call.1
= control target key start
LH: loop header
LB: loop body
LE: loop exit
PB: predicated region body
PF: predicated region fallthrough
CT: control target
= control target key end

     0   :  { %s9336_s0 = inlined_call_operand.vmem [shape: bf16[3,128,32], index: 0, kind: input, shape index: {}]   ;;  %s9337_s1 = inlined_call_operand.vmem [shape: bf16[32,384], index: 1, kind: input, shape index: {}]   ;;  %s9338_s2 = inlined_call_operand.vmem [shape: bf16[128,384], index: 2, kind: input, shape index: {}]   ;;  %s9339_s3 = inlined_call_operand.vmem [shape: f32[1,384], index: 3, kind: input, shape index: {}]   ;;  %s9340_s4 = inlined_call_operand.vmem [shape: f32[1,384], index: 4, kind: input, shape index: {}]   ;;  %s9341_s5 = inlined_call_operand.vmem [shape: bf16[128,8], index: 5, kind: input, shape index: {}]   ;;  %s9342_s6 = inlined_call_operand.hbm [shape: bf16[128,128], index: 6, kind: output, shape index: {0}]   ;;  %s9343_s7 = inlined_call_operand.vmem [shape: f32[128,8], index: 7, kind: output, shape index: {1}]  }
   0x1   :  { %v4008_v0 = vld [vmem:[%s9337_s1 + $0x18] sm:$0xf]  ;;  %v4318_v1 = vld [vmem:[%s9337_s1 + $0x20] sm:$0xf0]  ;;  %v3996_v2 = vld [vmem:[%s9337_s1] sm:$0xf] }
   0x2   :  { %v4009_v3 = vor.u32 %v4318_v1, %v4008_v0  ;;  %v4315_v4 = vld [vmem:[%s9337_s1 + $0x8] sm:$0xf0]  ;;  %v4317_v5 = vld [vmem:[%s9337_s1 + $0x1c] sm:$0xf]  ;;  %v4010_v6 = vld [vmem:[%s9337_s1 + $0x24] sm:$0xf0] }
   0x3   :  { %v3997_v7 = vor.u32 %v4315_v4, %v3996_v2  ;;  %v4013_v8 = vor.u32 %v4317_v5, %v4010_v6 }
   0x4   :  { %4423 = vmatpush.bf16.msra.mxu3 %v4009_v3  ;;  %357 = vmatpush.bf16.msra.mxu0 %v4009_v3 }
   0x5   :  { %13 = vsyncpa [#allocation3], 0  ;;  %v4314_v9 = vld [vmem:[%s9337_s1 + $0x4] sm:$0xf]  ;;  %v3998_v10 = vld [vmem:[%s9337_s1 + $0xc] sm:$0xf0]  ;;  %486 = vmatpush.bf16.msra.mxu1 %v4013_v8 }
   0x6   :  { %v5010_v11 = vld [vmem:[%s9336_s0 + $0xb0] sm:$0xff]  ;;  %vm278_vm0 = vcmask 261120   ;;  %v4001_v12 = vor.u32 %v4314_v9, %v3998_v10  ;;  %v4016_v13 = vld [vmem:[%s9337_s1 + $0x20] sm:$0xf]  ;;  %v4319_v14 = vld [vmem:[%s9337_s1 + $0x28] sm:$0xf0] }
   0x7   :  { %v4017_v15 = vor.u32 %v4319_v14, %v4016_v13  ;;  %v4367_v16 = vld [vmem:[%s9336_s0 + $0xb8] sm:$0xff]  ;;  %v4004_v17 = vld [vmem:[%s9337_s1 + $0x8] sm:$0xf]  ;;  %v4316_v18 = vld [vmem:[%s9337_s1 + $0x10] sm:$0xf0]  ;;  %v9344_v52 = vmov 0  }
   0x8   :  { %4424 = vmatpush.bf16.msra.mxu3 %v3997_v7  ;;  %358 = vmatpush.bf16.msra.mxu0 %v3997_v7  ;;  %v4005_v19 = vor.u32 %v4316_v18, %v4004_v17  ;;  %v4176_v20 = vld [vmem:[%s9338_s2 + $0xa8] sm:$0xf]  ;;  %v4342_v21 = vld [vmem:[%s9338_s2 + $0xb0] sm:$0xf0]  ;;  %v4164_v23 = vld [vmem:[%s9338_s2 + $0x90] sm:$0xf] }
   0x9   :  { %487 = vmatpush.bf16.msra.mxu1 %v4001_v12  ;;  %615 = vmatpush.bf16.msra.mxu2 %v4017_v15  ;;  %v5036_v22 = vor.u32 %v4342_v21, %v4176_v20  ;;  %v4339_v24 = vld [vmem:[%s9338_s2 + $0x98] sm:$0xf0]  ;;  %v4152_v26 = vld [vmem:[%s9338_s2 + $0x78] sm:$0xf]  ;;  %v4336_v27 = vld [vmem:[%s9338_s2 + $0x80] sm:$0xf0] }
   0xa   :  { %v5047_v25 = vor.u32 %v4339_v24, %v4164_v23  ;;  %v5057_v28 = vor.u32 %v4336_v27, %v4152_v26  ;;  %v4140_v29 = vld [vmem:[%s9338_s2 + $0x60] sm:$0xf]  ;;  %v4333_v30 = vld [vmem:[%s9338_s2 + $0x68] sm:$0xf0]  ;;  %v4128_v32 = vld [vmem:[%s9338_s2 + $0x48] sm:$0xf] }
   0xb   :  { %4040 = vmatmul.msk.bf16.vlgmr.msra.gmra.mxu3 %vm278_vm0, %v5010_v11  ;;  %v5067_v31 = vor.u32 %v4333_v30, %v4140_v29  ;;  %v4330_v33 = vld [vmem:[%s9338_s2 + $0x50] sm:$0xf0]  ;;  %v4116_v35 = vld [vmem:[%s9338_s2 + $0x30] sm:$0xf]  ;;  %v4327_v36 = vld [vmem:[%s9338_s2 + $0x38] sm:$0xf0] }
   0xc   :  { %4425 = vmatpush.bf16.msrb.mxu3 %v4013_v8  ;;  %1780 = vmatpush.bf16.msrb.mxu0 %v5036_v22  ;;  %v5078_v34 = vor.u32 %v4330_v33, %v4128_v32  ;;  %v5088_v37 = vor.u32 %v4327_v36, %v4116_v35  ;;  %v4104_v38 = vld [vmem:[%s9338_s2 + $0x18] sm:$0xf]  ;;  %v4324_v39 = vld [vmem:[%s9338_s2 + $0x20] sm:$0xf0]  ;;  %v4092_v41 = vld [vmem:[%s9338_s2] sm:$0xf] }
   0xd   :  { %616 = vmatpush.bf16.msra.mxu2 %v4005_v19  ;;  %v5098_v40 = vor.u32 %v4324_v39, %v4104_v38  ;;  %v4321_v42 = vld [vmem:[%s9338_s2 + $0x8] sm:$0xf0]  ;;  %v4178_v45 = vld [vmem:[%s9338_s2 + $0xb4] sm:$0xf0]  ;;  %v4344_v46 = vld [vmem:[%s9336_s0] sm:$0xff]  ;;  %s3850_s21 = sshll.u32 %s9342_s6, 4  ;;  %s3851_s21 = int_to_ptr.hbm [resolvable:$true] %s3850_s21 }
   0xe   :  { %v5108_v43 = vor.u32 %v4321_v42, %v4092_v41  ;;  %v4341_v44 = vld [vmem:[%s9338_s2 + $0xac] sm:$0xf]  ;;  %4018 = vmatmul.msk.bf16.vlgmr.msra.gmra.mxu0 %vm278_vm0, %v4344_v46  ;;  %4042 = vmatmul.msk.bf16.vlgmr.msra.gmra.mxu1 %vm278_vm0, %v4344_v46  ;;  %v4338_v48 = vld [vmem:[%s9338_s2 + $0x94] sm:$0xf]  ;;  %v4166_v49 = vld [vmem:[%s9338_s2 + $0x9c] sm:$0xf0] }
   0xf   :  { %v4181_v47 = vor.u32 %v4341_v44, %v4178_v45  ;;  %v4345_v50 = vld [vmem:[%s9336_s0 + $0x8] sm:$0xff]  ;;  %v4169_v51 = vor.u32 %v4338_v48, %v4166_v49  ;;  %v4335_v53 = vld [vmem:[%s9338_s2 + $0x7c] sm:$0xf]  ;;  %v4346_v56 = vld [vmem:[%s9336_s0 + $0x10] sm:$0xff]  ;;  %s4940_s22 = smov [#allocation2]   ;;  %s4942_s24 = smov 4  }
  0x10   :  { %4426 = vmatpush.bf16.msrb.mxu3 %v4001_v12  ;;  %1781 = vmatpush.bf16.msrb.mxu0 %v5047_v25  ;;  %v4154_v54 = vld [vmem:[%s9338_s2 + $0x84] sm:$0xf0]  ;;  %v4332_v57 = vld [vmem:[%s9338_s2 + $0x64] sm:$0xf]  ;;  %v4142_v58 = vld [vmem:[%s9338_s2 + $0x6c] sm:$0xf0] }
  0x11   :  { %4066 = vmatmul.msk.bf16.vlgmr.msra.gmra.mxu2 %vm278_vm0, %v4344_v46  ;;  %1829 = vmatpush.bf16.msrb.mxu1 %v4181_v47  ;;  %v4157_v55 = vor.u32 %v4335_v53, %v4154_v54  ;;  %v4145_v59 = vor.u32 %v4332_v57, %v4142_v58  ;;  %v4347_v60 = vld [vmem:[%s9336_s0 + $0x18] sm:$0xff]  ;;  %v4329_v61 = vld [vmem:[%s9338_s2 + $0x4c] sm:$0xf]  ;;  %v4348_v1 = vld [vmem:[%s9336_s0 + $0x20] sm:$0xff]  ;;  %s3848_s23 = sshll.u32 %s4940_s22, 4  ;;  %s3849_s23 = int_to_ptr.vmem [resolvable:$true] %s3848_s23 }
  0x12   :  { %v4130_v62 = vld [vmem:[%s9338_s2 + $0x54] sm:$0xf0]  ;;  %v4326_v3 = vld [vmem:[%s9338_s2 + $0x34] sm:$0xf]  ;;  %v4118_v4 = vld [vmem:[%s9338_s2 + $0x3c] sm:$0xf0] }
  0x13   :  { %v4133_v63 = vor.u32 %v4329_v61, %v4130_v62  ;;  %v4121_v5 = vor.u32 %v4326_v3, %v4118_v4  ;;  %v4349_v7 = vld [vmem:[%s9336_s0 + $0x28] sm:$0xff]  ;;  %v4184_v8 = vld [vmem:[%s9338_s2 + $0xb0] sm:$0xf]  ;;  %v4343_v9 = vld [vmem:[%s9338_s2 + $0xb8] sm:$0xf0] }
  0x14   :  { %4427 = vmatpush.bf16.msra.mxu3 %v4017_v15  ;;  %1782 = vmatpush.bf16.msrb.mxu0 %v5057_v28  ;;  %v4185_v10 = vor.u32 %v4343_v9, %v4184_v8  ;;  %v4323_v12 = vld [vmem:[%s9338_s2 + $0x1c] sm:$0xf]  ;;  %v4106_v13 = vld [vmem:[%s9338_s2 + $0x24] sm:$0xf0]  ;;  %v4320_v18 = vld [vmem:[%s9338_s2 + $0x4] sm:$0xf] }
  0x15   :  { %1830 = vmatpush.bf16.msrb.mxu1 %v4169_v51  ;;  %v4109_v14 = vor.u32 %v4323_v12, %v4106_v13  ;;  %v4351_v23 = vld [vmem:[%s9336_s0 + $0x38] sm:$0xff]  ;;  %v4340_v35 = vld [vmem:[%s9338_s2 + $0xa0] sm:$0xf0]  ;;  %v5261_v41 = vld [vmem:[%s9339_s3] sm:$0x7] }
  0x16   :  { %1878 = vmatpush.bf16.msrb.mxu2 %v4185_v10  ;;  %v4172_v33 = vld [vmem:[%s9338_s2 + $0x98] sm:$0xf]  ;;  %v5266_v42 = vld [vmem:[%s9340_s4] sm:$0x7]  ;;  %v5269_v44 = vperm.slane %v5261_v41, 0 }
  0x17   :  { %v4173_v36 = vor.u32 %v4340_v35, %v4172_v33  ;;  %v5273_v45 = vperm.slane %v5266_v42, 0  ;;  %v4160_v53 = vld [vmem:[%s9338_s2 + $0x80] sm:$0xf]  ;;  %v4337_v54 = vld [vmem:[%s9338_s2 + $0x88] sm:$0xf0] }
  0x18   :  { %4428 = vmatpush.bf16.msra.mxu3 %v4005_v19  ;;  %1783 = vmatpush.bf16.msrb.mxu0 %v5067_v31  ;;  %v4094_v19 = vld [vmem:[%s9338_s2 + $0xc] sm:$0xf0]  ;;  %9384 = vst [vmem:[#allocation17_spill] sm:$0xff] %v5269_v44  ;;  %v4352_v61 = vld [vmem:[%s9336_s0 + $0x40] sm:$0xff]  ;;  %v4334_v3 = vld [vmem:[%s9338_s2 + $0x70] sm:$0xf0] }
  0x19   :  { %1831 = vmatpush.bf16.msrb.mxu1 %v4157_v55  ;;  %v4097_v20 = vor.u32 %v4320_v18, %v4094_v19 }
  0x1a   :  { %1879 = vmatpush.bf16.msrb.mxu2 %v4173_v36 }
  0x1b   :  { %4041 = vmatmul.msk.bf16.gmra.mxu3 %vm278_vm0, %v4367_v16 }
  0x1c   :  { %1784 = vmatpush.bf16.msrb.mxu0 %v5078_v34 }
  0x1d   :  { %1832 = vmatpush.bf16.msrb.mxu1 %v4145_v59 }
  0x1e   :  { %4019 = vmatmul.msk.bf16.gmra.mxu0 %vm278_vm0, %v4345_v50  ;;  %4043 = vmatmul.msk.bf16.gmra.mxu1 %vm278_vm0, %v4345_v50 }
  0x20   :  { %1785 = vmatpush.bf16.msrb.mxu0 %v5088_v37 }
  0x21   :  { %4067 = vmatmul.msk.bf16.gmra.mxu2 %vm278_vm0, %v4345_v50  ;;  %1833 = vmatpush.bf16.msrb.mxu1 %v4133_v63 }
  0x24   :  { %1786 = vmatpush.bf16.msrb.mxu0 %v5098_v40 }
  0x25   :  { %1834 = vmatpush.bf16.msrb.mxu1 %v4121_v5 }
  0x28   :  { %1787 = vmatpush.bf16.msrb.mxu0 %v5108_v43 }
  0x29   :  { %1835 = vmatpush.bf16.msrb.mxu1 %v4109_v14 }
  0x2b   :  { %4064 = vmatmul.msk.bf16.vlgmr.msrb.gmra.mxu3 %vm278_vm0, %v5010_v11 }
  0x2c   :  { %873 = vmatpush.bf16.msrb.mxu3 %v5036_v22  ;;  %2736 = vmatpush.bf16.msra.mxu0 %v4181_v47 }
  0x2d   :  { %1836 = vmatpush.bf16.msrb.mxu1 %v4097_v20 }
  0x2e   :  { %4020 = vmatmul.msk.bf16.gmra.mxu0 %vm278_vm0, %v4346_v56  ;;  %4044 = vmatmul.msk.bf16.gmra.mxu1 %vm278_vm0, %v4346_v56 }
  0x30   :  { %874 = vmatpush.bf16.msrb.mxu3 %v5047_v25  ;;  %2737 = vmatpush.bf16.msra.mxu0 %v4169_v51 }
  0x31   :  { %4068 = vmatmul.msk.bf16.gmra.mxu2 %vm278_vm0, %v4346_v56  ;;  %2785 = vmatpush.bf16.msra.mxu1 %v4185_v10  ;;  %v4161_v56 = vor.u32 %v4337_v54, %v4160_v53  ;;  %v4354_v54 = vld [vmem:[%s9336_s0 + $0x50] sm:$0xff] }
  0x33   :  { %1880 = vmatpush.bf16.msrb.mxu2 %v4161_v56 }
  0x34   :  { %875 = vmatpush.bf16.msrb.mxu3 %v5057_v28  ;;  %2738 = vmatpush.bf16.msra.mxu0 %v4157_v55 }
  0x35   :  { %2786 = vmatpush.bf16.msra.mxu1 %v4173_v36 }
  0x38   :  { %876 = vmatpush.bf16.msrb.mxu3 %v5067_v31  ;;  %2739 = vmatpush.bf16.msra.mxu0 %v4145_v59 }
  0x39   :  { %2787 = vmatpush.bf16.msra.mxu1 %v4161_v56 }
  0x3b   :  { %4065 = vmatmul.msk.bf16.gmra.mxu3 %vm278_vm0, %v4367_v16 }
  0x3c   :  { %877 = vmatpush.bf16.msrb.mxu3 %v5078_v34  ;;  %2740 = vmatpush.bf16.msra.mxu0 %v4133_v63 }
  0x3e   :  { %4021 = vmatmul.msk.bf16.gmra.mxu0 %vm278_vm0, %v4347_v60  ;;  %4045 = vmatmul.msk.bf16.gmra.mxu1 %vm278_vm0, %v4347_v60 }
  0x40   :  { %878 = vmatpush.bf16.msrb.mxu3 %v5088_v37  ;;  %2741 = vmatpush.bf16.msra.mxu0 %v4121_v5 }
  0x41   :  { %4069 = vmatmul.msk.bf16.gmra.mxu2 %vm278_vm0, %v4347_v60 }
  0x44   :  { %879 = vmatpush.bf16.msrb.mxu3 %v5098_v40  ;;  %2742 = vmatpush.bf16.msra.mxu0 %v4109_v14 }
  0x48   :  { %880 = vmatpush.bf16.msrb.mxu3 %v5108_v43  ;;  %2743 = vmatpush.bf16.msra.mxu0 %v4097_v20 }
  0x4b   :  { %4088 = vmatmul.msk.bf16.vlgmr.msra.gmra.mxu3 %vm278_vm0, %v5010_v11 }
  0x4c   :  { %922 = vmatpush.bf16.msra.mxu3 %v4181_v47 }
  0x4e   :  { %4022 = vmatmul.msk.bf16.gmra.mxu0 %vm278_vm0, %v4348_v1  ;;  %4046 = vmatmul.msk.bf16.gmra.mxu1 %vm278_vm0, %v4348_v1 }
  0x50   :  { %923 = vmatpush.bf16.msra.mxu3 %v4169_v51 }
  0x51   :  { %4070 = vmatmul.msk.bf16.gmra.mxu2 %vm278_vm0, %v4348_v1  ;;  %v4148_v1 = vld [vmem:[%s9338_s2 + $0x68] sm:$0xf] }
  0x52   :  { %v4149_v4 = vor.u32 %v4334_v3, %v4148_v1 }
  0x54   :  { %924 = vmatpush.bf16.msra.mxu3 %v4157_v55  ;;  %1881 = vmatpush.bf16.msrb.mxu2 %v4149_v4 }
  0x55   :  { %2788 = vmatpush.bf16.msra.mxu1 %v4149_v4 }
  0x58   :  { %925 = vmatpush.bf16.msra.mxu3 %v4145_v59 }
  0x5b   :  { %4089 = vmatmul.msk.bf16.gmra.mxu3 %vm278_vm0, %v4367_v16  ;;  %v4350_v16 = vld [vmem:[%s9336_s0 + $0x30] sm:$0xff] }
  0x5c   :  { %926 = vmatpush.bf16.msra.mxu3 %v4133_v63 }
  0x5e   :  { %4023 = vmatmul.msk.bf16.gmra.mxu0 %vm278_vm0, %v4349_v7  ;;  %4047 = vmatmul.msk.bf16.gmra.mxu1 %vm278_vm0, %v4349_v7 }
  0x60   :  { %927 = vmatpush.bf16.msra.mxu3 %v4121_v5 }
  0x61   :  { %4071 = vmatmul.msk.bf16.gmra.mxu2 %vm278_vm0, %v4349_v7 }
  0x64   :  { %928 = vmatpush.bf16.msra.mxu3 %v4109_v14  ;;  %v4353_v14 = vld [vmem:[%s9336_s0 + $0x48] sm:$0xff] }
  0x68   :  { %929 = vmatpush.bf16.msra.mxu3 %v4097_v20 }
  0x6b   :  { %881 = vmatmul.bf16.vlgmr.msrb.gmra.mxu3 %v9344_v52 }
  0x6c   :  { %971 = vmatpush.bf16.msrb.mxu3 %v4185_v10 }
  0x6e   :  { %4024 = vmatmul.msk.bf16.gmra.mxu0 %vm278_vm0, %v4350_v16  ;;  %4048 = vmatmul.msk.bf16.gmra.mxu1 %vm278_vm0, %v4350_v16 }
  0x70   :  { %972 = vmatpush.bf16.msrb.mxu3 %v4173_v36 }
  0x71   :  { %4072 = vmatmul.msk.bf16.gmra.mxu2 %vm278_vm0, %v4350_v16 }
  0x74   :  { %973 = vmatpush.bf16.msrb.mxu3 %v4161_v56 }
  0x78   :  { %974 = vmatpush.bf16.msrb.mxu3 %v4149_v4 }
  0x7b   :  { %886 = vmatmul.bf16.gmra.mxu3 %v9344_v52 }
  0x7e   :  { %4025 = vmatmul.msk.bf16.gmra.mxu0 %vm278_vm0, %v4351_v23  ;;  %4049 = vmatmul.msk.bf16.gmra.mxu1 %vm278_vm0, %v4351_v23 }
  0x81   :  { %4073 = vmatmul.msk.bf16.gmra.mxu2 %vm278_vm0, %v4351_v23  ;;  %v4136_v23 = vld [vmem:[%s9338_s2 + $0x50] sm:$0xf] }
  0x8b   :  { %891 = vmatmul.bf16.gmra.mxu3 %v9344_v52  ;;  %v360_v27 = vpop.f32.mrf.mxu0  ;;  %v5310_v5 = vpop.f32.mrf.mxu1 }
  0x8c   :  { %v361_v47 = vadd.f32 %v360_v27, %v5269_v44  ;;  %v4331_v27 = vld [vmem:[%s9338_s2 + $0x58] sm:$0xf0] }
  0x8d   :  { %v4137_v33 = vor.u32 %v4331_v27, %v4136_v23 }
  0x8e   :  { %v5173_v0 = vpop.f32.mrf.mxu3  ;;  %4026 = vmatmul.msk.bf16.gmra.mxu0 %vm278_vm0, %v4352_v61  ;;  %4050 = vmatmul.msk.bf16.gmra.mxu1 %vm278_vm0, %v4352_v61 }
  0x8f   :  { %9372 = vst [vmem:[#allocation5_spill] sm:$0xff] %v5173_v0  ;;  %975 = vmatpush.bf16.msrb.mxu3 %v4137_v33  ;;  %1882 = vmatpush.bf16.msrb.mxu2 %v4137_v33 }
  0x90   :  { %2789 = vmatpush.bf16.msra.mxu1 %v4137_v33 }
  0x91   :  { %4074 = vmatmul.msk.bf16.gmra.mxu2 %vm278_vm0, %v4352_v61 }
  0x93   :  { %v5245_v30 = vpop.f32.mrf.mxu0  ;;  %v5317_v13 = vpop.f32.mrf.mxu1 }
  0x94   :  { %v5314_v9 = vpop.f32.mrf.mxu2 }
  0x96   :  { %v5181_v2 = vpop.f32.mrf.mxu3 }
  0x97   :  { %9373 = vst [vmem:[#allocation6_spill] sm:$0xff] %v5181_v2 }
  0x9b   :  { %896 = vmatmul.bf16.gmra.mxu3 %v9344_v52  ;;  %v365_v38 = vpop.f32.mrf.mxu0  ;;  %v5339_v35 = vpop.f32.mrf.mxu1 }
  0x9c   :  { %v366_v57 = vadd.f32 %v365_v38, %v5269_v44  ;;  %v5329_v19 = vpop.f32.mrf.mxu2 }
  0x9e   :  { %v5190_v6 = vpop.f32.mrf.mxu3  ;;  %4027 = vmatmul.msk.bf16.gmra.mxu0 %vm278_vm0, %v4353_v14  ;;  %4051 = vmatmul.msk.bf16.gmra.mxu1 %vm278_vm0, %v4353_v14 }
  0x9f   :  { %9374 = vst [vmem:[#allocation7_spill] sm:$0xff] %v5190_v6 }
  0xa1   :  { %4075 = vmatmul.msk.bf16.gmra.mxu2 %vm278_vm0, %v4353_v14  ;;  %v4355_v14 = vld [vmem:[%s9336_s0 + $0x58] sm:$0xff] }
  0xa3   :  { %v5275_v46 = vpop.f32.mrf.mxu0  ;;  %v5346_v53 = vpop.f32.mrf.mxu1 }
  0xa4   :  { %v5343_v38 = vpop.f32.mrf.mxu2 }
  0xa6   :  { %v5204_v11 = vpop.f32.mrf.mxu3 }
  0xa7   :  { %9375 = vst [vmem:[#allocation8_spill] sm:$0xff] %v5204_v11  ;;  %v4359_v11 = vld [vmem:[%s9336_s0 + $0x78] sm:$0xff] }
  0xab   :  { %901 = vmatmul.bf16.gmra.mxu3 %v9344_v52  ;;  %v370_v55 = vpop.f32.mrf.mxu0  ;;  %v5366_v1 = vpop.f32.mrf.mxu1 }
  0xac   :  { %v371_v8 = vadd.f32 %v370_v55, %v5269_v44  ;;  %v5356_v56 = vpop.f32.mrf.mxu2 }
  0xae   :  { %v5213_v15 = vpop.f32.mrf.mxu3  ;;  %4028 = vmatmul.msk.bf16.gmra.mxu0 %vm278_vm0, %v4354_v54  ;;  %4052 = vmatmul.msk.bf16.gmra.mxu1 %vm278_vm0, %v4354_v54 }
  0xaf   :  { %9376 = vst [vmem:[#allocation9_spill] sm:$0xff] %v5213_v15 }
  0xb1   :  { %4076 = vmatmul.msk.bf16.gmra.mxu2 %vm278_vm0, %v4354_v54 }
  0xb3   :  { %v5292_v60 = vpop.f32.mrf.mxu0 }
  0xb6   :  { %v5221_v17 = vpop.f32.mrf.mxu3 }
  0xb7   :  { %9377 = vst [vmem:[#allocation10_spill] sm:$0xff] %v5221_v17 }
  0xbb   :  { %906 = vmatmul.bf16.gmra.mxu3 %v9344_v52  ;;  %v375_v7 = vpop.f32.mrf.mxu0 }
  0xbc   :  { %v376_v36 = vadd.f32 %v375_v7, %v5269_v44  ;;  %v5372_v7 = vpop.f32.mrf.mxu2 }
  0xbe   :  { %v5230_v21 = vpop.f32.mrf.mxu3  ;;  %4029 = vmatmul.msk.bf16.gmra.mxu0 %vm278_vm0, %v4355_v14  ;;  %4053 = vmatmul.msk.bf16.gmra.mxu1 %vm278_vm0, %v4355_v14 }
  0xbf   :  { %9378 = vst [vmem:[#allocation11_spill] sm:$0xff] %v5230_v21 }
  0xc1   :  { %4077 = vmatmul.msk.bf16.gmra.mxu2 %vm278_vm0, %v4355_v14  ;;  %v4356_v14 = vld [vmem:[%s9336_s0 + $0x60] sm:$0xff] }
  0xc3   :  { %v5327_v18 = vpop.f32.mrf.mxu0 }
  0xc4   :  { %v5385_v33 = vpop.f32.mrf.mxu2 }
  0xc6   :  { %v5238_v24 = vpop.f32.mrf.mxu3 }
  0xc7   :  { %9379 = vst [vmem:[#allocation12_spill] sm:$0xff] %v5238_v24 }
  0xcb   :  { %911 = vmatmul.bf16.gmra.mxu3 %v9344_v52 }
  0xce   :  { %v5241_v26 = vpop.f32.mrf.mxu3  ;;  %4030 = vmatmul.msk.bf16.gmra.mxu0 %vm278_vm0, %v4356_v14  ;;  %4054 = vmatmul.msk.bf16.gmra.mxu1 %vm278_vm0, %v4356_v14 }
  0xcf   :  { %9380 = vst [vmem:[#allocation13_spill] sm:$0xff] %v5241_v26 }
  0xd1   :  { %4078 = vmatmul.msk.bf16.gmra.mxu2 %vm278_vm0, %v4356_v14  ;;  %v9385_v14 = vmov 0  }
  0xd6   :  { %v5243_v29 = vpop.f32.mrf.mxu3 }
  0xd7   :  { %9381 = vst [vmem:[#allocation14_spill] sm:$0xff] %v5243_v29 }
  0xdb   :  { %916 = vmatmul.bf16.gmra.mxu3 %v9344_v52 }
  0xde   :  { %v5248_v32 = vpop.f32.mrf.mxu3 }
  0xdf   :  { %9382 = vst [vmem:[#allocation15_spill] sm:$0xff] %v5248_v32 }
  0xe6   :  { %v5256_v39 = vpop.f32.mrf.mxu3 }
  0xe7   :  { %9383 = vst [vmem:[#allocation16_spill] sm:$0xff] %v5256_v39 }
  0xeb   :  { %930 = vmatmul.bf16.vlgmr.msra.gmra.mxu3 %v9344_v52 }
  0xee   :  { %v882_v48 = vpop.f32.mrf.mxu3 }
  0xef   :  { %v883_v49 = vadd.f32 %v882_v48, %v5273_v45  ;;  %v380_v48 = vpop.f32.mrf.mxu0 }
  0xf0   :  { %v381_v4 = vadd.f32 %v380_v48, %v5269_v44  ;;  %v4325_v48 = vld [vmem:[%s9338_s2 + $0x28] sm:$0xf0] }
  0xf1   :  { %v5279_v50 = vadd.f32 %v883_v49, %v361_v47 }
  0xf6   :  { %v5281_v51 = vpop.f32.mrf.mxu3 }
  0xf7   :  { %v5368_v3 = vpop.f32.mrf.mxu0 }
  0xfb   :  { %935 = vmatmul.bf16.gmra.mxu3 %v9344_v52 }
  0xfe   :  { %v887_v58 = vpop.f32.mrf.mxu3 }
  0xff   :  { %v888_v59 = vadd.f32 %v887_v58, %v5273_v45  ;;  %v4124_v58 = vld [vmem:[%s9338_s2 + $0x38] sm:$0xf]  ;;  %v385_v27 = vpop.f32.mrf.mxu0 }
 0x101   :  { %v5297_v62 = vadd.f32 %v888_v59, %v366_v57  ;;  %v4328_v59 = vld [vmem:[%s9338_s2 + $0x40] sm:$0xf0] }
 0x102   :  { %v4125_v61 = vor.u32 %v4328_v59, %v4124_v58  ;;  %v386_v59 = vadd.f32 %v385_v27, %v5269_v44  ;;  %v4100_v27 = vld [vmem:[%s9338_s2 + $0x8] sm:$0xf] }
 0x104   :  { %976 = vmatpush.bf16.msrb.mxu3 %v4125_v61  ;;  %1883 = vmatpush.bf16.msrb.mxu2 %v4125_v61 }
 0x105   :  { %2790 = vmatpush.bf16.msra.mxu1 %v4125_v61  ;;  %v5401_v61 = vpop.f32.mrf.mxu2 }
 0x106   :  { %v5302_v63 = vpop.f32.mrf.mxu3 }
 0x107   :  { %v5398_v58 = vpop.f32.mrf.mxu0 }
 0x10b   :  { %940 = vmatmul.bf16.gmra.mxu3 %v9344_v52 }
 0x10e   :  { %v892_v10 = vpop.f32.mrf.mxu3 }
 0x10f   :  { %v893_v12 = vadd.f32 %v892_v10, %v5273_v45 }
 0x111   :  { %v5322_v16 = vadd.f32 %v893_v12, %v371_v8  ;;  %v5375_v12 = vpop.f32.mrf.mxu1 }
 0x116   :  { %v5331_v20 = vpop.f32.mrf.mxu3 }
 0x119   :  { %v5395_v54 = vpop.f32.mrf.mxu1 }
 0x11b   :  { %945 = vmatmul.bf16.gmra.mxu3 %v9344_v52 }
 0x11e   :  { %v897_v47 = vpop.f32.mrf.mxu3 }
 0x11f   :  { %v898_v49 = vadd.f32 %v897_v47, %v5273_v45  ;;  %v4112_v47 = vld [vmem:[%s9338_s2 + $0x20] sm:$0xf] }
 0x121   :  { %v5351_v55 = vadd.f32 %v898_v49, %v376_v36  ;;  %v4113_v49 = vor.u32 %v4325_v48, %v4112_v47  ;;  %v4322_v48 = vld [vmem:[%s9338_s2 + $0x10] sm:$0xf0] }
 0x123   :  { %977 = vmatpush.bf16.msrb.mxu3 %v4113_v49  ;;  %1884 = vmatpush.bf16.msrb.mxu2 %v4113_v49 }
 0x124   :  { %2791 = vmatpush.bf16.msra.mxu1 %v4113_v49  ;;  %v5420_v49 = vpop.f32.mrf.mxu2 }
 0x126   :  { %v5358_v57 = vpop.f32.mrf.mxu3 }
 0x12b   :  { %950 = vmatmul.bf16.gmra.mxu3 %v9344_v52 }
 0x12c   :  { %v5429_v32 = vpop.f32.mrf.mxu2 }
 0x12d   :  { %9386 = vst [vmem:[#allocation18_spill] sm:$0xff] %v5429_v32 }
 0x12e   :  { %v902_v8 = vpop.f32.mrf.mxu3 }
 0x12f   :  { %v903_v10 = vadd.f32 %v902_v8, %v5273_v45 }
 0x131   :  { %v5380_v23 = vadd.f32 %v903_v10, %v381_v4  ;;  %v5404_v10 = vpop.f32.mrf.mxu1 }
 0x136   :  { %v5387_v36 = vpop.f32.mrf.mxu3 }
 0x13b   :  { %955 = vmatmul.bf16.gmra.mxu3 %v9344_v52  ;;  %v5424_v52 = vpop.f32.mrf.mxu1 }
 0x13e   :  { %v907_v4 = vpop.f32.mrf.mxu3 }
 0x13f   :  { %v908_v8 = vadd.f32 %v907_v4, %v5273_v45 }
 0x141   :  { %v5409_v47 = vadd.f32 %v908_v8, %v386_v59  ;;  %v390_v59 = vpop.f32.mrf.mxu0  ;;  %v4101_v8 = vor.u32 %v4322_v48, %v4100_v27 }
 0x142   :  { %v391_v39 = vadd.f32 %v390_v59, %v5269_v44 }
 0x143   :  { %978 = vmatpush.bf16.msrb.mxu3 %v4101_v8  ;;  %1885 = vmatpush.bf16.msrb.mxu2 %v4101_v8  ;;  %v5433_v24 = vpop.f32.mrf.mxu1 }
 0x144   :  { %2792 = vmatpush.bf16.msra.mxu1 %v4101_v8 }
 0x146   :  { %v5422_v4 = vpop.f32.mrf.mxu3 }
 0x147   :  { %2687 = vmatpush.bf16.msra.mxu3 %v5036_v22  ;;  %v4357_v22 = vld [vmem:[%s9336_s0 + $0x68] sm:$0xff] }
 0x148   :  { %4031 = vmatmul.msk.bf16.gmra.mxu0 %vm278_vm0, %v4357_v22  ;;  %4055 = vmatmul.msk.bf16.gmra.mxu1 %vm278_vm0, %v4357_v22 }
 0x149   :  { %v5435_v27 = vpop.f32.mrf.mxu0  ;;  %4079 = vmatmul.msk.bf16.gmra.mxu2 %vm278_vm0, %v4357_v22 }
 0x14b   :  { %960 = vmatmul.bf16.gmra.mxu3 %v9385_v14  ;;  %v5451_v59 = vpop.f32.mrf.mxu1 }
 0x14c   :  { %2688 = vmatpush.bf16.msra.mxu3 %v5047_v25  ;;  %v5446_v25 = vpop.f32.mrf.mxu2 }
 0x14d   :  { %9387 = vst [vmem:[#allocation19_spill] sm:$0xff] %v5446_v25 }
 0x14e   :  { %v912_v29 = vpop.f32.mrf.mxu3 }
 0x14f   :  { %v913_v26 = vadd.f32 %v912_v29, %v5273_v45 }
 0x150   :  { %2689 = vmatpush.bf16.msra.mxu3 %v5057_v28 }
 0x151   :  { %v5440_v48 = vadd.f32 %v913_v26, %v391_v39  ;;  %v395_v26 = vpop.f32.mrf.mxu0 }
 0x152   :  { %v396_v28 = vadd.f32 %v395_v26, %v5269_v44 }
 0x153   :  { %v5460_v21 = vpop.f32.mrf.mxu1 }
 0x154   :  { %2690 = vmatpush.bf16.msra.mxu3 %v5067_v31  ;;  %v5456_v39 = vpop.f32.mrf.mxu2  ;;  %9390 = vst [vmem:[#allocation22_spill] sm:$0xff] %v5460_v21  ;;  %v4358_v31 = vld [vmem:[%s9336_s0 + $0x70] sm:$0xff] }
 0x155   :  { %9389 = vst [vmem:[#allocation21_spill] sm:$0xff] %v5456_v39 }
 0x156   :  { %v5449_v29 = vpop.f32.mrf.mxu3 }
 0x157   :  { %9388 = vst [vmem:[#allocation20_spill] sm:$0xff] %v5449_v29 }
 0x158   :  { %2691 = vmatpush.bf16.msra.mxu3 %v5078_v34  ;;  %4032 = vmatmul.msk.bf16.gmra.mxu0 %vm278_vm0, %v4358_v31 }
 0x159   :  { %4056 = vmatmul.msk.bf16.gmra.mxu1 %vm278_vm0, %v4358_v31  ;;  %4080 = vmatmul.msk.bf16.gmra.mxu2 %vm278_vm0, %v4358_v31 }
 0x15b   :  { %965 = vmatmul.bf16.gmra.mxu3 %v9385_v14  ;;  %v5476_v26 = vpop.f32.mrf.mxu1 }
 0x15c   :  { %2692 = vmatpush.bf16.msra.mxu3 %v5088_v37  ;;  %v5471_v34 = vpop.f32.mrf.mxu2 }
 0x15d   :  { %9392 = vst [vmem:[#allocation24_spill] sm:$0xff] %v5471_v34 }
 0x15e   :  { %v917_v8 = vpop.f32.mrf.mxu3 }
 0x15f   :  { %v918_v22 = vadd.f32 %v917_v8, %v5273_v45 }
 0x160   :  { %2693 = vmatpush.bf16.msra.mxu3 %v5098_v40  ;;  %v5483_v40 = vperm.slane %v5261_v41, 1 }
 0x161   :  { %v5465_v17 = vadd.f32 %v918_v22, %v396_v28  ;;  %v5480_v28 = vperm.slane %v5266_v42, 1 }
 0x162   :  { %v490_v31 = vadd.f32 %v5310_v5, %v5483_v40  ;;  %v492_v5 = vadd.f32 %v5317_v13, %v5483_v40 }
 0x163   :  { %9391 = vst [vmem:[#allocation23_spill] sm:$0xff] %v5465_v17  ;;  %v5490_v15 = vpop.f32.mrf.mxu1 }
 0x164   :  { %2694 = vmatpush.bf16.msra.mxu3 %v5108_v43  ;;  %v5485_v8 = vpop.f32.mrf.mxu2  ;;  %9395 = vst [vmem:[#allocation27_spill] sm:$0xff] %v5490_v15 }
 0x165   :  { %9394 = vst [vmem:[#allocation26_spill] sm:$0xff] %v5485_v8 }
 0x166   :  { %v5474_v37 = vpop.f32.mrf.mxu3 }
 0x167   :  { %9393 = vst [vmem:[#allocation25_spill] sm:$0xff] %v5474_v37 }
 0x168   :  { %4033 = vmatmul.msk.bf16.gmra.mxu0 %vm278_vm0, %v4359_v11 }
 0x169   :  { %4057 = vmatmul.msk.bf16.gmra.mxu1 %vm278_vm0, %v4359_v11  ;;  %4081 = vmatmul.msk.bf16.gmra.mxu2 %vm278_vm0, %v4359_v11  ;;  %v495_v11 = vadd.f32 %v5339_v35, %v5483_v40 }
 0x16b   :  { %979 = vmatmul.bf16.vlgmr.msrb.gmra.mxu3 %v9385_v14  ;;  %v5507_v34 = vpop.f32.mrf.mxu1 }
 0x16c   :  { %v5500_v2 = vpop.f32.mrf.mxu2 }
 0x16d   :  { %9396 = vst [vmem:[#allocation28_spill] sm:$0xff] %v5500_v2 }
 0x16e   :  { %v931_v22 = vpop.f32.mrf.mxu3 }
 0x16f   :  { %v932_v43 = vadd.f32 %v931_v22, %v5480_v28  ;;  %v5504_v22 = vpop.f32.mrf.mxu0 }
 0x171   :  { %v5495_v6 = vadd.f32 %v932_v43, %v490_v31 }
 0x173   :  { %v5519_v13 = vpop.f32.mrf.mxu1 }
 0x174   :  { %v5512_v43 = vpop.f32.mrf.mxu2  ;;  %9399 = vst [vmem:[#allocation31_spill] sm:$0xff] %v5519_v13 }
 0x175   :  { %9397 = vst [vmem:[#allocation29_spill] sm:$0xff] %v5512_v43 }
 0x176   :  { %v933_v0 = vpop.f32.mrf.mxu3 }
 0x177   :  { %v934_v8 = vadd.f32 %v933_v0, %v5480_v28  ;;  %v5517_v25 = vpop.f32.mrf.mxu0  ;;  %v4360_v0 = vld [vmem:[%s9336_s0 + $0x80] sm:$0xff] }
 0x178   :  { %9398 = vst [vmem:[#allocation30_spill] sm:$0xff] %v5517_v25  ;;  %4034 = vmatmul.msk.bf16.gmra.mxu0 %vm278_vm0, %v4360_v0 }
 0x179   :  { %v5509_v31 = vadd.f32 %v934_v8, %v492_v5  ;;  %4058 = vmatmul.msk.bf16.gmra.mxu1 %vm278_vm0, %v4360_v0  ;;  %4082 = vmatmul.msk.bf16.gmra.mxu2 %vm278_vm0, %v4360_v0  ;;  %v500_v0 = vadd.f32 %v5366_v1, %v5483_v40 }
 0x17b   :  { %984 = vmatmul.bf16.gmra.mxu3 %v9385_v14  ;;  %v5536_v13 = vpop.f32.mrf.mxu1 }
 0x17c   :  { %v5529_v5 = vpop.f32.mrf.mxu2  ;;  %9402 = vst [vmem:[#allocation34_spill] sm:$0xff] %v5536_v13 }
 0x17d   :  { %9400 = vst [vmem:[#allocation32_spill] sm:$0xff] %v5529_v5 }
 0x17e   :  { %v936_v39 = vpop.f32.mrf.mxu3 }
 0x17f   :  { %v937_v2 = vadd.f32 %v936_v39, %v5480_v28  ;;  %v497_v39 = vadd.f32 %v5346_v53, %v5483_v40  ;;  %v5534_v43 = vpop.f32.mrf.mxu0 }
 0x180   :  { %9401 = vst [vmem:[#allocation33_spill] sm:$0xff] %v5534_v43 }
 0x181   :  { %v5524_v8 = vadd.f32 %v937_v2, %v495_v11 }
 0x183   :  { %v5548_v53 = vpop.f32.mrf.mxu1 }
 0x184   :  { %v5541_v11 = vpop.f32.mrf.mxu2  ;;  %9405 = vst [vmem:[#allocation37_spill] sm:$0xff] %v5548_v53 }
 0x185   :  { %9403 = vst [vmem:[#allocation35_spill] sm:$0xff] %v5541_v11 }
 0x186   :  { %v938_v35 = vpop.f32.mrf.mxu3 }
 0x187   :  { %v939_v25 = vadd.f32 %v938_v35, %v5480_v28  ;;  %v5546_v15 = vpop.f32.mrf.mxu0  ;;  %v4361_v35 = vld [vmem:[%s9336_s0 + $0x88] sm:$0xff] }
 0x188   :  { %9404 = vst [vmem:[#allocation36_spill] sm:$0xff] %v5546_v15  ;;  %4035 = vmatmul.msk.bf16.gmra.mxu0 %vm278_vm0, %v4361_v35 }
 0x189   :  { %v5538_v2 = vadd.f32 %v939_v25, %v497_v39  ;;  %4059 = vmatmul.msk.bf16.gmra.mxu1 %vm278_vm0, %v4361_v35  ;;  %4083 = vmatmul.msk.bf16.gmra.mxu2 %vm278_vm0, %v4361_v35  ;;  %v505_v35 = vadd.f32 %v5395_v54, %v5483_v40  ;;  %v4186_v54 = vmul.f32 -1.442695, %v5279_v50  ;;  %v368_v50 = vadd.f32 %v5275_v46, %v5269_v44 }
 0x18b   :  { %989 = vmatmul.bf16.gmra.mxu3 %v9385_v14  ;;  %v5565_v15 = vpop.f32.mrf.mxu1  ;;  %4433 = vpow2.f32 %v4186_v54 }
 0x18c   :  { %v5558_v39 = vpop.f32.mrf.mxu2  ;;  %9408 = vst [vmem:[#allocation40_spill] sm:$0xff] %v5565_v15 }
 0x18d   :  { %9406 = vst [vmem:[#allocation38_spill] sm:$0xff] %v5558_v39 }
 0x18e   :  { %v941_v37 = vpop.f32.mrf.mxu3 }
 0x18f   :  { %v942_v5 = vadd.f32 %v941_v37, %v5480_v28  ;;  %v502_v37 = vadd.f32 %v5375_v12, %v5483_v40  ;;  %v5563_v53 = vpop.f32.mrf.mxu0 }
 0x190   :  { %9407 = vst [vmem:[#allocation39_spill] sm:$0xff] %v5563_v53 }
 0x191   :  { %v5553_v25 = vadd.f32 %v942_v5, %v500_v0 }
 0x193   :  { %v5577_v12 = vpop.f32.mrf.mxu1 }
 0x194   :  { %v5570_v0 = vpop.f32.mrf.mxu2  ;;  %9411 = vst [vmem:[#allocation43_spill] sm:$0xff] %v5577_v12 }
 0x195   :  { %9409 = vst [vmem:[#allocation41_spill] sm:$0xff] %v5570_v0 }
 0x196   :  { %v943_v1 = vpop.f32.mrf.mxu3 }
 0x197   :  { %v944_v11 = vadd.f32 %v943_v1, %v5480_v28  ;;  %v5575_v13 = vpop.f32.mrf.mxu0  ;;  %v363_v1 = vadd.f32 %v5245_v30, %v5269_v44 }
 0x198   :  { %9410 = vst [vmem:[#allocation42_spill] sm:$0xff] %v5575_v13 }
 0x199   :  { %v5567_v5 = vadd.f32 %v944_v11, %v502_v37  ;;  %v885_v11 = vadd.f32 %v5281_v51, %v5273_v45  ;;  %v4362_v37 = vld [vmem:[%s9336_s0 + $0x90] sm:$0xff]  ;;  %v507_v51 = vadd.f32 %v5404_v10, %v5483_v40 }
 0x19a   :  { %4036 = vmatmul.msk.bf16.gmra.mxu0 %vm278_vm0, %v4362_v37  ;;  %4060 = vmatmul.msk.bf16.gmra.mxu1 %vm278_vm0, %v4362_v37 }
 0x19b   :  { %994 = vmatmul.bf16.gmra.mxu3 %v9385_v14  ;;  %4084 = vmatmul.msk.bf16.gmra.mxu2 %vm278_vm0, %v4362_v37  ;;  %v4188_v37 = vmul.f32 -1.442695, %v5297_v62 }
 0x19c   :  { %v5592_v13 = vpop.f32.mrf.mxu2 }
 0x19d   :  { %9412 = vst [vmem:[#allocation44_spill] sm:$0xff] %v5592_v13 }
 0x19e   :  { %v946_v43 = vpop.f32.mrf.mxu3 }
 0x19f   :  { %v947_v39 = vadd.f32 %v946_v43, %v5480_v28  ;;  %v1021_v43 = vadd.f32 %v885_v11, %v363_v1  ;;  %v5597_v15 = vpop.f32.mrf.mxu0  ;;  %v890_v1 = vadd.f32 %v5302_v63, %v5273_v45  ;;  %v4434_v11 = vpop.eup %4433  ;;  %v4363_v63 = vld [vmem:[%s9336_s0 + $0x98] sm:$0xff] }
 0x1a0   :  { %9413 = vst [vmem:[#allocation45_spill] sm:$0xff] %v5597_v15  ;;  %v4202_v15 = vmul.f32 -1.442695, %v5495_v6 }
 0x1a1   :  { %v5586_v0 = vadd.f32 %v947_v39, %v505_v35  ;;  %v5599_v39 = vpop.f32.mrf.mxu1  ;;  %v4187_v35 = vmul.f32 -1.442695, %v1021_v43 }
 0x1a2   :  { %9414 = vst [vmem:[#allocation46_spill] sm:$0xff] %v5599_v39 }
 0x1a3   :  { %4435 = vpow2.f32 %v4187_v35 }
 0x1a4   :  { %v5608_v10 = vpop.f32.mrf.mxu2  ;;  %4437 = vpow2.f32 %v4188_v37  ;;  %v4190_v37 = vmul.f32 -1.442695, %v5322_v16  ;;  %v378_v16 = vadd.f32 %v5327_v18, %v5269_v44 }
 0x1a5   :  { %9415 = vst [vmem:[#allocation47_spill] sm:$0xff] %v5608_v10 }
 0x1a6   :  { %v948_v30 = vpop.f32.mrf.mxu3 }
 0x1a7   :  { %v949_v12 = vadd.f32 %v948_v30, %v5480_v28  ;;  %v1023_v30 = vadd.f32 %v890_v1, %v368_v50  ;;  %v5614_v43 = vpop.f32.mrf.mxu0 }
 0x1a8   :  { %9416 = vst [vmem:[#allocation48_spill] sm:$0xff] %v5614_v43 }
 0x1a9   :  { %v5601_v53 = vadd.f32 %v949_v12, %v507_v51  ;;  %v510_v12 = vadd.f32 %v5424_v52, %v5483_v40  ;;  %v5616_v46 = vpop.f32.mrf.mxu1  ;;  %v5621_v51 = vadd.f32 1.0, %v4434_v11  ;;  %v4436_v62 = vpop.eup %4435  ;;  %v4189_v50 = vmul.f32 -1.442695, %v1023_v30 }
 0x1aa   :  { %9417 = vst [vmem:[#allocation49_spill] sm:$0xff] %v5616_v46  ;;  %4037 = vmatmul.msk.bf16.gmra.mxu0 %vm278_vm0, %v4363_v63  ;;  %4061 = vmatmul.msk.bf16.gmra.mxu1 %vm278_vm0, %v4363_v63  ;;  %v373_v52 = vadd.f32 %v5292_v60, %v5269_v44  ;;  %v5633_v1 = vadd.f32 1.0, %v4436_v62  ;;  %v4364_v46 = vld [vmem:[%s9336_s0 + $0xa0] sm:$0xff] }
 0x1ab   :  { %999 = vmatmul.bf16.gmra.mxu3 %v9385_v14  ;;  %4085 = vmatmul.msk.bf16.gmra.mxu2 %vm278_vm0, %v4363_v63  ;;  %4439 = vrcp.f32 %v5621_v51  ;;  %v4438_v63 = vpop.eup %4437  ;;  %vm1105_vm2 = vweird.f32 %v5621_v51 }
 0x1ac   :  { %v5635_v11 = vpop.f32.mrf.mxu2  ;;  %4441 = vpow2.f32 %v4189_v50  ;;  %v5647_v62 = vadd.f32 1.0, %v4438_v63  ;;  %vm1120_vm4 = vweird.f32 %v5633_v1 }
 0x1ad   :  { %9419 = vst [vmem:[#allocation51_spill] sm:$0xff] %v5635_v11  ;;  %4443 = vrcp.f32 %v5633_v1 }
 0x1ae   :  { %v951_v13 = vpop.f32.mrf.mxu3  ;;  %4445 = vpow2.f32 %v4190_v37  ;;  %vm1135_vm9 = vweird.f32 %v5647_v62 }
 0x1af   :  { %v952_v54 = vadd.f32 %v951_v13, %v5480_v28  ;;  %v895_v13 = vadd.f32 %v5331_v20, %v5273_v45  ;;  %4447 = vrcp.f32 %v5647_v62 }
 0x1b1   :  { %v5623_v35 = vadd.f32 %v952_v54, %v510_v12  ;;  %v5640_v12 = vpop.f32.mrf.mxu0  ;;  %v5642_v54 = vpop.f32.mrf.mxu1  ;;  %v1025_v60 = vadd.f32 %v895_v13, %v373_v52 }
 0x1b2   :  { %9421 = vst [vmem:[#allocation53_spill] sm:$0xff] %v5640_v12  ;;  %v5645_v20 = vpop.eup %4439  ;;  %v900_v12 = vadd.f32 %v5358_v57, %v5273_v45 }
 0x1b3   :  { %9418 = vst [vmem:[#allocation50_spill] sm:$0xff] %v5623_v35  ;;  %v4442_v50 = vpop.eup %4441  ;;  %v4191_v11 = vmul.f32 -1.442695, %v1025_v60  ;;  %v1101_v13 = vmul.f32 %v5645_v20, %v5621_v51  ;;  %v515_v60 = vadd.f32 %v5451_v59, %v5483_v40  ;;  %vm1106_vm1 = vweird.f32 %v5645_v20 }
 0x1b4   :  { %9422 = vst [vmem:[#allocation54_spill] sm:$0xff] %v5642_v54  ;;  %v5654_v54 = vpop.f32.mrf.mxu2  ;;  %v5658_v37 = vpop.eup %4443  ;;  %v5661_v63 = vadd.f32 1.0, %v4442_v50  ;;  %v1027_v10 = vadd.f32 %v900_v12, %v378_v16  ;;  %vm5719_vm3 = vmor %vm1105_vm2, %vm1106_vm1  ;;  %v4203_v35 = vmul.f32 -1.442695, %v5509_v31 }
 0x1b5   :  { %9423 = vst [vmem:[#allocation55_spill] sm:$0xff] %v5654_v54  ;;  %v4446_v57 = vpop.eup %4445  ;;  %4449 = vpow2.f32 %v4191_v11  ;;  %v4192_v54 = vmul.f32 -1.442695, %v5351_v55  ;;  %v1102_v59 = vsub.f32 1.0, %v1101_v13  ;;  %v1116_v55 = vmul.f32 %v5658_v37, %v5633_v1 }
 0x1b6   :  { %v5638_v30 = vpop.f32.mrf.mxu3  ;;  %4451 = vrcp.f32 %v5661_v63  ;;  %v4193_v11 = vmul.f32 -1.442695, %v1027_v10  ;;  %v5684_v12 = vpop.eup %4447  ;;  %vm1121_vm5 = vweird.f32 %v5658_v37  ;;  %vm1150_vm14 = vweird.f32 %v5661_v63 }
 0x1b7   :  { %9420 = vst [vmem:[#allocation52_spill] sm:$0xff] %v5638_v30  ;;  %4453 = vpow2.f32 %v4192_v54  ;;  %v1103_v13 = vmul.f32 %v5645_v20, %v1102_v59  ;;  %vm5756_vm7 = vmor %vm1120_vm4, %vm1121_vm5  ;;  %vm1136_vm10 = vweird.f32 %v5684_v12 }
 0x1b8   :  { %vm5807_vm12 = vmor %vm1135_vm9, %vm1136_vm10 }
 0x1b9   :  { %v5666_v43 = vpop.f32.mrf.mxu1  ;;  %v5674_v50 = vpop.f32.mrf.mxu0  ;;  %v1104_v59 = vadd.f32 %v5645_v20, %v1103_v13 }
 0x1ba   :  { %9424 = vst [vmem:[#allocation56_spill] sm:$0xff] %v5666_v43  ;;  %4038 = vmatmul.msk.bf16.gmra.mxu0 %vm278_vm0, %v4364_v46  ;;  %4062 = vmatmul.msk.bf16.gmra.mxu1 %vm278_vm0, %v4364_v46  ;;  %v1117_v43 = vsub.f32 1.0, %v1116_v55 }
 0x1bb   :  { %1004 = vmatmul.bf16.gmra.mxu3 %v9385_v14  ;;  %9426 = vst [vmem:[#allocation58_spill] sm:$0xff] %v5674_v50  ;;  %4086 = vmatmul.msk.bf16.gmra.mxu2 %vm278_vm0, %v4364_v46  ;;  %v1131_v46 = vmul.f32 %v5684_v12, %v5647_v62 }
 0x1bc   :  { %v5686_v16 = vpop.f32.mrf.mxu2 }
 0x1bd   :  { %9427 = vst [vmem:[#allocation59_spill] sm:$0xff] %v5686_v16  ;;  %v1111_v16 = vand.u32 2147483648, %v5621_v51 }
 0x1be   :  { %v956_v52 = vpop.f32.mrf.mxu3 }
 0x1bf   :  { %v957_v18 = vadd.f32 %v956_v52, %v5480_v28  ;;  %v5679_v52 = vadd.f32 1.0, %v4446_v57 }
 0x1c1   :  { %v5672_v39 = vadd.f32 %v957_v18, %v515_v60  ;;  %v4450_v60 = vpop.eup %4449  ;;  %4455 = vrcp.f32 %v5679_v52  ;;  %v5692_v57 = vpop.f32.mrf.mxu1  ;;  %vm1165_vm1 = vweird.f32 %v5679_v52 }
 0x1c2   :  { %9429 = vst [vmem:[#allocation61_spill] sm:$0xff] %v5692_v57  ;;  %4457 = vpow2.f32 %v4193_v11  ;;  %v5696_v54 = vpop.eup %4451  ;;  %v5698_v10 = vadd.f32 1.0, %v4450_v60  ;;  %v5705_v55 = vpop.f32.mrf.mxu0  ;;  %v1118_v11 = vmul.f32 %v5658_v37, %v1117_v43  ;;  %v1109_v60 = vand.u32 2147483647, %v5621_v51 }
 0x1c3   :  { %9425 = vst [vmem:[#allocation57_spill] sm:$0xff] %v5672_v39  ;;  %v4454_v50 = vpop.eup %4453  ;;  %v1132_v57 = vsub.f32 1.0, %v1131_v46  ;;  %v1146_v17 = vmul.f32 %v5696_v54, %v5661_v63  ;;  %v1112_v43 = vor.u32 1.1754944e-38, %v1111_v16  ;;  %v1124_v39 = vand.u32 2147483647, %v5633_v1 }
 0x1c4   :  { %9430 = vst [vmem:[#allocation62_spill] sm:$0xff] %v5705_v55  ;;  %4459 = vrcp.f32 %v5698_v10  ;;  %v5715_v6 = vadd.f32 1.0, %v4454_v50  ;;  %v5717_v13 = vpop.f32.mrf.mxu2  ;;  %v1126_v50 = vand.u32 2147483648, %v5633_v1  ;;  %v1119_v16 = vadd.f32 %v5658_v37, %v1118_v11 }
 0x1c5   :  { %9431 = vst [vmem:[#allocation63_spill] sm:$0xff] %v5717_v13  ;;  %4461 = vpow2.f32 %v4202_v15  ;;  %v520_v13 = vadd.f32 %v5476_v26, %v5483_v40  ;;  %v4365_v15 = vld [vmem:[%s9336_s0 + $0xa8] sm:$0xff]  ;;  %v1141_v55 = vand.u32 2147483648, %v5647_v62  ;;  %v1147_v30 = vsub.f32 1.0, %v1146_v17  ;;  %s4941_s0 = smov 64  }
 0x1c6   :  { %v5688_v18 = vpop.f32.mrf.mxu3  ;;  %4463 = vrcp.f32 %v5715_v6  ;;  %vm1110_vm6 = vcmp.eq.f32.partialorder %v1109_v60, 8.507059e+37  ;;  %vm5760_vm8 = vcmp.eq.f32.partialorder %v1124_v39, 8.507059e+37  ;;  %v1123_v1 = vsel %vm5756_vm7, %v5658_v37, %v1119_v16 }
 0x1c7   :  { %9428 = vst [vmem:[#allocation60_spill] sm:$0xff] %v5688_v18  ;;  %v5712_v21 = vpop.eup %4455  ;;  %v1108_v18 = vsel %vm5719_vm3, %v5645_v20, %v1104_v59  ;;  %v1133_v20 = vmul.f32 %v5684_v12, %v1132_v57  ;;  %v1139_v59 = vand.u32 2147483647, %v5647_v62  ;;  %v1127_v60 = vor.u32 1.1754944e-38, %v1126_v50 }
 0x1c8   :  { %v4458_v51 = vpop.eup %4457  ;;  %v1161_v11 = vmul.f32 %v5712_v21, %v5679_v52  ;;  %v5768_v31 = vsel %vm1110_vm6, %v1112_v43, %v1108_v18  ;;  %v1142_v37 = vor.u32 1.1754944e-38, %v1141_v55  ;;  %v1148_v43 = vmul.f32 %v5696_v54, %v1147_v30 }
 0x1c9   :  { %v5732_v29 = vpop.f32.mrf.mxu1  ;;  %v5743_v26 = vadd.f32 1.0, %v4458_v51  ;;  %v1134_v39 = vadd.f32 %v5684_v12, %v1133_v20  ;;  %vm5777_vm11 = vcmp.eq.f32.partialorder %v1139_v59, 8.507059e+37  ;;  %v5795_v20 = vsel %vm5760_vm8, %v1127_v60, %v1123_v1 }
 0x1ca   :  { %9434 = vst [vmem:[#allocation64_spill] sm:$0xff] %v5732_v29  ;;  %v5750_v29 = vperm.slane %v5261_v41, 2  ;;  %4039 = vmatmul.msk.bf16.gmra.mxu0 %vm278_vm0, %v4365_v15  ;;  %4063 = vmatmul.msk.bf16.gmra.mxu1 %vm278_vm0, %v4365_v15  ;;  %v5765_v57 = vpop.eup %4459  ;;  %v4194_v41 = vmul.f32 -1.442695, %v5380_v23  ;;  %v5782_v23 = vpop.f32.mrf.mxu0  ;;  %v1162_v50 = vsub.f32 1.0, %v1161_v11  ;;  %v1156_v30 = vand.u32 2147483648, %v5661_v63 }
 0x1cb   :  { %1009 = vmatmul.bf16.gmra.mxu3 %v9385_v14  ;;  %4087 = vmatmul.msk.bf16.gmra.mxu2 %vm278_vm0, %v4365_v15  ;;  %4465 = vrcp.f32 %v5743_v26  ;;  %9442 = vst [vmem:[#allocation66_spill] sm:$0xff] %v5782_v23  ;;  %v1176_v59 = vmul.f32 %v5765_v57, %v5698_v10  ;;  %v383_v11 = vadd.f32 %v5368_v3, %v5269_v44  ;;  %v1171_v1 = vand.u32 2147483648, %v5679_v52 }
 0x1cc   :  { %9435 = vst [vmem:[#allocation65_spill] sm:$0xff] %v5750_v29  ;;  %v5784_v18 = vpop.f32.mrf.mxu2  ;;  %v5789_v16 = vadd.f32 %v5314_v9, %v5750_v29  ;;  %4467 = vpow2.f32 %v4203_v35  ;;  %v1154_v35 = vand.u32 2147483647, %v5661_v63  ;;  %v905_v62 = vadd.f32 %v5387_v36, %v5273_v45 }
 0x1cd   :  { %9443 = vst [vmem:[#allocation67_spill] sm:$0xff] %v5784_v18  ;;  %4469 = vpow2.f32 %v4194_v41  ;;  %v1169_v41 = vand.u32 2147483647, %v5679_v52  ;;  %vm1151_vm13 = vweird.f32 %v5696_v54  ;;  %v1163_v18 = vmul.f32 %v5712_v21, %v1162_v50 }
 0x1ce   :  { %v961_v46 = vpop.f32.mrf.mxu3  ;;  %v4204_v3 = vmul.f32 -1.442695, %v5524_v8  ;;  %v5835_v36 = vadd.f32 %v5329_v19, %v5750_v29  ;;  %vm5839_vm15 = vcmp.eq.f32.partialorder %v1154_v35, 8.507059e+37  ;;  %v1157_v8 = vor.u32 1.1754944e-38, %v1156_v30  ;;  %vm5847_vm0 = vmor %vm1150_vm14, %vm1151_vm13 }
 0x1cf   :  { %v962_v32 = vadd.f32 %v961_v46, %v5480_v28  ;;  %vm5852_vm2 = vcmp.eq.f32.partialorder %v1169_v41, 8.507059e+37  ;;  %v1164_v51 = vadd.f32 %v5712_v21, %v1163_v18  ;;  %vm1166_vm3 = vweird.f32 %v5712_v21 }
 0x1d0   :  { %vm5885_vm4 = vmor %vm1165_vm1, %vm1166_vm3  ;;  %vm1180_vm5 = vweird.f32 %v5698_v10  ;;  %v1186_v52 = vand.u32 2147483648, %v5698_v10  ;;  %vm1181_vm6 = vweird.f32 %v5765_v57  ;;  %vm1195_vm10 = vweird.f32 %v5715_v6 }
 0x1d1   :  { %v5745_v46 = vadd.f32 %v962_v32, %v520_v13  ;;  %v4462_v13 = vpop.eup %4461  ;;  %v1138_v32 = vsel %vm5807_vm12, %v5684_v12, %v1134_v39  ;;  %v5822_v60 = vpop.f32.mrf.mxu1  ;;  %v1177_v12 = vsub.f32 1.0, %v1176_v59  ;;  %vm5929_vm8 = vmor %vm1180_vm5, %vm1181_vm6  ;;  %vm1210_vm13 = vweird.f32 %v5743_v26 }
 0x1d2   :  { %v5799_v17 = vpop.eup %4463  ;;  %v5801_v55 = vadd.f32 1.0, %v4462_v13  ;;  %9446 = vst [vmem:[#allocation68_spill] sm:$0xff] %v5822_v60  ;;  %v1149_v13 = vadd.f32 %v5696_v54, %v1148_v43  ;;  %v5845_v50 = vsel %vm5777_vm11, %v1142_v37, %v1138_v32  ;;  %v1029_v60 = vadd.f32 %v905_v62, %v383_v11  ;;  %v5871_v62 = vpop.f32.mrf.mxu0 }
 0x1d3   :  { %v1191_v39 = vmul.f32 %v5799_v17, %v5715_v6  ;;  %v5831_v9 = vpop.eup %4465  ;;  %v5863_v37 = vadd.f32 %v5343_v38, %v5750_v29  ;;  %v1178_v41 = vmul.f32 %v5765_v57, %v1177_v12  ;;  %v525_v11 = vadd.f32 %v5507_v34, %v5483_v40  ;;  %9453 = vst [vmem:[#allocation69_spill] sm:$0xff] %v5871_v62 }
 0x1d4   :  { %4471 = vrcp.f32 %v5801_v55  ;;  %v4468_v63 = vpop.eup %4467  ;;  %v1153_v30 = vsel %vm5847_vm0, %v5696_v54, %v1149_v13  ;;  %v5873_v18 = vpop.f32.mrf.mxu2  ;;  %v1206_v38 = vmul.f32 %v5831_v9, %v5743_v26  ;;  %v1184_v34 = vand.u32 2147483647, %v5698_v10 }
 0x1d5   :  { %v4470_v35 = vpop.eup %4469  ;;  %4473 = vpow2.f32 %v4204_v3  ;;  %v1192_v23 = vsub.f32 1.0, %v1191_v39  ;;  %9454 = vst [vmem:[#allocation70_spill] sm:$0xff] %v5873_v18  ;;  %v5881_v3 = vsel %vm5839_vm15, %v1157_v8, %v1153_v30  ;;  %v1168_v43 = vsel %vm5885_vm4, %v5712_v21, %v1164_v51 }
 0x1d6   :  { %v5791_v15 = vpop.f32.mrf.mxu3  ;;  %v5877_v13 = vadd.f32 1.0, %v4470_v35  ;;  %v4205_v8 = vmul.f32 -1.442695, %v5538_v2  ;;  %v1179_v30 = vadd.f32 %v5765_v57, %v1178_v41  ;;  %vm5914_vm7 = vcmp.eq.f32.partialorder %v1184_v34, 8.507059e+37 }
 0x1d7   :  { %v1187_v12 = vor.u32 1.1754944e-38, %v1186_v52  ;;  %vm1196_vm9 = vweird.f32 %v5799_v17  ;;  %v4196_v52 = vmul.f32 -1.442695, %v5409_v47  ;;  %v1216_v47 = vand.u32 2147483648, %v5743_v26 }
 0x1d8   :  { %vm5965_vm12 = vmor %vm1195_vm10, %vm1196_vm9  ;;  %v4206_v51 = vmul.f32 -1.442695, %v5553_v25  ;;  %vm1211_vm14 = vweird.f32 %v5831_v9  ;;  %v910_v25 = vadd.f32 %v5422_v4, %v5273_v45  ;;  %vm1425_vm3 = vweird.f32 %v5801_v55 }
 0x1d9   :  { %v5895_v35 = vpop.f32.mrf.mxu1  ;;  %vm6014_vm0 = vmor %vm1210_vm13, %vm1211_vm14  ;;  %vm1225_vm5 = vweird.f32 %v5877_v13 }
 0x1da   :  { %v5891_v39 = vpop.eup %4471  ;;  %9457 = vst [vmem:[#allocation71_spill] sm:$0xff] %v5895_v35 }
 0x1db   :  { %1014 = vmatmul.bf16.gmra.mxu3 %v9385_v14  ;;  %v1172_v14 = vor.u32 1.1754944e-38, %v1171_v1  ;;  %v5866_v1 = vadd.f32 1.0, %v4468_v63  ;;  %v4195_v63 = vmul.f32 -1.442695, %v1029_v60  ;;  %v5907_v60 = vadd.f32 %v5398_v58, %v5269_v44  ;;  %v4474_v21 = vpop.eup %4473 }
 0x1dc   :  { %v1421_v2 = vmul.f32 %v5891_v39, %v5801_v55  ;;  %v5921_v58 = vadd.f32 %v5356_v56, %v5750_v29  ;;  %v5940_v19 = vadd.f32 1.0, %v4474_v21  ;;  %v5957_v21 = vpop.f32.mrf.mxu0  ;;  %vm1426_vm1 = vweird.f32 %v5891_v39 }
 0x1dd   :  { %4475 = vrcp.f32 %v5866_v1  ;;  %v5925_v41 = vsel %vm5852_vm2, %v1172_v14, %v1168_v43  ;;  %v5942_v14 = vpop.f32.mrf.mxu2  ;;  %9465 = vst [vmem:[#allocation73_spill] sm:$0xff] %v5957_v21  ;;  %vm6053_vm4 = vmor %vm1425_vm3, %vm1426_vm1  ;;  %vm1440_vm9 = vweird.f32 %v5866_v1 }
 0x1de   :  { %v966_v32 = vpop.f32.mrf.mxu3  ;;  %4477 = vrcp.f32 %v5877_v13  ;;  %9462 = vst [vmem:[#allocation72_spill] sm:$0xff] %v5942_v14  ;;  %v1231_v14 = vand.u32 2147483648, %v5877_v13 }
 0x1df   :  { %v967_v54 = vadd.f32 %v966_v32, %v5480_v28  ;;  %v1193_v32 = vmul.f32 %v5799_v17, %v1192_v23  ;;  %v1201_v23 = vand.u32 2147483648, %v5715_v6  ;;  %4479 = vpow2.f32 %v4195_v63 }
 0x1e0   :  { %4481 = vpow2.f32 %v4205_v8  ;;  %v1183_v63 = vsel %vm5929_vm8, %v5765_v57, %v1179_v30  ;;  %v5953_v57 = vadd.f32 %v5372_v7, %v5750_v29  ;;  %v1422_v8 = vsub.f32 1.0, %v1421_v2 }
 0x1e1   :  { %v5893_v59 = vadd.f32 %v967_v54, %v525_v11  ;;  %v1199_v11 = vand.u32 2147483647, %v5715_v6  ;;  %v1207_v54 = vsub.f32 1.0, %v1206_v38  ;;  %v1194_v56 = vadd.f32 %v5799_v17, %v1193_v32  ;;  %v5959_v38 = vpop.f32.mrf.mxu1 }
 0x1e2   :  { %v1202_v30 = vor.u32 1.1754944e-38, %v1201_v23  ;;  %9466 = vst [vmem:[#allocation74_spill] sm:$0xff] %v5959_v38  ;;  %v5963_v6 = vsel %vm5914_vm7, %v1187_v12, %v1183_v63  ;;  %v1214_v7 = vand.u32 2147483647, %v5743_v26  ;;  %v5976_v2 = vadd.f32 %v5435_v27, %v5269_v44 }
 0x1e3   :  { %vm5945_vm11 = vcmp.eq.f32.partialorder %v1199_v11, 8.507059e+37  ;;  %v1208_v43 = vmul.f32 %v5831_v9, %v1207_v54  ;;  %v5955_v32 = vpop.eup %4475  ;;  %v1198_v23 = vsel %vm5965_vm12, %v5799_v17, %v1194_v56  ;;  %4483 = vrcp.f32 %v5940_v19 }
 0x1e4   :  { %v5972_v54 = vpop.eup %4477  ;;  %v5985_v63 = vperm.slane %v5266_v42, 2  ;;  %4485 = vpow2.f32 %v4196_v52  ;;  %v1423_v11 = vmul.f32 %v5891_v39, %v1422_v8  ;;  %v1436_v17 = vmul.f32 %v5955_v32, %v5866_v1 }
 0x1e5   :  { %v4480_v12 = vpop.eup %4479  ;;  %v1209_v38 = vadd.f32 %v5831_v9, %v1208_v43  ;;  %v5996_v56 = vadd.f32 %v5385_v33, %v5750_v29  ;;  %vm5998_vm15 = vcmp.eq.f32.partialorder %v1214_v7, 8.507059e+37  ;;  %v1217_v43 = vor.u32 1.1754944e-38, %v1216_v47 }
 0x1e6   :  { %v5933_v34 = vpop.f32.mrf.mxu3  ;;  %v4482_v27 = vpop.eup %4481  ;;  %v1221_v52 = vmul.f32 %v5972_v54, %v5877_v13  ;;  %v6004_v35 = vadd.f32 1.0, %v4480_v12  ;;  %4487 = vpow2.f32 %v4206_v51  ;;  %v6008_v8 = vsel %vm5945_vm11, %v1202_v30, %v1198_v23 }
 0x1e7   :  { %v1229_v7 = vand.u32 2147483647, %v5877_v13  ;;  %v6019_v47 = vadd.f32 1.0, %v4482_v27  ;;  %v6022_v51 = vpop.f32.mrf.mxu2  ;;  %v1213_v10 = vsel %vm6014_vm0, %v5831_v9, %v1209_v38  ;;  %v6027_v30 = vor.u32 1.1754944e-38, %v1231_v14 }
 0x1e8   :  { %9473 = vst [vmem:[#allocation75_spill] sm:$0xff] %v6022_v51  ;;  %v1031_v26 = vadd.f32 %v910_v25, %v5907_v60  ;;  %v1437_v23 = vsub.f32 1.0, %v1436_v17  ;;  %v1424_v21 = vadd.f32 %v5891_v39, %v1423_v11  ;;  %v1222_v62 = vsub.f32 1.0, %v1221_v52  ;;  %v6049_v25 = vpop.f32.mrf.mxu0 }
 0x1e9   :  { %v6032_v18 = vpop.eup %4483  ;;  %v6036_v51 = vpop.f32.mrf.mxu1  ;;  %vm1226_vm2 = vweird.f32 %v5972_v54  ;;  %4489 = vrcp.f32 %v6004_v35  ;;  %v4207_v60 = vmul.f32 -1.442695, %v5567_v5  ;;  %v1429_v14 = vand.u32 2147483647, %v5801_v55 }
 0x1ea   :  { %v4486_v9 = vpop.eup %4485  ;;  %v6045_v38 = vadd.f32 %v5401_v61, %v5750_v29  ;;  %4491 = vrcp.f32 %v6019_v47  ;;  %v6059_v5 = vsel %vm5998_vm15, %v1217_v43, %v1213_v10  ;;  %v1451_v17 = vmul.f32 %v6032_v18, %v5940_v19  ;;  %vm6119_vm11 = vmor %vm1225_vm5, %vm1226_vm2 }
 0x1eb   :  { %v1438_v52 = vmul.f32 %v5955_v32, %v1437_v23  ;;  %v6068_v33 = vadd.f32 1.0, %v4486_v9  ;;  %v1223_v42 = vmul.f32 %v5972_v54, %v1222_v62  ;;  %v6073_v43 = vadd.f32 %v5504_v22, %v5269_v44 }
 0x1ec   :  { %v4488_v61 = vpop.eup %4487  ;;  %vm1430_vm6 = vcmp.eq.f32.partialorder %v1429_v14, 8.507059e+37  ;;  %vm6079_vm7 = vcmp.eq.f32.partialorder %v1229_v7, 8.507059e+37  ;;  %v1246_v62 = vand.u32 2147483648, %v6004_v35  ;;  %v1452_v22 = vsub.f32 1.0, %v1451_v17 }
 0x1ed   :  { %v1439_v9 = vadd.f32 %v5955_v32, %v1438_v52  ;;  %vm1441_vm8 = vweird.f32 %v5955_v32  ;;  %v1224_v11 = vadd.f32 %v5972_v54, %v1223_v42  ;;  %vm1456_vm13 = vweird.f32 %v6032_v18 }
 0x1ee   :  { %v980_v4 = vpop.f32.mrf.mxu3  ;;  %vm6101_vm10 = vmor %vm1440_vm9, %vm1441_vm8  ;;  %vm1455_vm15 = vweird.f32 %v5940_v19  ;;  %vm1240_vm1 = vweird.f32 %v6004_v35 }
 0x1ef   :  { %v981_v12 = vadd.f32 %v980_v4, %v5985_v63  ;;  %v1431_v4 = vand.u32 2147483648, %v5801_v55  ;;  %v4197_v55 = vmul.f32 -1.442695, %v1031_v26  ;;  %vm6166_vm0 = vmor %vm1455_vm15, %vm1456_vm13 }
 0x1f1   :  { %v1660_v27 = vmul.f32 %v5768_v31, %v981_v12  ;;  %v1432_v12 = vor.u32 1.1754944e-38, %v1431_v4  ;;  %v6084_v4 = vpop.eup %4489 }
 0x1f2   :  { %v6090_v14 = vpop.eup %4491  ;;  %vm1241_vm14 = vweird.f32 %v6084_v4 }
 0x1f3   :  { %v1676_v31 = vadd.f32 %v1660_v27, %v5789_v16  ;;  %v1428_v16 = vsel %vm6053_vm4, %v5891_v39, %v1424_v21  ;;  %v6076_v27 = vadd.f32 1.0, %v4488_v61  ;;  %v4208_v61 = vmul.f32 -1.442695, %v5586_v0 }
 0x1f4   :  { %v1433_v21 = vsel %vm1430_vm6, %v1432_v12, %v1428_v16  ;;  %v1236_v0 = vmul.f32 %v6084_v4, %v6004_v35  ;;  %v1228_v12 = vsel %vm6119_vm11, %v5972_v54, %v1224_v11  ;;  %vm1471_vm3 = vweird.f32 %v6090_v14  ;;  %vm6231_vm6 = vmor %vm1240_vm1, %vm1241_vm14 }
 0x1f5   :  { %4493 = vtanh.f32 %v1676_v31  ;;  %v1446_v31 = vand.u32 2147483648, %v5866_v1  ;;  %v1708_v17 = vsub.f32 1.0, %v1433_v21  ;;  %vm1470_vm4 = vweird.f32 %v6019_v47 }
 0x1f6   :  { %4495 = vpow2.f32 %v4207_v60  ;;  %v982_v10 = vpop.f32.mrf.mxu3  ;;  %v6088_v60 = vpop.f32.mrf.mxu2  ;;  %vm6215_vm5 = vmor %vm1470_vm4, %vm1471_vm3  ;;  %vm1255_vm14 = vweird.f32 %v6068_v33 }
 0x1f7   :  { %v983_v39 = vadd.f32 %v982_v10, %v5985_v63  ;;  %4497 = vpow2.f32 %v4197_v55  ;;  %9478 = vst [vmem:[#allocation76_spill] sm:$0xff] %v6088_v60  ;;  %v1444_v55 = vand.u32 2147483647, %v5866_v1  ;;  %v6105_v10 = vpop.f32.mrf.mxu1  ;;  %v1466_v1 = vmul.f32 %v6090_v14, %v6019_v47 }
 0x1f8   :  { %4499 = vrcp.f32 %v6068_v33  ;;  %9481 = vst [vmem:[#allocation77_spill] sm:$0xff] %v6105_v10  ;;  %v6123_v10 = vpop.f32.mrf.mxu0 }
 0x1f9   :  { %v1661_v7 = vmul.f32 %v5795_v20, %v983_v39  ;;  %4501 = vrcp.f32 %v6076_v27  ;;  %v1740_v20 = vmul.f32 0.0, %v1433_v21  ;;  %v1443_v39 = vsel %vm6101_vm10, %v5955_v32, %v1439_v9 }
 0x1fa   :  { %v6128_v32 = vor.u32 1.1754944e-38, %v1246_v62  ;;  %vm1445_vm12 = vcmp.eq.f32.partialorder %v1444_v55, 8.507059e+37  ;;  %v1237_v62 = vsub.f32 1.0, %v1236_v0  ;;  %v1467_v11 = vsub.f32 1.0, %v1466_v1 }
 0x1fb   :  { %v4494_v16 = vpop.eup %4493  ;;  %v1677_v52 = vadd.f32 %v1661_v7, %v5835_v36  ;;  %v1453_v36 = vmul.f32 %v6032_v18, %v1452_v22  ;;  %v1447_v7 = vor.u32 1.1754944e-38, %v1446_v31  ;;  %v6134_v22 = vadd.f32 %v5420_v49, %v5750_v29 }
 0x1fc   :  { %v4496_v42 = vpop.eup %4495  ;;  %v1724_v26 = vmul.f32 %v4494_v16, %v1708_v17  ;;  %v6148_v49 = vsel %vm6079_vm7, %v6027_v30, %v1228_v12  ;;  %v1461_v55 = vand.u32 2147483648, %v5940_v19  ;;  %v1261_v0 = vand.u32 2147483648, %v6068_v33 }
 0x1fd   :  { %4503 = vtanh.f32 %v1677_v52  ;;  %v6130_v9 = vpop.eup %4497  ;;  %v6140_v16 = vadd.f32 1.0, %v4496_v42  ;;  %v1448_v54 = vsel %vm1445_vm12, %v1447_v7, %v1443_v39  ;;  %v1454_v21 = vadd.f32 %v6032_v18, %v1453_v36  ;;  %v9488_v7 = vld [vmem:[#allocation52_spill] sm:$0xff] }
 0x1fe   :  { %4505 = vpow2.f32 %v4208_v61  ;;  %v985_v13 = vpop.f32.mrf.mxu3  ;;  %v6136_v17 = vadd.f32 %v1740_v20, %v1724_v26  ;;  %v6138_v31 = vpop.eup %4499  ;;  %v4209_v42 = vmul.f32 -1.442695, %v5601_v53  ;;  %v1709_v1 = vsub.f32 1.0, %v1448_v54 }
 0x1ff   :  { %v986_v52 = vadd.f32 %v985_v13, %v5985_v63  ;;  %v6150_v26 = vpop.eup %4501  ;;  %v1459_v30 = vand.u32 2147483647, %v5940_v19  ;;  %v6160_v23 = vpop.f32.mrf.mxu2  ;;  %4507 = vrcp.f32 %v6140_v16  ;;  %v1741_v36 = vmul.f32 0.0, %v1448_v54 }
 0x200   :  { %9484 = vst [vmem:[#allocation78_spill] sm:$0xff] %v6160_v23  ;;  %v1238_v53 = vmul.f32 %v6084_v4, %v1237_v62  ;;  %v1481_v19 = vmul.f32 %v6150_v26, %v6076_v27  ;;  %v4198_v54 = vmul.f32 -1.442695, %v5440_v48  ;;  %v1462_v62 = vor.u32 1.1754944e-38, %v1461_v55  ;;  %v6181_v20 = vpop.f32.mrf.mxu1 }
 0x201   :  { %v1662_v61 = vmul.f32 %v5845_v50, %v986_v52  ;;  %v1468_v52 = vmul.f32 %v6090_v14, %v1467_v11  ;;  %vm1460_vm2 = vcmp.eq.f32.partialorder %v1459_v30, 8.507059e+37  ;;  %v6190_v11 = vpop.f32.mrf.mxu0  ;;  %vm1486_vm9 = vweird.f32 %v6150_v26 }
 0x202   :  { %vm1485_vm10 = vweird.f32 %v6076_v27  ;;  %vm1256_vm12 = vweird.f32 %v6138_v31 }
 0x203   :  { %v4504_v39 = vpop.eup %4503  ;;  %v1678_v50 = vadd.f32 %v1662_v61, %v5863_v37  ;;  %v1458_v37 = vsel %vm6166_vm0, %v6032_v18, %v1454_v21  ;;  %v512_v61 = vadd.f32 %v5433_v24, %v5483_v40  ;;  %v6193_v24 = vadd.f32 %v6084_v4, %v1238_v53  ;;  %vm6278_vm11 = vmor %vm1485_vm10, %vm1486_vm9 }
 0x204   :  { %v4506_v12 = vpop.eup %4505  ;;  %v1725_v13 = vmul.f32 %v4504_v39, %v1709_v1  ;;  %v6185_v1 = vor.u32 1.1754944e-38, %v1261_v0  ;;  %v1463_v48 = vsel %vm1460_vm2, %v1462_v62, %v1458_v37  ;;  %v1482_v21 = vsub.f32 1.0, %v1481_v19  ;;  %vm6363_vm4 = vmor %vm1255_vm14, %vm1256_vm12 }
 0x205   :  { %4509 = vtanh.f32 %v1678_v50  ;;  %v6187_v39 = vadd.f32 1.0, %v4506_v12  ;;  %v6199_v0 = vpop.eup %4507  ;;  %v9487_v50 = vld [vmem:[#allocation50_spill] sm:$0xff]  ;;  %v954_v53 = vadd.f32 %v9488_v7, %v5480_v28  ;;  %v1474_v12 = vand.u32 2147483647, %v6019_v47 }
 0x206   :  { %4511 = vpow2.f32 %v4209_v42  ;;  %v987_v23 = vpop.f32.mrf.mxu3  ;;  %v6183_v60 = vadd.f32 %v1741_v36, %v1725_v13  ;;  %v1469_v42 = vadd.f32 %v6090_v14, %v1468_v52  ;;  %v4210_v36 = vmul.f32 -1.442695, %v9487_v50  ;;  %v9497_v52 = vld [vmem:[#allocation20_spill] sm:$0xff] }
 0x207   :  { %v988_v18 = vadd.f32 %v987_v23, %v5985_v63  ;;  %4513 = vpow2.f32 %v4198_v54  ;;  %v1476_v23 = vand.u32 2147483648, %v6019_v47  ;;  %v1710_v19 = vsub.f32 1.0, %v1463_v48  ;;  %v6224_v50 = vpop.f32.mrf.mxu2 }
 0x208   :  { %v1772_v55 = vpack.c.bf16 %v6183_v60, %v6136_v17  ;;  %v6209_v37 = vadd.f32 1.0, %v6130_v9  ;;  %4515 = vrcp.f32 %v6187_v39  ;;  %v1742_v54 = vmul.f32 0.0, %v1463_v48  ;;  %9491 = vst [vmem:[#allocation50_spill] sm:$0xff] %v6224_v50 }
 0x209   :  { %v1663_v30 = vmul.f32 %v5881_v3, %v988_v18  ;;  %v1496_v47 = vmul.f32 %v6199_v0, %v6140_v16  ;;  %v1473_v9 = vsel %vm6215_vm5, %v6090_v14, %v1469_v42  ;;  %v9494_v48 = vand.u32 2147483647, %v6004_v35 }
 0x20a   :  { %1788 = vmatmul.bf16.vlgmr.msrb.gmra.mxu0 %v1772_v55  ;;  %1837 = vmatmul.bf16.vlgmr.msrb.gmra.mxu1 %v1772_v55  ;;  %v1477_v14 = vor.u32 1.1754944e-38, %v1476_v23  ;;  %v1251_v42 = vmul.f32 %v6138_v31, %v6068_v33  ;;  %v1349_v7 = vadd.f32 %v954_v53, %v512_v61  ;;  %vm1475_vm8 = vcmp.eq.f32.partialorder %v1474_v12, 8.507059e+37  ;;  %v9499_v53 = vld [vmem:[#allocation18_spill] sm:$0xff] }
 0x20b   :  { %v4510_v13 = vpop.eup %4509  ;;  %v1679_v3 = vadd.f32 %v1663_v30, %v5921_v58  ;;  %1886 = vmatmul.bf16.vlgmr.msrb.gmra.mxu2 %v1772_v55  ;;  %v1483_v58 = vmul.f32 %v6150_v26, %v1482_v21  ;;  %vm6237_vm7 = vcmp.eq.f32.partialorder %v9494_v48, 8.507059e+37  ;;  %v1243_v21 = vsel %vm6231_vm6, %v6084_v4, %v6193_v24  ;;  %v6256_v4 = vpop.f32.mrf.mxu1 }
 0x20c   :  { %v4512_v62 = vpop.eup %4511  ;;  %v1726_v18 = vmul.f32 %v4510_v13, %v1710_v19  ;;  %v1478_v55 = vsel %vm1475_vm8, %v1477_v14, %v1473_v9  ;;  %9498 = vst [vmem:[#allocation52_spill] sm:$0xff] %v6256_v4  ;;  %v1497_v24 = vsub.f32 1.0, %v1496_v47  ;;  %v6265_v12 = vadd.f32 %v9499_v53, %v5750_v29 }
 0x20d   :  { %4517 = vtanh.f32 %v1679_v3  ;;  %v6249_v35 = vpop.eup %4513  ;;  %v915_v3 = vadd.f32 %v9497_v52, %v5273_v45  ;;  %v6253_v23 = vadd.f32 1.0, %v4512_v62  ;;  %v1484_v61 = vadd.f32 %v6150_v26, %v1483_v58  ;;  %v6268_v62 = vpop.f32.mrf.mxu0 }
 0x20e   :  { %4519 = vpow2.f32 %v4210_v36  ;;  %v990_v19 = vpop.f32.mrf.mxu3  ;;  %v6247_v13 = vadd.f32 %v1742_v54, %v1726_v18  ;;  %v6261_v36 = vpop.eup %4515  ;;  %9500 = vst [vmem:[#allocation20_spill] sm:$0xff] %v6268_v62  ;;  %v1491_v9 = vand.u32 2147483648, %v6076_v27  ;;  %v1252_v18 = vsub.f32 1.0, %v1251_v42 }
 0x20f   :  { %v991_v48 = vadd.f32 %v990_v19, %v5985_v63  ;;  %4521 = vrcp.f32 %v6209_v37  ;;  %v4211_v14 = vmul.f32 -1.442695, %v1349_v7  ;;  %v1711_v19 = vsub.f32 1.0, %v1478_v55 }
 0x210   :  { %v1489_v47 = vand.u32 2147483647, %v6076_v27  ;;  %v1033_v52 = vadd.f32 %v915_v3, %v5976_v2  ;;  %4523 = vrcp.f32 %v6253_v23  ;;  %v1743_v4 = vmul.f32 0.0, %v1478_v55 }
 0x211   :  { %v1664_v54 = vmul.f32 %v5925_v41, %v991_v48  ;;  %v1511_v7 = vmul.f32 %v6261_v36, %v6187_v39  ;;  %v1488_v2 = vsel %vm6278_vm11, %v6150_v26, %v1484_v61  ;;  %v1498_v27 = vmul.f32 %v6199_v0, %v1497_v24  ;;  %v6299_v26 = vpop.f32.mrf.mxu2 }
 0x212   :  { %v6292_v3 = vsel %vm6237_vm7, %v6128_v32, %v1243_v21  ;;  %v1253_v55 = vmul.f32 %v6138_v31, %v1252_v18  ;;  %vm1490_vm13 = vcmp.eq.f32.partialorder %v1489_v47, 8.507059e+37  ;;  %9503 = vst [vmem:[#allocation18_spill] sm:$0xff] %v6299_v26  ;;  %v4199_v61 = vmul.f32 -1.442695, %v1033_v52 }
 0x213   :  { %v4518_v58 = vpop.eup %4517  ;;  %v1680_v53 = vadd.f32 %v1664_v54, %v5953_v57  ;;  %v1492_v57 = vor.u32 1.1754944e-38, %v1491_v9  ;;  %v1512_v21 = vsub.f32 1.0, %v1511_v7  ;;  %vm1501_vm15 = vweird.f32 %v6199_v0 }
 0x214   :  { %v4520_v42 = vpop.eup %4519  ;;  %v1727_v48 = vmul.f32 %v4518_v58, %v1711_v19  ;;  %vm1500_vm0 = vweird.f32 %v6140_v16  ;;  %v1506_v52 = vand.u32 2147483648, %v6140_v16  ;;  %v6318_v41 = vadd.f32 %v6138_v31, %v1253_v55 }
 0x215   :  { %4525 = vtanh.f32 %v1680_v53  ;;  %v6295_v54 = vpop.eup %4521  ;;  %v6303_v9 = vadd.f32 1.0, %v4520_v42  ;;  %v1493_v30 = vsel %vm1490_vm13, %v1492_v57, %v1488_v2  ;;  %v6315_v53 = vpop.f32.mrf.mxu1  ;;  %v9505_v42 = vld [vmem:[#allocation57_spill] sm:$0xff]  ;;  %vm6334_vm1 = vmor %vm1500_vm0, %vm1501_vm15  ;;  %v1276_v62 = vand.u32 2147483648, %v6209_v37 }
 0x216   :  { %4527 = vpow2.f32 %v4211_v14  ;;  %v992_v19 = vpop.f32.mrf.mxu3  ;;  %v6297_v58 = vadd.f32 %v1743_v4, %v1727_v48  ;;  %v1499_v4 = vadd.f32 %v6199_v0, %v1498_v27  ;;  %v6310_v14 = vpop.eup %4523  ;;  %9504 = vst [vmem:[#allocation79_spill] sm:$0xff] %v6315_v53  ;;  %v4212_v7 = vmul.f32 -1.442695, %v9505_v42  ;;  %v9506_v48 = vld [vmem:[#allocation60_spill] sm:$0xff] }
 0x217   :  { %v993_v32 = vadd.f32 %v992_v19, %v5985_v63  ;;  %v959_v2 = vadd.f32 %v9506_v48, %v5480_v28  ;;  %v1504_v27 = vand.u32 2147483647, %v6140_v16  ;;  %v1712_v57 = vsub.f32 1.0, %v1493_v30  ;;  %v9507_v19 = vld [vmem:[#allocation22_spill] sm:$0xff]  ;;  %v6328_v55 = vpop.f32.mrf.mxu0 }
 0x218   :  { %v1773_v18 = vpack.c.bf16 %v6297_v58, %v6247_v13  ;;  %4529 = vrcp.f32 %v6303_v9  ;;  %9508 = vst [vmem:[#allocation57_spill] sm:$0xff] %v6328_v55  ;;  %v1744_v48 = vmul.f32 0.0, %v1493_v30  ;;  %v9511_v53 = vand.u32 2147483647, %v6068_v33 }
 0x219   :  { %v1665_v47 = vmul.f32 %v5963_v6, %v993_v32  ;;  %v517_v32 = vadd.f32 %v9507_v19, %v5483_v40  ;;  %v1526_v19 = vmul.f32 %v6310_v14, %v6253_v23  ;;  %v6351_v55 = vadd.f32 1.0, %v6249_v35 }
 0x21a   :  { %1793 = vmatmul.bf16.gmra.mxu0 %v1773_v18  ;;  %1842 = vmatmul.bf16.gmra.mxu1 %v1773_v18  ;;  %vm6346_vm2 = vcmp.eq.f32.partialorder %v9511_v53, 8.507059e+37  ;;  %v1507_v30 = vor.u32 1.1754944e-38, %v1506_v52  ;;  %vm1505_vm3 = vcmp.eq.f32.partialorder %v1504_v27, 8.507059e+37  ;;  %v6367_v52 = vpop.f32.mrf.mxu2  ;;  %vm1516_vm5 = vweird.f32 %v6261_v36 }
 0x21b   :  { %v4526_v6 = vpop.eup %4525  ;;  %v1681_v24 = vadd.f32 %v1665_v47, %v5996_v56  ;;  %1891 = vmatmul.bf16.gmra.mxu2 %v1773_v18  ;;  %v1503_v56 = vsel %vm6334_vm1, %v6199_v0, %v1499_v4  ;;  %v1513_v47 = vmul.f32 %v6261_v36, %v1512_v21  ;;  %v1351_v50 = vadd.f32 %v959_v2, %v517_v32 }
 0x21c   :  { %v4528_v26 = vpop.eup %4527  ;;  %v1728_v18 = vmul.f32 %v4526_v6, %v1712_v57  ;;  %v1508_v53 = vsel %vm1505_vm3, %v1507_v30, %v1503_v56  ;;  %9517 = vst [vmem:[#allocation22_spill] sm:$0xff] %v6367_v52  ;;  %v1521_v2 = vand.u32 2147483648, %v6187_v39  ;;  %v6382_v27 = vmul.f32 %v6295_v54, %v6209_v37 }
 0x21d   :  { %4531 = vtanh.f32 %v1681_v24  ;;  %v6356_v21 = vadd.f32 1.0, %v4528_v26  ;;  %v1527_v24 = vsub.f32 1.0, %v1526_v19  ;;  %v1258_v26 = vsel %vm6363_vm4, %v6138_v31, %v6318_v41  ;;  %v6388_v19 = vpop.f32.mrf.mxu1 }
 0x21e   :  { %4533 = vpow2.f32 %v4212_v7  ;;  %v995_v42 = vpop.f32.mrf.mxu3  ;;  %v6354_v0 = vadd.f32 %v1744_v48, %v1728_v18  ;;  %v1514_v7 = vadd.f32 %v6261_v36, %v1513_v47  ;;  %v4213_v57 = vmul.f32 -1.442695, %v1351_v50  ;;  %9518 = vst [vmem:[#allocation80_spill] sm:$0xff] %v6388_v19 }
 0x21f   :  { %4535 = vpow2.f32 %v4199_v61  ;;  %v996_v4 = vadd.f32 %v995_v42, %v5985_v63  ;;  %v6375_v61 = vpop.eup %4529  ;;  %v1713_v6 = vsub.f32 1.0, %v1508_v53  ;;  %vm1515_vm6 = vweird.f32 %v6187_v39  ;;  %v6404_v42 = vpop.f32.mrf.mxu0 }
 0x220   :  { %9514 = vst [vmem:[#allocation60_spill] sm:$0xff] %v6354_v0  ;;  %4537 = vrcp.f32 %v6351_v55  ;;  %v1519_v32 = vand.u32 2147483647, %v6187_v39  ;;  %v1745_v41 = vmul.f32 0.0, %v1508_v53  ;;  %vm6392_vm7 = vmor %vm1515_vm6, %vm1516_vm5  ;;  %v6396_v50 = vor.u32 1.1754944e-38, %v1276_v62 }
 0x221   :  { %v1666_v33 = vmul.f32 %v6008_v8, %v996_v4  ;;  %4539 = vrcp.f32 %v6356_v21  ;;  %v1541_v39 = vmul.f32 %v6375_v61, %v6303_v9  ;;  %v1528_v47 = vmul.f32 %v6310_v14, %v1527_v24  ;;  %9521 = vst [vmem:[#allocation81_spill] sm:$0xff] %v6404_v42 }
 0x222   :  { %v1522_v4 = vor.u32 1.1754944e-38, %v1521_v2  ;;  %v6409_v62 = vsel %vm6346_vm2, %v6185_v1, %v1258_v26  ;;  %vm1520_vm8 = vcmp.eq.f32.partialorder %v1519_v32, 8.507059e+37  ;;  %vm1531_vm9 = vweird.f32 %v6310_v14 }
 0x223   :  { %v4532_v48 = vpop.eup %4531  ;;  %v1682_v31 = vadd.f32 %v1666_v33, %v6045_v38  ;;  %v1518_v38 = vsel %vm6392_vm7, %v6261_v36, %v1514_v7  ;;  %v1267_v36 = vsub.f32 1.0, %v6382_v27  ;;  %v1542_v1 = vsub.f32 1.0, %v1541_v39  ;;  %v9523_v27 = vld [vmem:[#allocation23_spill] sm:$0xff] }
 0x224   :  { %v4534_v56 = vpop.eup %4533  ;;  %v1729_v18 = vmul.f32 %v4532_v48, %v1713_v6  ;;  %v1523_v6 = vsel %vm1520_vm8, %v1522_v4, %v1518_v38  ;;  %v4200_v48 = vmul.f32 -1.442695, %v9523_v27  ;;  %vm1530_vm10 = vweird.f32 %v6253_v23  ;;  %v6435_v38 = vpop.f32.mrf.mxu2  ;;  %v9525_v4 = vld [vmem:[#allocation27_spill] sm:$0xff] }
 0x225   :  { %v4536_v30 = vpop.eup %4535  ;;  %4541 = vtanh.f32 %v1682_v31  ;;  %v6417_v7 = vadd.f32 1.0, %v4534_v56  ;;  %v4214_v8 = vmul.f32 -1.442695, %v5745_v46  ;;  %v964_v56 = vadd.f32 %v5791_v15, %v5480_v28  ;;  %9524 = vst [vmem:[#allocation23_spill] sm:$0xff] %v6435_v38  ;;  %vm6443_vm11 = vmor %vm1530_vm10, %vm1531_vm9  ;;  %v6457_v38 = vpop.f32.mrf.mxu1 }
 0x226   :  { %4543 = vpow2.f32 %v4213_v57  ;;  %v997_v35 = vpop.f32.mrf.mxu3  ;;  %v6412_v33 = vadd.f32 %v1745_v41, %v1729_v18  ;;  %v6415_v24 = vpop.eup %4537  ;;  %v1529_v57 = vadd.f32 %v6310_v14, %v1528_v47  ;;  %v1536_v41 = vand.u32 2147483648, %v6253_v23  ;;  %9529 = vst [vmem:[#allocation27_spill] sm:$0xff] %v6457_v38  ;;  %v9632_v38 = vld [vmem:[#allocation59_spill] sm:$0xff] }
 0x227   :  { %v998_v2 = vadd.f32 %v997_v35, %v5985_v63  ;;  %v6425_v32 = vpop.eup %4539  ;;  %v1534_v39 = vand.u32 2147483647, %v6253_v23  ;;  %v1714_v18 = vsub.f32 1.0, %v1523_v6  ;;  %4545 = vrcp.f32 %v6417_v7 }
 0x228   :  { %9522 = vst [vmem:[#allocation82_spill] sm:$0xff] %v6412_v33  ;;  %v1774_v26 = vpack.c.bf16 %v6412_v33, %v6354_v0  ;;  %v1746_v15 = vmul.f32 0.0, %v1523_v6  ;;  %v1533_v27 = vsel %vm6443_vm11, %v6310_v14, %v1529_v57  ;;  %v1543_v53 = vmul.f32 %v6375_v61, %v1542_v1  ;;  %v6464_v1 = vpop.f32.mrf.mxu0 }
 0x229   :  { %v1667_v31 = vmul.f32 %v6059_v5, %v998_v2  ;;  %v522_v5 = vadd.f32 %v9525_v4, %v5483_v40  ;;  %v1556_v2 = vmul.f32 %v6425_v32, %v6356_v21  ;;  %v1537_v16 = vor.u32 1.1754944e-38, %v1536_v41  ;;  %9531 = vst [vmem:[#allocation83_spill] sm:$0xff] %v6464_v1 }
 0x22a   :  { %1798 = vmatmul.bf16.gmra.mxu0 %v1774_v26  ;;  %1847 = vmatmul.bf16.gmra.mxu1 %v1774_v26  ;;  %vm1535_vm12 = vcmp.eq.f32.partialorder %v1534_v39, 8.507059e+37  ;;  %v1268_v57 = vmul.f32 %v6295_v54, %v1267_v36  ;;  %v1544_v41 = vadd.f32 %v6375_v61, %v1543_v53  ;;  %vm1546_vm13 = vweird.f32 %v6375_v61 }
 0x22b   :  { %v4542_v47 = vpop.eup %4541  ;;  %v1683_v35 = vadd.f32 %v1667_v31, %v6134_v22  ;;  %1896 = vmatmul.bf16.gmra.mxu2 %v1774_v26  ;;  %v6453_v22 = vadd.f32 1.0, %v4536_v30  ;;  %v9528_v26 = vld [vmem:[#allocation25_spill] sm:$0xff]  ;;  %v1353_v6 = vadd.f32 %v964_v56, %v522_v5  ;;  %v1538_v30 = vsel %vm1535_vm12, %v1537_v16, %v1533_v27 }
 0x22c   :  { %v4544_v23 = vpop.eup %4543  ;;  %v1730_v4 = vmul.f32 %v4542_v47, %v1714_v18  ;;  %v920_v31 = vadd.f32 %v9528_v26, %v5273_v45  ;;  %v1557_v18 = vsub.f32 1.0, %v1556_v2  ;;  %vm1271_vm14 = vweird.f32 %v6295_v54  ;;  %v6493_v2 = vpop.f32.mrf.mxu2 }
 0x22d   :  { %4547 = vtanh.f32 %v1683_v35  ;;  %v6461_v46 = vadd.f32 1.0, %v4544_v23  ;;  %v4215_v16 = vmul.f32 -1.442695, %v1353_v6  ;;  %v1715_v36 = vsub.f32 1.0, %v1538_v30  ;;  %9535 = vst [vmem:[#allocation84_spill] sm:$0xff] %v6493_v2 }
 0x22e   :  { %4549 = vpow2.f32 %v4214_v8  ;;  %v1000_v52 = vpop.f32.mrf.mxu3  ;;  %v6459_v42 = vadd.f32 %v1746_v15, %v1730_v4  ;;  %v6469_v8 = vpop.eup %4545  ;;  %v1035_v56 = vadd.f32 %v920_v31, %v6073_v43  ;;  %vm1545_vm15 = vweird.f32 %v6303_v9 }
 0x22f   :  { %v1001_v14 = vadd.f32 %v1000_v52, %v5985_v63  ;;  %4551 = vpow2.f32 %v4200_v48  ;;  %v1551_v52 = vand.u32 2147483648, %v6303_v9  ;;  %v1549_v53 = vand.u32 2147483647, %v6303_v9  ;;  %vm6483_vm1 = vmor %vm1545_vm15, %vm1546_vm13 }
 0x230   :  { %9530 = vst [vmem:[#allocation25_spill] sm:$0xff] %v6459_v42  ;;  %4553 = vrcp.f32 %v6453_v22  ;;  %v1747_v5 = vmul.f32 0.0, %v1538_v30  ;;  %vm1270_vm0 = vweird.f32 %v6209_v37  ;;  %v1571_v9 = vmul.f32 %v6469_v8, %v6417_v7  ;;  %v6524_v43 = vpop.f32.mrf.mxu0 }
 0x231   :  { %v1668_v39 = vmul.f32 %v6148_v49, %v1001_v14  ;;  %4555 = vrcp.f32 %v6461_v46  ;;  %v9534_v49 = vand.u32 2147483648, %v6351_v55  ;;  %v1558_v27 = vmul.f32 %v6425_v32, %v1557_v18  ;;  %9539 = vst [vmem:[#allocation86_spill] sm:$0xff] %v6524_v43  ;;  %vm6547_vm6 = vmor %vm1270_vm0, %vm1271_vm14 }
 0x232   :  { %v4201_v4 = vmul.f32 -1.442695, %v1035_v56  ;;  %v6500_v26 = vadd.f32 %v6295_v54, %v1268_v57  ;;  %v1552_v31 = vor.u32 1.1754944e-38, %v1551_v52  ;;  %vm1550_vm2 = vcmp.eq.f32.partialorder %v1549_v53, 8.507059e+37  ;;  %v6515_v56 = vpop.f32.mrf.mxu1 }
 0x233   :  { %v4548_v48 = vpop.eup %4547  ;;  %v1684_v47 = vadd.f32 %v1668_v39, %v6265_v12  ;;  %v6489_v35 = vor.u32 1.1754944e-38, %v9534_v49  ;;  %v1548_v12 = vsel %vm6483_vm1, %v6375_v61, %v1544_v41  ;;  %v6506_v39 = vmul.f32 %v6415_v24, %v6351_v55  ;;  %v9537_v61 = vld [vmem:[#allocation19_spill] sm:$0xff] }
 0x234   :  { %v4550_v15 = vpop.eup %4549  ;;  %v1731_v23 = vmul.f32 %v4548_v48, %v1715_v36  ;;  %v641_v18 = vadd.f32 %v9537_v61, %v5750_v29  ;;  %9538 = vst [vmem:[#allocation19_spill] sm:$0xff] %v6515_v56  ;;  %v1553_v52 = vsel %vm1550_vm2, %v1552_v31, %v1548_v12  ;;  %v1559_v48 = vadd.f32 %v6425_v32, %v1558_v27 }
 0x235   :  { %4557 = vtanh.f32 %v1684_v47  ;;  %v4552_v6 = vpop.eup %4551  ;;  %v6512_v41 = vadd.f32 1.0, %v4550_v15  ;;  %vm1561_vm3 = vweird.f32 %v6425_v32  ;;  %vm1560_vm4 = vweird.f32 %v6356_v21 }
 0x236   :  { %4559 = vpow2.f32 %v4215_v16  ;;  %v1002_v14 = vpop.f32.mrf.mxu3  ;;  %v6502_v30 = vadd.f32 %v1747_v5, %v1731_v23  ;;  %v6508_v36 = vpop.eup %4553  ;;  %v1572_v16 = vsub.f32 1.0, %v1571_v9  ;;  %v1566_v49 = vand.u32 2147483648, %v6356_v21  ;;  %vm6537_vm5 = vmor %vm1560_vm4, %vm1561_vm3 }
 0x237   :  { %v1003_v57 = vadd.f32 %v1002_v14, %v5985_v63  ;;  %v6521_v47 = vpop.eup %4555  ;;  %4561 = vpow2.f32 %v4201_v4  ;;  %v4216_v15 = vmul.f32 -1.442695, %v5893_v59  ;;  %v969_v9 = vadd.f32 %v5933_v34, %v5480_v28  ;;  %v9540_v4 = vld [vmem:[#allocation31_spill] sm:$0xff]  ;;  %v6569_v59 = vpop.f32.mrf.mxu2 }
 0x238   :  { %9536 = vst [vmem:[#allocation85_spill] sm:$0xff] %v6502_v30  ;;  %v1775_v53 = vpack.c.bf16 %v6502_v30, %v6459_v42  ;;  %v1564_v23 = vand.u32 2147483647, %v6356_v21  ;;  %v1716_v12 = vsub.f32 1.0, %v1553_v52  ;;  %4563 = vrcp.f32 %v6512_v41  ;;  %v6592_v61 = vpop.f32.mrf.mxu0 }
 0x239   :  { %v1669_v5 = vmul.f32 %v6292_v3, %v1003_v57  ;;  %v527_v3 = vadd.f32 %v9540_v4, %v5483_v40  ;;  %v1748_v34 = vmul.f32 0.0, %v1553_v52  ;;  %v1586_v21 = vmul.f32 %v6521_v47, %v6461_v46  ;;  %9549 = vst [vmem:[#allocation87_spill] sm:$0xff] %v6569_v59 }
 0x23a   :  { %1803 = vmatmul.bf16.gmra.mxu0 %v1775_v53  ;;  %1852 = vmatmul.bf16.gmra.mxu1 %v1775_v53  ;;  %v1563_v52 = vsel %vm6537_vm5, %v6425_v32, %v1559_v48  ;;  %v6561_v4 = vadd.f32 1.0, %v4552_v6  ;;  %v1273_v56 = vsel %vm6547_vm6, %v6295_v54, %v6500_v26  ;;  %vm1565_vm8 = vcmp.eq.f32.partialorder %v1564_v23, 8.507059e+37  ;;  %9552 = vst [vmem:[#allocation88_spill] sm:$0xff] %v6592_v61 }
 0x23b   :  { %v4558_v27 = vpop.eup %4557  ;;  %v1685_v31 = vadd.f32 %v1669_v5, %v641_v18  ;;  %1901 = vmatmul.bf16.gmra.mxu2 %v1775_v53  ;;  %v9545_v18 = vand.u32 2147483647, %v6209_v37  ;;  %v1573_v5 = vmul.f32 %v6469_v8, %v1572_v16  ;;  %v1567_v37 = vor.u32 1.1754944e-38, %v1566_v49 }
 0x23c   :  { %v4560_v14 = vpop.eup %4559  ;;  %v1732_v53 = vmul.f32 %v4558_v27, %v1716_v12  ;;  %v1282_v12 = vsub.f32 1.0, %v6506_v39  ;;  %v1587_v27 = vsub.f32 1.0, %v1586_v21  ;;  %v1296_v54 = vmul.f32 %v6508_v36, %v6453_v22  ;;  %v6586_v39 = vpop.f32.mrf.mxu1 }
 0x23d   :  { %vm6553_vm7 = vcmp.eq.f32.partialorder %v9545_v18, 8.507059e+37  ;;  %4565 = vtanh.f32 %v1685_v31  ;;  %v1355_v18 = vadd.f32 %v969_v9, %v527_v3  ;;  %v4562_v32 = vpop.eup %4561  ;;  %v6571_v48 = vadd.f32 1.0, %v4560_v14 }
 0x23e   :  { %4567 = vpow2.f32 %v4216_v15  ;;  %v1005_v2 = vpop.f32.mrf.mxu3  ;;  %v6567_v43 = vadd.f32 %v1748_v34, %v1732_v53  ;;  %v1568_v16 = vsel %vm1565_vm8, %v1567_v37, %v1563_v52  ;;  %v1574_v26 = vadd.f32 %v6469_v8, %v1573_v5  ;;  %v6579_v49 = vpop.eup %4563  ;;  %v9550_v15 = vld [vmem:[#allocation21_spill] sm:$0xff] }
 0x23f   :  { %v1006_v6 = vadd.f32 %v1005_v2, %v5985_v63  ;;  %vm1576_vm9 = vweird.f32 %v6469_v8  ;;  %4569 = vrcp.f32 %v6561_v4  ;;  %v644_v9 = vadd.f32 %v9550_v15, %v5750_v29  ;;  %9551 = vst [vmem:[#allocation21_spill] sm:$0xff] %v6586_v39 }
 0x240   :  { %9548 = vst [vmem:[#allocation31_spill] sm:$0xff] %v6567_v43  ;;  %vm1286_vm10 = vweird.f32 %v6415_v24  ;;  %v1581_v23 = vand.u32 2147483648, %v6417_v7  ;;  %v4217_v3 = vmul.f32 -1.442695, %v1355_v18  ;;  %v1717_v31 = vsub.f32 1.0, %v1568_v16 }
 0x241   :  { %v1670_v2 = vmul.f32 %v6409_v62, %v1006_v6  ;;  %vm1575_vm11 = vweird.f32 %v6417_v7  ;;  %v1579_v34 = vand.u32 2147483647, %v6417_v7  ;;  %4571 = vrcp.f32 %v6571_v48 }
 0x242   :  { %v1749_v52 = vmul.f32 0.0, %v1568_v16  ;;  %v1283_v62 = vmul.f32 %v6415_v24, %v1282_v12  ;;  %vm1285_vm12 = vweird.f32 %v6351_v55  ;;  %vm6598_vm13 = vmor %vm1575_vm11, %vm1576_vm9  ;;  %v1601_v7 = vmul.f32 %v6579_v49, %v6512_v41 }
 0x243   :  { %v4566_v14 = vpop.eup %4565  ;;  %v1686_v21 = vadd.f32 %v1670_v2, %v644_v9  ;;  %v1578_v18 = vsel %vm6598_vm13, %v6469_v8, %v1574_v26  ;;  %v1588_v6 = vmul.f32 %v6521_v47, %v1587_v27  ;;  %v1278_v16 = vsel %vm6553_vm7, %v6396_v50, %v1273_v56  ;;  %v6629_v26 = vpop.f32.mrf.mxu2  ;;  %vm6660_vm4 = vmor %vm1285_vm12, %vm1286_vm10 }
 0x244   :  { %v4568_v5 = vpop.eup %4567  ;;  %v1733_v37 = vmul.f32 %v4566_v14, %v1717_v31  ;;  %v1297_v12 = vsub.f32 1.0, %v1296_v54  ;;  %v1582_v15 = vor.u32 1.1754944e-38, %v1581_v23  ;;  %v6611_v9 = vadd.f32 1.0, %v4562_v32  ;;  %9559 = vst [vmem:[#allocation90_spill] sm:$0xff] %v6629_v26 }
 0x245   :  { %4573 = vtanh.f32 %v1686_v21  ;;  %vm1580_vm14 = vcmp.eq.f32.partialorder %v1579_v34, 8.507059e+37  ;;  %v6615_v31 = vpop.eup %4569  ;;  %v6617_v14 = vadd.f32 1.0, %v4568_v5  ;;  %v1284_v27 = vadd.f32 %v6415_v24, %v1283_v62  ;;  %v9560_v34 = vld [vmem:[#allocation24_spill] sm:$0xff] }
 0x246   :  { %4575 = vpow2.f32 %v4217_v3  ;;  %v1007_v2 = vpop.f32.mrf.mxu3  ;;  %v6613_v39 = vadd.f32 %v1749_v52, %v1733_v37  ;;  %v9556_v57 = vand.u32 2147483647, %v6351_v55  ;;  %v1583_v56 = vsel %vm1580_vm14, %v1582_v15, %v1578_v18 }
 0x247   :  { %v1008_v8 = vadd.f32 %v1007_v2, %v5985_v63  ;;  %v1602_v32 = vsub.f32 1.0, %v1601_v7  ;;  %vm1300_vm0 = vweird.f32 %v6453_v22  ;;  %v1589_v23 = vadd.f32 %v6521_v47, %v1588_v6  ;;  %v6634_v3 = vpop.eup %4571  ;;  %v6644_v6 = vpop.f32.mrf.mxu1 }
 0x248   :  { %9555 = vst [vmem:[#allocation89_spill] sm:$0xff] %v6613_v39  ;;  %vm6623_vm15 = vcmp.eq.f32.partialorder %v9556_v57, 8.507059e+37  ;;  %v1776_v54 = vpack.c.bf16 %v6613_v39, %v6567_v43  ;;  %vm1591_vm1 = vweird.f32 %v6521_v47  ;;  %v646_v21 = vadd.f32 %v9560_v34, %v5750_v29 }
 0x249   :  { %v1671_v52 = vmul.f32 %v1278_v16, %v1008_v8  ;;  %v1298_v62 = vmul.f32 %v6508_v36, %v1297_v12  ;;  %v1596_v53 = vand.u32 2147483648, %v6461_v46  ;;  %4577 = vrcp.f32 %v6611_v9  ;;  %9561 = vst [vmem:[#allocation24_spill] sm:$0xff] %v6644_v6 }
 0x24a   :  { %1808 = vmatmul.bf16.gmra.mxu0 %v1776_v54  ;;  %1857 = vmatmul.bf16.gmra.mxu1 %v1776_v54  ;;  %vm1590_vm2 = vweird.f32 %v6461_v46  ;;  %v1594_v5 = vand.u32 2147483647, %v6461_v46  ;;  %v1718_v7 = vsub.f32 1.0, %v1583_v56  ;;  %4579 = vrcp.f32 %v6617_v14 }
 0x24b   :  { %v4574_v37 = vpop.eup %4573  ;;  %v1687_v18 = vadd.f32 %v1671_v52, %v646_v21  ;;  %1906 = vmatmul.bf16.gmra.mxu2 %v1776_v54  ;;  %vm6648_vm3 = vmor %vm1590_vm2, %vm1591_vm1  ;;  %v1750_v12 = vmul.f32 0.0, %v1583_v56  ;;  %v1311_v15 = vmul.f32 %v6615_v31, %v6561_v4  ;;  %v1616_v46 = vmul.f32 %v6634_v3, %v6571_v48  ;;  %v6671_v21 = vpop.f32.mrf.mxu0 }
 0x24c   :  { %v4576_v2 = vpop.eup %4575  ;;  %v1593_v57 = vsel %vm6648_vm3, %v6521_v47, %v1589_v23  ;;  %v1734_v56 = vmul.f32 %v4574_v37, %v1718_v7  ;;  %v1603_v54 = vmul.f32 %v6579_v49, %v1602_v32  ;;  %v1288_v34 = vsel %vm6660_vm4, %v6415_v24, %v1284_v27  ;;  %9566 = vst [vmem:[#allocation91_spill] sm:$0xff] %v6671_v21 }
 0x24d   :  { %4581 = vtanh.f32 %v1687_v18  ;;  %v1304_v55 = vand.u32 2147483647, %v6453_v22  ;;  %v1597_v52 = vor.u32 1.1754944e-38, %v1596_v53  ;;  %v1299_v26 = vadd.f32 %v6508_v36, %v1298_v62  ;;  %v9568_v18 = vld [vmem:[#allocation26_spill] sm:$0xff] }
 0x24e   :  { %v1010_v6 = vpop.f32.mrf.mxu3  ;;  %vm1301_vm5 = vweird.f32 %v6508_v36  ;;  %vm1595_vm6 = vcmp.eq.f32.partialorder %v1594_v5, 8.507059e+37  ;;  %v6676_v47 = vadd.f32 %v1750_v12, %v1734_v56  ;;  %v6678_v23 = vadd.f32 1.0, %v4576_v2 }
 0x24f   :  { %v1011_v32 = vadd.f32 %v1010_v6, %v5985_v63  ;;  %v1598_v7 = vsel %vm1595_vm6, %v1597_v52, %v1593_v57  ;;  %v1312_v37 = vsub.f32 1.0, %v1311_v15  ;;  %v6681_v24 = vpop.eup %4577  ;;  %v1617_v27 = vsub.f32 1.0, %v1616_v46  ;;  %vm6696_vm8 = vmor %vm1300_vm0, %vm1301_vm5  ;;  %v6705_v46 = vpop.f32.mrf.mxu2 }
 0x250   :  { %9567 = vst [vmem:[#allocation92_spill] sm:$0xff] %v6676_v47  ;;  %v1293_v53 = vsel %vm6623_vm15, %v6489_v35, %v1288_v34  ;;  %v1604_v62 = vadd.f32 %v6579_v49, %v1603_v54  ;;  %vm1606_vm7 = vweird.f32 %v6579_v49  ;;  %v6688_v5 = vpop.eup %4579  ;;  %v649_v16 = vadd.f32 %v9568_v18, %v5750_v29 }
 0x251   :  { %v1672_v12 = vmul.f32 %v1293_v53, %v1011_v32  ;;  %v1306_v35 = vand.u32 2147483648, %v6453_v22  ;;  %v1611_v50 = vand.u32 2147483648, %v6512_v41  ;;  %v1303_v15 = vsel %vm6696_vm8, %v6508_v36, %v1299_v26  ;;  %9571 = vst [vmem:[#allocation26_spill] sm:$0xff] %v6705_v46  ;;  %v9628_v46 = vld [vmem:[#allocation55_spill] sm:$0xff] }
 0x252   :  { %v1719_v2 = vsub.f32 1.0, %v1598_v7  ;;  %vm1605_vm9 = vweird.f32 %v6512_v41  ;;  %v1609_v8 = vand.u32 2147483647, %v6512_v41  ;;  %4583 = vrcp.f32 %v6678_v23 }
 0x253   :  { %v4582_v57 = vpop.eup %4581  ;;  %v1688_v56 = vadd.f32 %v1672_v12, %v649_v16  ;;  %v1751_v54 = vmul.f32 0.0, %v1598_v7  ;;  %v1313_v22 = vmul.f32 %v6615_v31, %v1312_v37  ;;  %vm6713_vm10 = vmor %vm1605_vm9, %vm1606_vm7  ;;  %v1631_v36 = vmul.f32 %v6688_v5, %v6617_v14  ;;  %v6723_v7 = vpop.f32.mrf.mxu1 }
 0x254   :  { %v1735_v26 = vmul.f32 %v4582_v57, %v1719_v2  ;;  %v1608_v41 = vsel %vm6713_vm10, %v6579_v49, %v1604_v62  ;;  %v1618_v52 = vmul.f32 %v6634_v3, %v1617_v27  ;;  %v1307_v32 = vor.u32 1.1754944e-38, %v1306_v35  ;;  %9574 = vst [vmem:[#allocation93_spill] sm:$0xff] %v6723_v7  ;;  %v6731_v62 = vpop.f32.mrf.mxu0 }
 0x255   :  { %4585 = vtanh.f32 %v1688_v56  ;;  %v1326_v37 = vmul.f32 %v6681_v24, %v6611_v9  ;;  %v1612_v53 = vor.u32 1.1754944e-38, %v1611_v50  ;;  %vm1305_vm11 = vcmp.eq.f32.partialorder %v1304_v55, 8.507059e+37  ;;  %9576 = vst [vmem:[#allocation95_spill] sm:$0xff] %v6731_v62 }
 0x256   :  { %v1012_v18 = vpop.f32.mrf.mxu3  ;;  %v6727_v16 = vadd.f32 %v1751_v54, %v1735_v26  ;;  %vm1316_vm12 = vweird.f32 %v6615_v31  ;;  %vm1610_vm13 = vcmp.eq.f32.partialorder %v1609_v8, 8.507059e+37  ;;  %v1308_v49 = vsel %vm1305_vm11, %v1307_v32, %v1303_v15  ;;  %v9577_v8 = vld [vmem:[#allocation28_spill] sm:$0xff] }
 0x257   :  { %v1013_v12 = vadd.f32 %v1012_v18, %v5985_v63  ;;  %v1314_v27 = vadd.f32 %v6615_v31, %v1313_v22  ;;  %v1613_v6 = vsel %vm1610_vm13, %v1612_v53, %v1608_v41  ;;  %v1632_v35 = vsub.f32 1.0, %v1631_v36  ;;  %v6762_v18 = vpop.f32.mrf.mxu2 }
 0x258   :  { %9575 = vst [vmem:[#allocation94_spill] sm:$0xff] %v6727_v16  ;;  %v1777_v2 = vpack.c.bf16 %v6727_v16, %v6676_v47  ;;  %v1619_v50 = vadd.f32 %v6634_v3, %v1618_v52  ;;  %vm1621_vm14 = vweird.f32 %v6634_v3  ;;  %v6738_v55 = vpop.eup %4583  ;;  %v651_v57 = vadd.f32 %v9577_v8, %v5750_v29  ;;  %v9643_v16 = vld [vmem:[#allocation73_spill] sm:$0xff] }
 0x259   :  { %v1673_v56 = vmul.f32 %v1308_v49, %v1013_v12  ;;  %v1327_v15 = vsub.f32 1.0, %v1326_v37  ;;  %v1626_v54 = vand.u32 2147483648, %v6571_v48  ;;  %v1321_v22 = vand.u32 2147483648, %v6561_v4  ;;  %9582 = vst [vmem:[#allocation28_spill] sm:$0xff] %v6762_v18 }
 0x25a   :  { %1813 = vmatmul.bf16.gmra.mxu0 %v1777_v2  ;;  %1862 = vmatmul.bf16.gmra.mxu1 %v1777_v2  ;;  %vm1620_vm15 = vweird.f32 %v6571_v48  ;;  %v1624_v34 = vand.u32 2147483647, %v6571_v48  ;;  %v1720_v36 = vsub.f32 1.0, %v1613_v6  ;;  %vm1315_vm0 = vweird.f32 %v6561_v4 }
 0x25b   :  { %v4586_v26 = vpop.eup %4585  ;;  %v1689_v41 = vadd.f32 %v1673_v56, %v651_v57  ;;  %1911 = vmatmul.bf16.gmra.mxu2 %v1777_v2  ;;  %v1319_v52 = vand.u32 2147483647, %v6561_v4  ;;  %vm6750_vm1 = vmor %vm1620_vm15, %vm1621_vm14  ;;  %v1752_v37 = vmul.f32 0.0, %v1613_v6  ;;  %v1646_v53 = vmul.f32 %v6738_v55, %v6678_v23 }
 0x25c   :  { %vm6758_vm2 = vmor %vm1315_vm0, %vm1316_vm12  ;;  %v1623_v4 = vsel %vm6750_vm1, %v6634_v3, %v1619_v50  ;;  %v1736_v12 = vmul.f32 %v4586_v26, %v1720_v36  ;;  %v1633_v49 = vmul.f32 %v6688_v5, %v1632_v35  ;;  %v1328_v2 = vmul.f32 %v6681_v24, %v1327_v15  ;;  %v6776_v3 = vpop.f32.mrf.mxu1 }
 0x25d   :  { %4587 = vtanh.f32 %v1689_v41  ;;  %v1318_v6 = vsel %vm6758_vm2, %v6615_v31, %v1314_v27  ;;  %v1627_v8 = vor.u32 1.1754944e-38, %v1626_v54  ;;  %v1322_v56 = vor.u32 1.1754944e-38, %v1321_v22  ;;  %9584 = vst [vmem:[#allocation97_spill] sm:$0xff] %v6776_v3  ;;  %v9585_v27 = vld [vmem:[#allocation29_spill] sm:$0xff]  ;;  %v6782_v22 = vpop.f32.mrf.mxu0 }
 0x25e   :  { %v1015_v57 = vpop.f32.mrf.mxu3  ;;  %vm1625_vm3 = vcmp.eq.f32.partialorder %v1624_v34, 8.507059e+37  ;;  %v6772_v7 = vadd.f32 %v1752_v37, %v1736_v12  ;;  %vm1320_vm4 = vcmp.eq.f32.partialorder %v1319_v52, 8.507059e+37  ;;  %vm1331_vm5 = vweird.f32 %v6681_v24  ;;  %9586 = vst [vmem:[#allocation29_spill] sm:$0xff] %v6782_v22 }
 0x25f   :  { %v1016_v18 = vadd.f32 %v1015_v57, %v5985_v63  ;;  %v1628_v35 = vsel %vm1625_vm3, %v1627_v8, %v1623_v4  ;;  %v1647_v50 = vsub.f32 1.0, %v1646_v53  ;;  %v1323_v36 = vsel %vm1320_vm4, %v1322_v56, %v1318_v6 }
 0x260   :  { %9583 = vst [vmem:[#allocation96_spill] sm:$0xff] %v6772_v7  ;;  %v1634_v31 = vadd.f32 %v6688_v5, %v1633_v49  ;;  %vm1636_vm6 = vweird.f32 %v6688_v5  ;;  %v654_v15 = vadd.f32 %v9585_v27, %v5750_v29  ;;  %v1329_v34 = vadd.f32 %v6681_v24, %v1328_v2 }
 0x261   :  { %v1674_v54 = vmul.f32 %v1323_v36, %v1016_v18  ;;  %v1641_v26 = vand.u32 2147483648, %v6617_v14  ;;  %v1336_v41 = vand.u32 2147483648, %v6611_v9  ;;  %v1721_v52 = vsub.f32 1.0, %v1628_v35  ;;  %v6810_v36 = vpop.f32.mrf.mxu2 }
 0x262   :  { %vm1635_vm7 = vweird.f32 %v6617_v14  ;;  %v1639_v32 = vand.u32 2147483647, %v6617_v14  ;;  %vm1330_vm8 = vweird.f32 %v6611_v9  ;;  %v1334_v48 = vand.u32 2147483647, %v6611_v9  ;;  %9592 = vst [vmem:[#allocation99_spill] sm:$0xff] %v6810_v36 }
 0x263   :  { %v4588_v37 = vpop.eup %4587  ;;  %v1690_v53 = vadd.f32 %v1674_v54, %v654_v15  ;;  %vm6791_vm9 = vmor %vm1635_vm7, %vm1636_vm6  ;;  %v1753_v49 = vmul.f32 0.0, %v1628_v35  ;;  %v1648_v6 = vmul.f32 %v6738_v55, %v1647_v50  ;;  %v1642_v2 = vor.u32 1.1754944e-38, %v1641_v26 }
 0x264   :  { %vm6797_vm10 = vmor %vm1330_vm8, %vm1331_vm5  ;;  %v1737_v12 = vmul.f32 %v4588_v37, %v1721_v52  ;;  %v1638_v14 = vsel %vm6791_vm9, %v6688_v5, %v1634_v31  ;;  %v1337_v57 = vor.u32 1.1754944e-38, %v1336_v41  ;;  %vm1640_vm11 = vcmp.eq.f32.partialorder %v1639_v32, 8.507059e+37 }
 0x265   :  { %4589 = vtanh.f32 %v1690_v53  ;;  %v1333_v9 = vsel %vm6797_vm10, %v6681_v24, %v1329_v34  ;;  %vm1335_vm12 = vcmp.eq.f32.partialorder %v1334_v48, 8.507059e+37  ;;  %v1643_v27 = vsel %vm1640_vm11, %v1642_v2, %v1638_v14  ;;  %v9593_v24 = vld [vmem:[#allocation32_spill] sm:$0xff]  ;;  %v6819_v34 = vpop.f32.mrf.mxu1  ;;  %v6824_v53 = vpop.f32.mrf.mxu0 }
 0x266   :  { %v1017_v8 = vpop.f32.mrf.mxu3  ;;  %v6808_v56 = vadd.f32 %v1753_v49, %v1737_v12  ;;  %v1338_v5 = vsel %vm1335_vm12, %v1337_v57, %v1333_v9  ;;  %v1649_v31 = vadd.f32 %v6738_v55, %v1648_v6  ;;  %vm1651_vm13 = vweird.f32 %v6738_v55  ;;  %9594 = vst [vmem:[#allocation32_spill] sm:$0xff] %v6819_v34 }
 0x267   :  { %v1018_v35 = vadd.f32 %v1017_v8, %v5985_v63  ;;  %v656_v15 = vadd.f32 %v9593_v24, %v5750_v29  ;;  %v1656_v26 = vand.u32 2147483648, %v6678_v23  ;;  %vm1650_vm14 = vweird.f32 %v6678_v23  ;;  %9595 = vst [vmem:[#allocation100_spill] sm:$0xff] %v6824_v53 }
 0x268   :  { %9591 = vst [vmem:[#allocation98_spill] sm:$0xff] %v6808_v56  ;;  %v1778_v50 = vpack.c.bf16 %v6808_v56, %v6772_v7  ;;  %v1654_v41 = vand.u32 2147483647, %v6678_v23  ;;  %v1722_v52 = vsub.f32 1.0, %v1643_v27  ;;  %vm1652_vm15 = vmor %vm1650_vm14, %vm1651_vm13  ;;  %v1754_v4 = vmul.f32 0.0, %v1643_v27  ;;  %v9639_v56 = vld [vmem:[#allocation68_spill] sm:$0xff] }
 0x269   :  { %v1675_v54 = vmul.f32 %v1338_v5, %v1018_v35  ;;  %v1653_v48 = vsel %vm1652_vm15, %v6738_v55, %v1649_v31  ;;  %v1657_v12 = vor.u32 1.1754944e-38, %v1656_v26  ;;  %v6829_v6 = vpop.f32.mrf.mxu2  ;;  %v9605_v26 = vld [vmem:[#allocation30_spill] sm:$0xff]  ;;  %v6937_v62 = vadd.f32 %v9628_v46, %v5750_v29 }
 0x26a   :  { %1818 = vmatmul.bf16.gmra.mxu0 %v1778_v50  ;;  %1867 = vmatmul.bf16.gmra.mxu1 %v1778_v50  ;;  %vm1655_vm0 = vcmp.eq.f32.partialorder %v1654_v41, 8.507059e+37  ;;  %9597 = vst [vmem:[#allocation102_spill] sm:$0xff] %v6829_v6  ;;  %v401_v41 = vadd.f32 %v9605_v26, %v5269_v44  ;;  %v6957_v19 = vadd.f32 %v9632_v38, %v5750_v29 }
 0x26b   :  { %v4590_v32 = vpop.eup %4589  ;;  %v1691_v37 = vadd.f32 %v1675_v54, %v656_v15  ;;  %1916 = vmatmul.bf16.gmra.mxu2 %v1778_v50  ;;  %v1658_v14 = vsel %vm1655_vm0, %v1657_v12, %v1653_v48  ;;  %v6987_v47 = vadd.f32 %v9643_v16, %v5269_v44  ;;  %v9650_v16 = vld [vmem:[#allocation74_spill] sm:$0xff] }
 0x26c   :  { %v1738_v18 = vmul.f32 %v4590_v32, %v1722_v52  ;;  %v1723_v23 = vsub.f32 1.0, %v1658_v14  ;;  %v1755_v57 = vmul.f32 0.0, %v1658_v14  ;;  %v9606_v52 = vld [vmem:[#allocation34_spill] sm:$0xff]  ;;  %v7005_v42 = vadd.f32 %v9650_v16, %v5483_v40 }
 0x26d   :  { %4591 = vtanh.f32 %v1691_v37  ;;  %v6831_v2 = vpop.f32.mrf.mxu1  ;;  %v6833_v35 = vpop.f32.mrf.mxu0  ;;  %v530_v32 = vadd.f32 %v9606_v52, %v5483_v40  ;;  %v7025_v16 = vadd.f32 %v6190_v11, %v5269_v44 }
 0x26e   :  { %v6827_v49 = vadd.f32 %v1754_v4, %v1738_v18  ;;  %9598 = vst [vmem:[#allocation103_spill] sm:$0xff] %v6831_v2  ;;  %v9618_v2 = vld [vmem:[#allocation46_spill] sm:$0xff] }
 0x26f   :  { %9599 = vst [vmem:[#allocation104_spill] sm:$0xff] %v6833_v35 }
 0x270   :  { %9596 = vst [vmem:[#allocation101_spill] sm:$0xff] %v6827_v49 }
 0x271   :  { %v6839_v27 = vpop.f32.mrf.mxu2  ;;  %9658 = vst [vmem:[#allocation46_spill] sm:$0xff] %v7025_v16 }
 0x272   :  { %9601 = vst [vmem:[#allocation106_spill] sm:$0xff] %v6839_v27  ;;  %v9617_v27 = vld [vmem:[#allocation45_spill] sm:$0xff] }
 0x273   :  { %v4592_v9 = vpop.eup %4591 }
 0x274   :  { %v1739_v8 = vmul.f32 %v4592_v9, %v1723_v23  ;;  %v9607_v23 = vld [vmem:[#allocation33_spill] sm:$0xff] }
 0x275   :  { %v6841_v50 = vpop.f32.mrf.mxu1  ;;  %v6843_v31 = vpop.f32.mrf.mxu0  ;;  %v403_v9 = vadd.f32 %v9607_v23, %v5269_v44  ;;  %v9613_v23 = vld [vmem:[#allocation38_spill] sm:$0xff] }
 0x276   :  { %v6835_v5 = vadd.f32 %v1755_v57, %v1739_v8  ;;  %9602 = vst [vmem:[#allocation107_spill] sm:$0xff] %v6841_v50  ;;  %v9608_v8 = vld [vmem:[#allocation36_spill] sm:$0xff] }
 0x277   :  { %9603 = vst [vmem:[#allocation108_spill] sm:$0xff] %v6843_v31  ;;  %v6857_v57 = vadd.f32 %v9608_v8, %v5269_v44  ;;  %v6875_v8 = vadd.f32 %v9613_v23, %v5750_v29  ;;  %v6893_v23 = vadd.f32 %v9617_v27, %v5269_v44  ;;  %v9622_v27 = vld [vmem:[#allocation48_spill] sm:$0xff] }
 0x278   :  { %9600 = vst [vmem:[#allocation105_spill] sm:$0xff] %v6835_v5  ;;  %v1779_v55 = vpack.c.bf16 %v6835_v5, %v6827_v49  ;;  %v6913_v36 = vadd.f32 %v9622_v27, %v5269_v44  ;;  %v9637_v49 = vld [vmem:[#allocation67_spill] sm:$0xff] }
 0x279   :  { %v6845_v24 = vpop.f32.mrf.mxu2  ;;  %v6974_v38 = vadd.f32 %v9637_v49, %v5750_v29  ;;  %v9647_v49 = vld [vmem:[#allocation72_spill] sm:$0xff]  ;;  %9651 = vst [vmem:[#allocation38_spill] sm:$0xff] %v7005_v42 }
 0x27a   :  { %1823 = vmatmul.bf16.gmra.mxu0 %v1779_v55  ;;  %1872 = vmatmul.bf16.gmra.mxu1 %v1779_v55  ;;  %9604 = vst [vmem:[#allocation109_spill] sm:$0xff] %v6845_v24  ;;  %v6995_v43 = vadd.f32 %v9647_v49, %v5750_v29 }
 0x27b   :  { %1921 = vmatmul.bf16.gmra.mxu2 %v1779_v55  ;;  %v9609_v55 = vld [vmem:[#allocation37_spill] sm:$0xff]  ;;  %9638 = vst [vmem:[#allocation34_spill] sm:$0xff] %v6974_v38 }
 0x27c   :  { %v532_v26 = vadd.f32 %v9609_v55, %v5483_v40  ;;  %9644 = vst [vmem:[#allocation37_spill] sm:$0xff] %v6987_v47 }
 0x287   :  { %v1789_v15 = vpop.f32.mrf.mxu0  ;;  %v1838_v54 = vpop.f32.mrf.mxu1 }
 0x288   :  { %v1790_v37 = vadd.f32 %v1789_v15, %v5273_v45  ;;  %v1839_v48 = vadd.f32 %v1838_v54, %v5480_v28  ;;  %v9610_v15 = vld [vmem:[#allocation35_spill] sm:$0xff] }
 0x289   :  { %v6865_v54 = vadd.f32 %v9610_v15, %v5750_v29 }
 0x28a   :  { %v1927_v18 = vadd.f32 %v1790_v37, %v401_v41  ;;  %v2247_v4 = vadd.f32 %v1839_v48, %v530_v32  ;;  %v9611_v41 = vld [vmem:[#allocation39_spill] sm:$0xff]  ;;  %v9612_v37 = vld [vmem:[#allocation40_spill] sm:$0xff] }
 0x28b   :  { %v6869_v32 = vadd.f32 %v9611_v41, %v5269_v44  ;;  %v535_v48 = vadd.f32 %v9612_v37, %v5483_v40  ;;  %v9615_v41 = vld [vmem:[#allocation41_spill] sm:$0xff]  ;;  %9648 = vst [vmem:[#allocation39_spill] sm:$0xff] %v6995_v43 }
 0x28c   :  { %v4218_v12 = vmul.f32 -1.442695, %v1927_v18  ;;  %v4234_v14 = vmul.f32 -1.442695, %v2247_v4  ;;  %v6885_v50 = vadd.f32 %v9615_v41, %v5750_v29 }
 0x28e   :  { %4593 = vpow2.f32 %v4218_v12  ;;  %v6861_v52 = vpop.f32.mrf.mxu2  ;;  %v9614_v12 = vld [vmem:[#allocation43_spill] sm:$0xff] }
 0x28f   :  { %4595 = vpow2.f32 %v4234_v14  ;;  %v1791_v18 = vpop.f32.mrf.mxu0  ;;  %v1840_v4 = vpop.f32.mrf.mxu1  ;;  %v6879_v55 = vadd.f32 %v9614_v12, %v5483_v40  ;;  %v9616_v14 = vld [vmem:[#allocation42_spill] sm:$0xff]  ;;  %v6897_v12 = vadd.f32 %v9618_v2, %v5483_v40  ;;  %v9623_v2 = vld [vmem:[#allocation53_spill] sm:$0xff] }
 0x290   :  { %v1792_v15 = vadd.f32 %v1791_v18, %v5273_v45  ;;  %v1841_v24 = vadd.f32 %v1840_v4, %v5480_v28  ;;  %v6889_v37 = vadd.f32 %v9616_v14, %v5269_v44  ;;  %v9619_v18 = vld [vmem:[#allocation44_spill] sm:$0xff]  ;;  %v9620_v4 = vld [vmem:[#allocation49_spill] sm:$0xff]  ;;  %v9621_v14 = vld [vmem:[#allocation47_spill] sm:$0xff]  ;;  %v6917_v3 = vadd.f32 %v9623_v2, %v5269_v44 }
 0x291   :  { %v6901_v31 = vadd.f32 %v9619_v18, %v5750_v29  ;;  %v6905_v41 = vadd.f32 %v9620_v4, %v5483_v40  ;;  %v6909_v35 = vadd.f32 %v9621_v14, %v5750_v29  ;;  %v9624_v18 = vld [vmem:[#allocation54_spill] sm:$0xff]  ;;  %v9627_v14 = vld [vmem:[#allocation56_spill] sm:$0xff] }
 0x292   :  { %v1928_v6 = vadd.f32 %v1792_v15, %v403_v9  ;;  %v2248_v34 = vadd.f32 %v1841_v24, %v532_v26  ;;  %v6921_v53 = vadd.f32 %v9624_v18, %v5483_v40  ;;  %v9625_v9 = vld [vmem:[#allocation51_spill] sm:$0xff]  ;;  %v9626_v26 = vld [vmem:[#allocation58_spill] sm:$0xff]  ;;  %v6933_v27 = vadd.f32 %v9627_v14, %v5483_v40  ;;  %v9631_v14 = vld [vmem:[#allocation64_spill] sm:$0xff] }
 0x293   :  { %v6925_v24 = vadd.f32 %v9625_v9, %v5750_v29  ;;  %v6929_v15 = vadd.f32 %v9626_v26, %v5269_v44  ;;  %v9629_v18 = vld [vmem:[#allocation62_spill] sm:$0xff]  ;;  %v9630_v26 = vld [vmem:[#allocation61_spill] sm:$0xff]  ;;  %v6951_v1 = vadd.f32 %v9631_v14, %v5483_v40 }
 0x294   :  { %v4594_v4 = vpop.eup %4593  ;;  %v4219_v22 = vmul.f32 -1.442695, %v1928_v6  ;;  %v6941_v21 = vadd.f32 %v9629_v18, %v5269_v44  ;;  %v4235_v59 = vmul.f32 -1.442695, %v2248_v34  ;;  %v6947_v61 = vadd.f32 %v9630_v26, %v5483_v40  ;;  %v9634_v34 = vld [vmem:[#allocation69_spill] sm:$0xff] }
 0x295   :  { %v4596_v2 = vpop.eup %4595  ;;  %v6943_v9 = vadd.f32 1.0, %v4594_v4  ;;  %v9633_v4 = vld [vmem:[#allocation66_spill] sm:$0xff]  ;;  %v6965_v26 = vadd.f32 %v9634_v34, %v5269_v44 }
 0x296   :  { %v6953_v6 = vadd.f32 1.0, %v4596_v2  ;;  %4597 = vpow2.f32 %v4219_v22  ;;  %v1889_v46 = vpop.f32.mrf.mxu2  ;;  %v6961_v18 = vadd.f32 %v9633_v4, %v5269_v44  ;;  %v9636_v2 = vld [vmem:[#allocation63_spill] sm:$0xff]  ;;  %v6978_v4 = vadd.f32 %v9639_v56, %v5483_v40  ;;  %v9641_v34 = vld [vmem:[#allocation70_spill] sm:$0xff] }
 0x297   :  { %9635 = vst [vmem:[#allocation30_spill] sm:$0xff] %v6965_v26  ;;  %4599 = vrcp.f32 %v6943_v9  ;;  %v1794_v14 = vpop.f32.mrf.mxu0  ;;  %v1843_v5 = vpop.f32.mrf.mxu1  ;;  %v6970_v22 = vadd.f32 %v9636_v2, %v5750_v29  ;;  %v6983_v7 = vadd.f32 %v9641_v34, %v5750_v29  ;;  %v9645_v2 = vld [vmem:[#allocation71_spill] sm:$0xff]  ;;  %v6999_v56 = vadd.f32 %v6049_v25, %v5269_v44 }
 0x298   :  { %9640 = vst [vmem:[#allocation33_spill] sm:$0xff] %v6978_v4  ;;  %4601 = vrcp.f32 %v6953_v6  ;;  %v6991_v39 = vadd.f32 %v9645_v2, %v5483_v40  ;;  %v1795_v34 = vadd.f32 %v1794_v14, %v5273_v45  ;;  %v1844_v30 = vadd.f32 %v1843_v5, %v5480_v28  ;;  %v9652_v2 = vld [vmem:[#allocation75_spill] sm:$0xff]  ;;  %v9656_v14 = vld [vmem:[#allocation76_spill] sm:$0xff] }
 0x299   :  { %9642 = vst [vmem:[#allocation36_spill] sm:$0xff] %v6983_v7  ;;  %4603 = vpow2.f32 %v4235_v59  ;;  %v7009_v7 = vadd.f32 %v9652_v2, %v5750_v29  ;;  %v7013_v59 = vadd.f32 %v6123_v10, %v5269_v44  ;;  %v7017_v25 = vadd.f32 %v6036_v51, %v5483_v40  ;;  %v9659_v10 = vld [vmem:[#allocation77_spill] sm:$0xff]  ;;  %v9661_v51 = vld [vmem:[#allocation78_spill] sm:$0xff] }
 0x29a   :  { %9646 = vst [vmem:[#allocation35_spill] sm:$0xff] %v6991_v39  ;;  %v7021_v5 = vadd.f32 %v9656_v14, %v5750_v29  ;;  %v1929_v2 = vadd.f32 %v1795_v34, %v6857_v57  ;;  %v1888_v14 = vadd.f32 %v6861_v52, %v5985_v63  ;;  %vm2012_vm1 = vweird.f32 %v6943_v9 }
 0x29b   :  { %9649 = vst [vmem:[#allocation40_spill] sm:$0xff] %v6999_v56  ;;  %v2018_v52 = vand.u32 2147483648, %v6943_v9  ;;  %vm2332_vm2 = vweird.f32 %v6953_v6 }
 0x29c   :  { %9653 = vst [vmem:[#allocation43_spill] sm:$0xff] %v7009_v7  ;;  %v4598_v49 = vpop.eup %4597  ;;  %v2249_v7 = vadd.f32 %v1844_v30, %v535_v48  ;;  %v2016_v30 = vand.u32 2147483647, %v6943_v9  ;;  %v4220_v57 = vmul.f32 -1.442695, %v1929_v2 }
 0x29d   :  { %9654 = vst [vmem:[#allocation41_spill] sm:$0xff] %v7013_v59  ;;  %v4600_v43 = vpop.eup %4599  ;;  %v7030_v59 = vadd.f32 %v9659_v10, %v5483_v40 }
 0x29e   :  { %9655 = vst [vmem:[#allocation42_spill] sm:$0xff] %v7017_v25  ;;  %v7034_v25 = vadd.f32 %v9661_v51, %v5750_v29  ;;  %v7040_v56 = vpop.eup %4601  ;;  %v2008_v11 = vmul.f32 %v4600_v43, %v6943_v9  ;;  %v7045_v48 = vpop.f32.mrf.mxu2  ;;  %v2338_v51 = vand.u32 2147483648, %v6953_v6  ;;  %v4236_v2 = vmul.f32 -1.442695, %v2249_v7 }
 0x29f   :  { %9657 = vst [vmem:[#allocation45_spill] sm:$0xff] %v7021_v5  ;;  %v7038_v5 = vadd.f32 1.0, %v4598_v49  ;;  %v4604_v34 = vpop.eup %4603  ;;  %v2328_v10 = vmul.f32 %v7040_v56, %v6953_v6  ;;  %v1796_v49 = vpop.f32.mrf.mxu0  ;;  %vm2013_vm3 = vweird.f32 %v4600_v43  ;;  %vm7057_vm4 = vcmp.eq.f32.partialorder %v2016_v30, 8.507059e+37 }
 0x2a0   :  { %9660 = vst [vmem:[#allocation44_spill] sm:$0xff] %v7030_v59  ;;  %v1845_v44 = vpop.f32.mrf.mxu1  ;;  %v2009_v29 = vsub.f32 1.0, %v2008_v11  ;;  %v7053_v16 = vadd.f32 1.0, %v4604_v34  ;;  %v1797_v42 = vadd.f32 %v1796_v49, %v5273_v45  ;;  %v2339_v33 = vor.u32 1.1754944e-38, %v2338_v51  ;;  %vm2014_vm7 = vmor %vm2012_vm1, %vm2013_vm3 }
 0x2a1   :  { %9662 = vst [vmem:[#allocation49_spill] sm:$0xff] %v7034_v25  ;;  %4605 = vrcp.f32 %v7038_v5  ;;  %v2336_v25 = vand.u32 2147483647, %v6953_v6  ;;  %v2329_v59 = vsub.f32 1.0, %v2328_v10  ;;  %v2019_v34 = vor.u32 1.1754944e-38, %v2018_v52 }
 0x2a2   :  { %4607 = vpow2.f32 %v4220_v57  ;;  %v2010_v38 = vmul.f32 %v4600_v43, %v2009_v29  ;;  %v7064_v7 = vadd.f32 %v1889_v46, %v5985_v63  ;;  %v1930_v29 = vadd.f32 %v1797_v42, %v6869_v32 }
 0x2a3   :  { %4609 = vrcp.f32 %v7053_v16  ;;  %v2330_v11 = vmul.f32 %v7040_v56, %v2329_v59  ;;  %vm7066_vm5 = vcmp.eq.f32.partialorder %v2336_v25, 8.507059e+37  ;;  %vm2333_vm6 = vweird.f32 %v7040_v56 }
 0x2a4   :  { %v2011_v10 = vadd.f32 %v4600_v43, %v2010_v38  ;;  %4611 = vpow2.f32 %v4236_v2  ;;  %vm2027_vm8 = vweird.f32 %v7038_v5  ;;  %v2031_v59 = vand.u32 2147483647, %v7038_v5  ;;  %vm7093_vm10 = vmor %vm2332_vm2, %vm2333_vm6 }
 0x2a5   :  { %v1846_v46 = vadd.f32 %v1845_v44, %v5480_v28  ;;  %v2331_v25 = vadd.f32 %v7040_v56, %v2330_v11  ;;  %v4221_v52 = vmul.f32 -1.442695, %v1930_v29  ;;  %vm2347_vm9 = vweird.f32 %v7053_v16 }
 0x2a6   :  { %v2015_v38 = vsel %vm2014_vm7, %v4600_v43, %v2011_v10  ;;  %v7079_v49 = vpop.f32.mrf.mxu2  ;;  %v2353_v9 = vand.u32 2147483648, %v7053_v16  ;;  %v2033_v2 = vand.u32 2147483648, %v7038_v5  ;;  %vm7098_vm12 = vcmp.eq.f32.partialorder %v2031_v59, 8.507059e+37 }
 0x2a7   :  { %v4606_v30 = vpop.eup %4605  ;;  %v2020_v32 = vsel %vm7057_vm4, %v2019_v34, %v2015_v38  ;;  %v1799_v0 = vpop.f32.mrf.mxu0  ;;  %v2250_v29 = vadd.f32 %v1846_v46, %v6879_v55  ;;  %4613 = vpow2.f32 %v4221_v52  ;;  %v2335_v55 = vsel %vm7093_vm10, %v7040_v56, %v2331_v25 }
 0x2a8   :  { %v2023_v51 = vmul.f32 %v4606_v30, %v7038_v5  ;;  %v4608_v42 = vpop.eup %4607  ;;  %v1848_v44 = vpop.f32.mrf.mxu1  ;;  %v2567_v10 = vmul.f32 %v2020_v32, %v1888_v14  ;;  %vm2028_vm11 = vweird.f32 %v4606_v30  ;;  %v2351_v32 = vand.u32 2147483647, %v7053_v16 }
 0x2a9   :  { %v4610_v43 = vpop.eup %4609  ;;  %v7086_v39 = vadd.f32 1.0, %v4608_v42  ;;  %v2034_v42 = vor.u32 1.1754944e-38, %v2033_v2  ;;  %v4237_v4 = vmul.f32 -1.442695, %v2250_v29  ;;  %v1800_v52 = vadd.f32 %v1799_v0, %v5273_v45  ;;  %vm2029_vm14 = vmor %vm2027_vm8, %vm2028_vm11 }
 0x2aa   :  { %v2024_v11 = vsub.f32 1.0, %v2023_v51  ;;  %v2343_v34 = vmul.f32 %v4610_v43, %v7053_v16  ;;  %v4612_v14 = vpop.eup %4611  ;;  %v2583_v46 = vadd.f32 %v2567_v10, %v6865_v54  ;;  %v2340_v47 = vsel %vm7066_vm5, %v2339_v33, %v2335_v55 }
 0x2ab   :  { %4615 = vrcp.f32 %v7086_v39  ;;  %v7108_v26 = vadd.f32 1.0, %v4612_v14  ;;  %vm2348_vm13 = vweird.f32 %v4610_v43  ;;  %v2354_v54 = vor.u32 1.1754944e-38, %v2353_v9 }
 0x2ac   :  { %v2025_v6 = vmul.f32 %v4606_v30, %v2024_v11  ;;  %v2344_v51 = vsub.f32 1.0, %v2343_v34  ;;  %4617 = vtanh.f32 %v2583_v46  ;;  %v1931_v2 = vadd.f32 %v1800_v52, %v6889_v37  ;;  %vm7130_vm0 = vmor %vm2347_vm9, %vm2348_vm13 }
 0x2ad   :  { %4619 = vpow2.f32 %v4237_v4  ;;  %v1849_v10 = vadd.f32 %v1848_v44, %v5480_v28  ;;  %v4614_v29 = vpop.eup %4613  ;;  %vm7122_vm15 = vcmp.eq.f32.partialorder %v2351_v32, 8.507059e+37  ;;  %v2046_v44 = vand.u32 2147483647, %v7086_v39 }
 0x2ae   :  { %v2026_v59 = vadd.f32 %v4606_v30, %v2025_v6  ;;  %v2345_v56 = vmul.f32 %v4610_v43, %v2344_v51  ;;  %v7118_v11 = vpop.f32.mrf.mxu2  ;;  %4621 = vrcp.f32 %v7108_v26  ;;  %v7136_v34 = vadd.f32 1.0, %v4614_v29 }
 0x2af   :  { %v1801_v5 = vpop.f32.mrf.mxu0  ;;  %v2251_v38 = vadd.f32 %v1849_v10, %v6897_v12  ;;  %v2615_v14 = vsub.f32 1.0, %v2340_v47  ;;  %v4222_v6 = vmul.f32 -1.442695, %v1931_v2  ;;  %vm2042_vm1 = vweird.f32 %v7086_v39 }
 0x2b0   :  { %v2030_v25 = vsel %vm2029_vm14, %v4606_v30, %v2026_v59  ;;  %v2346_v33 = vadd.f32 %v4610_v43, %v2345_v56  ;;  %v1850_v30 = vpop.f32.mrf.mxu1  ;;  %4623 = vrcp.f32 %v7136_v34  ;;  %vm7153_vm2 = vcmp.eq.f32.partialorder %v2046_v44, 8.507059e+37 }
 0x2b1   :  { %v2035_v0 = vsel %vm7098_vm12, %v2034_v42, %v2030_v25  ;;  %v4616_v4 = vpop.eup %4615  ;;  %v2048_v42 = vand.u32 2147483648, %v7086_v39  ;;  %v4238_v56 = vmul.f32 -1.442695, %v2251_v38  ;;  %v1851_v37 = vadd.f32 %v1850_v30, %v5480_v28 }
 0x2b2   :  { %v2568_v9 = vmul.f32 %v2035_v0, %v7064_v7  ;;  %v2350_v55 = vsel %vm7130_vm0, %v4610_v43, %v2346_v33  ;;  %v2038_v46 = vmul.f32 %v4616_v4, %v7086_v39  ;;  %v4618_v16 = vpop.eup %4617  ;;  %v1802_v7 = vadd.f32 %v1801_v5, %v5273_v45 }
 0x2b3   :  { %v2631_v32 = vmul.f32 %v4618_v16, %v2615_v14  ;;  %v7148_v12 = vsel %vm7122_vm15, %v2354_v54, %v2350_v55  ;;  %v1893_v43 = vadd.f32 %v7045_v48, %v5985_v63  ;;  %v4620_v52 = vpop.eup %4619  ;;  %vm2043_vm3 = vweird.f32 %v4616_v4 }
 0x2b4   :  { %v2584_v51 = vadd.f32 %v2568_v9, %v6875_v8  ;;  %v2039_v59 = vsub.f32 1.0, %v2038_v46  ;;  %v7157_v25 = vpop.eup %4621  ;;  %v7159_v10 = vadd.f32 1.0, %v4620_v52  ;;  %v2616_v54 = vsub.f32 1.0, %v7148_v12  ;;  %vm2044_vm4 = vmor %vm2042_vm1, %vm2043_vm3 }
 0x2b5   :  { %v2049_v48 = vor.u32 1.1754944e-38, %v2048_v42  ;;  %v1932_v29 = vadd.f32 %v1802_v7, %v6893_v23  ;;  %v2647_v33 = vmul.f32 %v2340_v47, %v6136_v17  ;;  %v2061_v5 = vand.u32 2147483647, %v7136_v34 }
 0x2b6   :  { %4625 = vtanh.f32 %v2584_v51  ;;  %v2040_v2 = vmul.f32 %v4616_v4, %v2039_v59  ;;  %v1899_v0 = vpop.f32.mrf.mxu2  ;;  %v4624_v38 = vpop.eup %4623  ;;  %v7168_v14 = vmul.f32 %v7157_v25, %v7108_v26  ;;  %v2252_v46 = vadd.f32 %v1851_v37, %v6905_v41 }
 0x2b7   :  { %4627 = vpow2.f32 %v4222_v6  ;;  %v1804_v9 = vpop.f32.mrf.mxu0  ;;  %v4223_v23 = vmul.f32 -1.442695, %v1932_v29  ;;  %v2053_v30 = vmul.f32 %v4624_v38, %v7136_v34  ;;  %vm2058_vm5 = vweird.f32 %v4624_v38 }
 0x2b8   :  { %v2041_v57 = vadd.f32 %v4616_v4, %v2040_v2  ;;  %4629 = vpow2.f32 %v4238_v56  ;;  %v1853_v44 = vpop.f32.mrf.mxu1  ;;  %v1805_v17 = vadd.f32 %v1804_v9, %v5273_v45  ;;  %v2063_v56 = vand.u32 2147483648, %v7136_v34 }
 0x2b9   :  { %v1854_v47 = vadd.f32 %v1853_v44, %v5480_v28  ;;  %4631 = vrcp.f32 %v7159_v10  ;;  %v2054_v52 = vsub.f32 1.0, %v2053_v30  ;;  %v7185_v41 = vadd.f32 %v2647_v33, %v2631_v32 }
 0x2ba   :  { %v2045_v55 = vsel %vm2044_vm4, %v4616_v4, %v2041_v57  ;;  %4633 = vpow2.f32 %v4223_v23  ;;  %v1933_v39 = vadd.f32 %v1805_v17, %v6913_v36  ;;  %v4239_v4 = vmul.f32 -1.442695, %v2252_v46 }
 0x2bb   :  { %v2050_v16 = vsel %vm7153_vm2, %v2049_v48, %v2045_v55  ;;  %v2253_v51 = vadd.f32 %v1854_v47, %v6921_v53  ;;  %v2055_v48 = vmul.f32 %v4624_v38, %v2054_v52  ;;  %v7190_v53 = vadd.f32 %v6181_v20, %v5483_v40 }
 0x2bc   :  { %v4626_v6 = vpop.eup %4625  ;;  %v2569_v59 = vmul.f32 %v2050_v16, %v1893_v43  ;;  %4635 = vpow2.f32 %v4239_v4  ;;  %v4224_v36 = vmul.f32 -1.442695, %v1933_v39  ;;  %v1895_v43 = vadd.f32 %v7079_v49, %v5985_v63 }
 0x2bd   :  { %v4628_v42 = vpop.eup %4627  ;;  %v2632_v7 = vmul.f32 %v4626_v6, %v2616_v54  ;;  %v4240_v54 = vmul.f32 -1.442695, %v2253_v51  ;;  %v2056_v32 = vadd.f32 %v4624_v38, %v2055_v48  ;;  %vm2057_vm6 = vweird.f32 %v7136_v34 }
 0x2be   :  { %v7183_v2 = vadd.f32 1.0, %v4628_v42  ;;  %v4630_v29 = vpop.eup %4629  ;;  %v2585_v8 = vadd.f32 %v2569_v59, %v6885_v50  ;;  %v1902_v57 = vpop.f32.mrf.mxu2  ;;  %vm2062_vm7 = vcmp.eq.f32.partialorder %v2061_v5, 8.507059e+37  ;;  %v7200_v50 = vadd.f32 %v7118_v11, %v5985_v63  ;;  %vm2059_vm8 = vmor %vm2057_vm6, %vm2058_vm5 }
 0x2bf   :  { %v7195_v37 = vpop.eup %4631  ;;  %v1806_v33 = vpop.f32.mrf.mxu0  ;;  %v2359_v44 = vsub.f32 1.0, %v7168_v14  ;;  %v2064_v49 = vor.u32 1.1754944e-38, %v2063_v56  ;;  %v7204_v23 = vadd.f32 1.0, %v4630_v29  ;;  %v2060_v47 = vsel %vm2059_vm8, %v4624_v38, %v2056_v32 }
 0x2c0   :  { %4637 = vrcp.f32 %v7183_v2  ;;  %v1855_v20 = vpop.f32.mrf.mxu1  ;;  %v4634_v9 = vpop.eup %4633  ;;  %v1807_v17 = vadd.f32 %v1806_v33, %v5273_v45  ;;  %v7210_v34 = vadd.f32 %v1899_v0, %v5985_v63  ;;  %v7216_v6 = vmul.f32 %v7195_v37, %v7159_v10 }
 0x2c1   :  { %v7207_v55 = vadd.f32 1.0, %v4634_v9  ;;  %4639 = vpow2.f32 %v4224_v36  ;;  %v2065_v11 = vsel %vm2062_vm7, %v2064_v49, %v2060_v47  ;;  %v1856_v30 = vadd.f32 %v1855_v20, %v5480_v28 }
 0x2c2   :  { %4641 = vpow2.f32 %v4240_v54  ;;  %v1934_v5 = vadd.f32 %v1807_v17, %v6917_v3  ;;  %v4636_v46 = vpop.eup %4635  ;;  %v2570_v16 = vmul.f32 %v2065_v11, %v1895_v43  ;;  %v2648_v38 = vmul.f32 %v7148_v12, %v6183_v60 }
 0x2c3   :  { %4643 = vrcp.f32 %v7207_v55  ;;  %v7222_v39 = vadd.f32 1.0, %v4636_v46  ;;  %v2254_v3 = vadd.f32 %v1856_v30, %v6933_v27  ;;  %vm2072_vm9 = vweird.f32 %v7183_v2 }
 0x2c4   :  { %4645 = vrcp.f32 %v7204_v23  ;;  %v4225_v51 = vmul.f32 -1.442695, %v1934_v5  ;;  %v2586_v42 = vadd.f32 %v2570_v16, %v6901_v31  ;;  %v2076_v52 = vand.u32 2147483647, %v7183_v2 }
 0x2c5   :  { %4647 = vtanh.f32 %v2585_v8  ;;  %v2078_v4 = vand.u32 2147483648, %v7183_v2  ;;  %v4241_v60 = vmul.f32 -1.442695, %v2254_v3  ;;  %v7230_v12 = vadd.f32 %v2648_v38, %v2632_v7 }
 0x2c6   :  { %v4638_v0 = vpop.eup %4637  ;;  %4649 = vrcp.f32 %v7222_v39  ;;  %v2091_v27 = vand.u32 2147483647, %v7207_v55  ;;  %v2093_v31 = vand.u32 2147483648, %v7207_v55  ;;  %v1904_v9 = vpop.f32.mrf.mxu2  ;;  %v2374_v17 = vsub.f32 1.0, %v7216_v6 }
 0x2c7   :  { %v2068_v59 = vmul.f32 %v4638_v0, %v7183_v2  ;;  %v4640_v56 = vpop.eup %4639  ;;  %v1809_v48 = vpop.f32.mrf.mxu0  ;;  %4651 = vpow2.f32 %v4225_v51  ;;  %v2679_v8 = vpack.c.bf16 %v7230_v12, %v7185_v41  ;;  %vm2073_vm10 = vweird.f32 %v4638_v0 }
 0x2c8   :  { %v4642_v36 = vpop.eup %4641  ;;  %v7235_v43 = vadd.f32 1.0, %v4640_v56  ;;  %v1810_v54 = vadd.f32 %v1809_v48, %v5273_v45  ;;  %v1858_v7 = vpop.f32.mrf.mxu1  ;;  %4653 = vpow2.f32 %v4241_v60  ;;  %v7251_v11 = vadd.f32 %v1902_v57, %v5985_v63  ;;  %vm2074_vm13 = vmor %vm2072_vm9, %vm2073_vm10 }
 0x2c9   :  { %v2069_v29 = vsub.f32 1.0, %v2068_v59  ;;  %v7240_v32 = vpop.eup %4643  ;;  %v7242_v20 = vadd.f32 1.0, %v4642_v36  ;;  %2695 = vmatmul.bf16.vlgmr.msra.gmra.mxu3 %v2679_v8  ;;  %2744 = vmatmul.bf16.vlgmr.msra.gmra.mxu0 %v2679_v8  ;;  %vm7253_vm11 = vcmp.eq.f32.partialorder %v2076_v52, 8.507059e+37  ;;  %v2079_v46 = vor.u32 1.1754944e-38, %v2078_v4 }
 0x2ca   :  { %v7244_v49 = vpop.eup %4645  ;;  %v2083_v47 = vmul.f32 %v7240_v32, %v7207_v55  ;;  %4655 = vrcp.f32 %v7235_v43  ;;  %vm2087_vm12 = vweird.f32 %v7207_v55  ;;  %2793 = vmatmul.bf16.vlgmr.msra.gmra.mxu1 %v2679_v8  ;;  %vm7263_vm14 = vcmp.eq.f32.partialorder %v2091_v27, 8.507059e+37 }
 0x2cb   :  { %v2070_v33 = vmul.f32 %v4638_v0, %v2069_v29  ;;  %v7258_v16 = vpop.eup %4647  ;;  %4657 = vrcp.f32 %v7242_v20  ;;  %v1935_v51 = vadd.f32 %v1810_v54, %v6929_v15  ;;  %v7273_v59 = vmul.f32 %v7244_v49, %v7204_v23 }
 0x2cc   :  { %v2084_v38 = vsub.f32 1.0, %v2083_v47  ;;  %v7269_v3 = vpop.eup %4649  ;;  %vm2088_vm15 = vweird.f32 %v7240_v32  ;;  %v2094_v2 = vor.u32 1.1754944e-38, %v2093_v31  ;;  %v1859_v27 = vadd.f32 %v1858_v7, %v5480_v28 }
 0x2cd   :  { %v2071_v5 = vadd.f32 %v4638_v0, %v2070_v33  ;;  %v4652_v4 = vpop.eup %4651  ;;  %v4226_v29 = vmul.f32 -1.442695, %v1935_v51  ;;  %4659 = vtanh.f32 %v2586_v42  ;;  %v2106_v36 = vand.u32 2147483647, %v7235_v43  ;;  %vm7295_vm0 = vmor %vm2087_vm12, %vm2088_vm15 }
 0x2ce   :  { %v2085_v56 = vmul.f32 %v7240_v32, %v2084_v38  ;;  %v4654_v15 = vpop.eup %4653  ;;  %v7282_v8 = vadd.f32 1.0, %v4652_v4  ;;  %v7286_v31 = vmul.f32 %v7269_v3, %v7222_v39  ;;  %v2108_v33 = vand.u32 2147483648, %v7235_v43  ;;  %v1907_v4 = vpop.f32.mrf.mxu2 }
 0x2cf   :  { %v2075_v52 = vsel %vm2074_vm13, %v4638_v0, %v2071_v5  ;;  %4661 = vpow2.f32 %v4226_v29  ;;  %v7302_v47 = vadd.f32 %v1904_v9, %v5985_v63  ;;  %v2389_v30 = vsub.f32 1.0, %v7273_v59  ;;  %v1811_v38 = vpop.f32.mrf.mxu0 }
 0x2d0   :  { %v2080_v60 = vsel %vm7253_vm11, %v2079_v46, %v2075_v52  ;;  %v4656_v0 = vpop.eup %4655  ;;  %v2086_v54 = vadd.f32 %v7240_v32, %v2085_v56  ;;  %4663 = vrcp.f32 %v7282_v8  ;;  %v7310_v55 = vadd.f32 1.0, %v4654_v15  ;;  %v1860_v51 = vpop.f32.mrf.mxu1 }
 0x2d1   :  { %v2571_v48 = vmul.f32 %v2080_v60, %v7200_v50  ;;  %v2098_v42 = vmul.f32 %v4656_v0, %v7235_v43  ;;  %v7304_v5 = vpop.eup %4657  ;;  %v2255_v46 = vadd.f32 %v1859_v27, %v6947_v61  ;;  %vm2102_vm1 = vweird.f32 %v7235_v43 }
 0x2d2   :  { %vm7314_vm2 = vcmp.eq.f32.partialorder %v2106_v36, 8.507059e+37  ;;  %v2360_v60 = vmul.f32 %v7157_v25, %v2359_v44  ;;  %vm2103_vm3 = vweird.f32 %v4656_v0  ;;  %v2109_v61 = vor.u32 1.1754944e-38, %v2108_v33 }
 0x2d3   :  { %v2587_v7 = vadd.f32 %v2571_v48, %v6909_v35  ;;  %v2090_v35 = vsel %vm7295_vm0, %v7240_v32, %v2086_v54  ;;  %v2099_v52 = vsub.f32 1.0, %v2098_v42  ;;  %v2404_v32 = vsub.f32 1.0, %v7286_v31  ;;  %v7324_v29 = vpop.eup %4659  ;;  %vm2104_vm4 = vmor %vm2102_vm1, %vm2103_vm3 }
 0x2d4   :  { %v2095_v56 = vsel %vm7263_vm14, %v2094_v2, %v2090_v35  ;;  %v7328_v27 = vmul.f32 %v7304_v5, %v7242_v20  ;;  %v1812_v48 = vadd.f32 %v1811_v38, %v5273_v45  ;;  %v1861_v14 = vadd.f32 %v1860_v51, %v5480_v28 }
 0x2d5   :  { %v2100_v15 = vmul.f32 %v4656_v0, %v2099_v52  ;;  %v4662_v36 = vpop.eup %4661  ;;  %4665 = vrcp.f32 %v7310_v55  ;;  %v2121_v44 = vand.u32 2147483647, %v7282_v8  ;;  %v4242_v57 = vmul.f32 -1.442695, %v2255_v46 }
 0x2d6   :  { %v7335_v2 = vadd.f32 %v1907_v4, %v5985_v63  ;;  %v4664_v54 = vpop.eup %4663  ;;  %v2572_v33 = vmul.f32 %v2095_v56, %v7210_v34  ;;  %v7338_v42 = vadd.f32 1.0, %v4662_v36  ;;  %v1936_v35 = vadd.f32 %v1812_v48, %v6941_v21 }
 0x2d7   :  { %v2101_v50 = vadd.f32 %v4656_v0, %v2100_v15  ;;  %4667 = vtanh.f32 %v2587_v7  ;;  %v2113_v38 = vmul.f32 %v4664_v54, %v7282_v8  ;;  %vm2117_vm5 = vweird.f32 %v7282_v8 }
 0x2d8   :  { %v2123_v46 = vand.u32 2147483648, %v7282_v8  ;;  %v2419_v51 = vsub.f32 1.0, %v7328_v27  ;;  %4669 = vrcp.f32 %v7338_v42  ;;  %v2256_v34 = vadd.f32 %v1861_v14, %v6951_v1 }
 0x2d9   :  { %v2105_v52 = vsel %vm2104_vm4, %v4656_v0, %v2101_v50  ;;  %v2114_v7 = vsub.f32 1.0, %v2113_v38  ;;  %vm7352_vm6 = vcmp.eq.f32.partialorder %v2121_v44, 8.507059e+37  ;;  %4671 = vpow2.f32 %v4242_v57  ;;  %v1814_v38 = vpop.f32.mrf.mxu0 }
 0x2da   :  { %v2110_v21 = vsel %vm7314_vm2, %v2109_v61, %v2105_v52  ;;  %v2588_v4 = vadd.f32 %v2572_v33, %v6925_v24  ;;  %vm2118_vm7 = vweird.f32 %v4664_v54  ;;  %v4227_v15 = vmul.f32 -1.442695, %v1936_v35 }
 0x2db   :  { %v2573_v56 = vmul.f32 %v2110_v21, %v7251_v11  ;;  %v7358_v0 = vpop.eup %4665  ;;  %v2115_v48 = vmul.f32 %v4664_v54, %v2114_v7  ;;  %v2124_v36 = vor.u32 1.1754944e-38, %v2123_v46  ;;  %v2361_v1 = vadd.f32 %v7157_v25, %v2360_v60  ;;  %vm7371_vm10 = vmor %vm2117_vm5, %vm2118_vm7  ;;  %v1863_v46 = vpop.f32.mrf.mxu1 }
 0x2dc   :  { %vm2363_vm8 = vweird.f32 %v7157_v25  ;;  %v4243_v61 = vmul.f32 -1.442695, %v2256_v34  ;;  %vm2362_vm9 = vweird.f32 %v7108_v26  ;;  %v2366_v24 = vand.u32 2147483647, %v7108_v26 }
 0x2dd   :  { %v7363_v9 = vadd.f32 %v2573_v56, %v6937_v62  ;;  %v7367_v14 = vpop.eup %4667  ;;  %v2116_v11 = vadd.f32 %v4664_v54, %v2115_v48  ;;  %4673 = vpow2.f32 %v4227_v15  ;;  %v2368_v60 = vand.u32 2147483648, %v7108_v26  ;;  %vm7383_vm12 = vmor %vm2362_vm9, %vm2363_vm8  ;;  %v7410_v48 = vpop.f32.mrf.mxu2 }
 0x2de   :  { %v2375_v62 = vmul.f32 %v7195_v37, %v2374_v17  ;;  %v4670_v57 = vpop.eup %4669  ;;  %4675 = vtanh.f32 %v2588_v4  ;;  %vm2132_vm11 = vweird.f32 %v7338_v42  ;;  %v2136_v33 = vand.u32 2147483647, %v7338_v42 }
 0x2df   :  { %vm2378_vm13 = vweird.f32 %v7195_v37  ;;  %v4672_v50 = vpop.eup %4671  ;;  %v2120_v26 = vsel %vm7371_vm10, %v4664_v54, %v2116_v11  ;;  %v2128_v6 = vmul.f32 %v4670_v57, %v7338_v42  ;;  %v2138_v17 = vand.u32 2147483648, %v7338_v42 }
 0x2e0   :  { %v2365_v35 = vsel %vm7383_vm12, %v7157_v25, %v2361_v1  ;;  %v2369_v52 = vor.u32 1.1754944e-38, %v2368_v60  ;;  %v2376_v34 = vadd.f32 %v7195_v37, %v2375_v62  ;;  %vm2377_vm14 = vweird.f32 %v7159_v10 }
 0x2e1   :  { %v2381_v21 = vand.u32 2147483647, %v7159_v10  ;;  %v2129_v7 = vsub.f32 1.0, %v2128_v6  ;;  %4677 = vpow2.f32 %v4243_v61  ;;  %vm2367_vm15 = vcmp.eq.f32.partialorder %v2366_v24, 8.507059e+37  ;;  %vm7400_vm0 = vmor %vm2377_vm14, %vm2378_vm13 }
 0x2e2   :  { %v2383_v25 = vand.u32 2147483648, %v7159_v10  ;;  %v2125_v4 = vsel %vm7352_vm6, %v2124_v36, %v2120_v26  ;;  %v2370_v56 = vsel %vm2367_vm15, %v2369_v52, %v2365_v35  ;;  %v2380_v15 = vsel %vm7400_vm0, %v7195_v37, %v2376_v34 }
 0x2e3   :  { %v1815_v1 = vadd.f32 %v1814_v38, %v5273_v45  ;;  %v4674_v61 = vpop.eup %4673  ;;  %v7413_v24 = vadd.f32 1.0, %v4672_v50  ;;  %v2130_v11 = vmul.f32 %v4670_v57, %v2129_v7  ;;  %vm2133_vm1 = vweird.f32 %v4670_v57  ;;  %v1816_v7 = vpop.f32.mrf.mxu0 }
 0x2e4   :  { %v2384_v44 = vor.u32 1.1754944e-38, %v2383_v25  ;;  %v7415_v60 = vpop.eup %4675  ;;  %v2139_v10 = vor.u32 1.1754944e-38, %v2138_v17  ;;  %v7417_v43 = vadd.f32 1.0, %v4674_v61  ;;  %vm2382_vm2 = vcmp.eq.f32.partialorder %v2381_v21, 8.507059e+37  ;;  %vm2134_vm3 = vmor %vm2132_vm11, %vm2133_vm1  ;;  %v1865_v54 = vpop.f32.mrf.mxu1  ;;  %v9694_v61 = vld [vmem:[#allocation30_spill] sm:$0xff] }
 0x2e5   :  { %v2617_v36 = vsub.f32 1.0, %v2370_v56  ;;  %v2574_v62 = vmul.f32 %v2125_v4, %v7302_v47  ;;  %v2131_v37 = vadd.f32 %v4670_v57, %v2130_v11  ;;  %v1937_v26 = vadd.f32 %v1815_v1, %v6961_v18  ;;  %v1912_v1 = vpop.f32.mrf.mxu2 }
 0x2e6   :  { %v2385_v8 = vsel %vm2382_vm2, %v2384_v44, %v2380_v15  ;;  %4679 = vrcp.f32 %v7417_v43  ;;  %v2649_v17 = vmul.f32 %v2370_v56, %v6247_v13  ;;  %v7428_v38 = vmul.f32 %v7358_v0, %v7310_v55  ;;  %v9693_v56 = vld [vmem:[#allocation33_spill] sm:$0xff] }
 0x2e7   :  { %v2618_v50 = vsub.f32 1.0, %v2385_v8  ;;  %v2633_v6 = vmul.f32 %v7258_v16, %v2617_v36  ;;  %v4678_v35 = vpop.eup %4677  ;;  %4681 = vrcp.f32 %v7413_v24  ;;  %v2135_v47 = vsel %vm2134_vm3, %v4670_v57, %v2131_v37 }
 0x2e8   :  { %vm2137_vm4 = vcmp.eq.f32.partialorder %v2136_v33, 8.507059e+37  ;;  %v2650_v52 = vmul.f32 %v2385_v8, %v6297_v58  ;;  %4683 = vtanh.f32 %v7363_v9  ;;  %v2590_v13 = vadd.f32 %v2574_v62, %v6957_v19 }
 0x2e9   :  { %v2140_v18 = vsel %vm2137_vm4, %v2139_v10, %v2135_v47  ;;  %v2634_v42 = vmul.f32 %v7324_v29, %v2618_v50  ;;  %v7433_v34 = vadd.f32 %v2649_v17, %v2633_v6  ;;  %v4228_v21 = vmul.f32 -1.442695, %v1937_v26  ;;  %v9695_v10 = vld [vmem:[#allocation35_spill] sm:$0xff] }
 0x2ea   :  { %v2575_v16 = vmul.f32 %v2140_v18, %v7335_v2  ;;  %v7438_v25 = vadd.f32 1.0, %v4678_v35  ;;  %v1864_v33 = vadd.f32 %v1863_v46, %v5480_v28  ;;  %v1817_v29 = vadd.f32 %v1816_v7, %v5273_v45 }
 0x2eb   :  { %v7440_v57 = vadd.f32 %v2650_v52, %v2634_v42  ;;  %v2434_v58 = vsub.f32 1.0, %v7428_v38  ;;  %4685 = vpow2.f32 %v4228_v21  ;;  %v1866_v19 = vadd.f32 %v1865_v54, %v5480_v28 }
 0x2ec   :  { %v7446_v4 = vadd.f32 %v2575_v16, %v6970_v22  ;;  %v7449_v2 = vpop.eup %4679  ;;  %v2257_v15 = vadd.f32 %v1864_v33, %v9693_v56  ;;  %v1938_v46 = vadd.f32 %v1817_v29, %v9694_v61  ;;  %v2390_v11 = vmul.f32 %v7244_v49, %v2389_v30 }
 0x2ed   :  { %v2680_v9 = vpack.c.bf16 %v7440_v57, %v7433_v34  ;;  %v7458_v44 = vpop.eup %4681  ;;  %4687 = vtanh.f32 %v2590_v13  ;;  %v2143_v22 = vmul.f32 %v7449_v2, %v7417_v43  ;;  %vm2147_vm5 = vweird.f32 %v7417_v43 }
 0x2ee   :  { %v2258_v36 = vadd.f32 %v1866_v19, %v9695_v10  ;;  %4689 = vrcp.f32 %v7438_v25  ;;  %v4244_v62 = vmul.f32 -1.442695, %v2257_v15  ;;  %v4229_v37 = vmul.f32 -1.442695, %v1938_v46  ;;  %v7466_v8 = vpop.eup %4683 }
 0x2ef   :  { %2700 = vmatmul.bf16.gmra.mxu3 %v2680_v9  ;;  %2749 = vmatmul.bf16.gmra.mxu0 %v2680_v9  ;;  %v2391_v59 = vadd.f32 %v7244_v49, %v2390_v11  ;;  %v2144_v30 = vsub.f32 1.0, %v2143_v22  ;;  %vm2392_vm6 = vweird.f32 %v7204_v23  ;;  %vm2393_vm7 = vweird.f32 %v7244_v49 }
 0x2f0   :  { %2798 = vmatmul.bf16.gmra.mxu1 %v2680_v9  ;;  %v4245_v26 = vmul.f32 -1.442695, %v2258_v36  ;;  %4691 = vpow2.f32 %v4244_v62  ;;  %v2396_v50 = vand.u32 2147483647, %v7204_v23  ;;  %v2398_v6 = vand.u32 2147483648, %v7204_v23  ;;  %vm7478_vm9 = vmor %vm2392_vm6, %vm2393_vm7 }
 0x2f1   :  { %v2405_v17 = vmul.f32 %v7269_v3, %v2404_v32  ;;  %v4686_v35 = vpop.eup %4685  ;;  %v2145_v47 = vmul.f32 %v7449_v2, %v2144_v30  ;;  %vm2148_vm8 = vweird.f32 %v7449_v2  ;;  %v2151_v18 = vand.u32 2147483647, %v7417_v43  ;;  %v1819_v30 = vpop.f32.mrf.mxu0 }
 0x2f2   :  { %4693 = vpow2.f32 %v4229_v37  ;;  %v2153_v52 = vand.u32 2147483648, %v7417_v43  ;;  %v7483_v13 = vadd.f32 1.0, %v4686_v35  ;;  %v2395_v23 = vsel %vm7478_vm9, %v7244_v49, %v2391_v59  ;;  %vm7505_vm11 = vmor %vm2147_vm5, %vm2148_vm8 }
 0x2f3   :  { %4695 = vpow2.f32 %v4245_v26  ;;  %v7488_v31 = vpop.eup %4687  ;;  %v2146_v32 = vadd.f32 %v7449_v2, %v2145_v47  ;;  %v2399_v16 = vor.u32 1.1754944e-38, %v2398_v6  ;;  %v2406_v21 = vadd.f32 %v7269_v3, %v2405_v17  ;;  %v9702_v17 = vld [vmem:[#allocation60_spill] sm:$0xff] }
 0x2f4   :  { %vm2408_vm10 = vweird.f32 %v7269_v3  ;;  %v7493_v7 = vpop.eup %4689  ;;  %v7497_v54 = vmul.f32 %v7458_v44, %v7413_v24  ;;  %v1910_v33 = vadd.f32 %v7410_v48, %v5985_v63  ;;  %4697 = vrcp.f32 %v7483_v13 }
 0x2f5   :  { %vm2397_vm12 = vcmp.eq.f32.partialorder %v2396_v50, 8.507059e+37  ;;  %v2150_v29 = vsel %vm7505_vm11, %v7449_v2, %v2146_v32  ;;  %vm2407_vm13 = vweird.f32 %v7222_v39  ;;  %v2411_v48 = vand.u32 2147483647, %v7222_v39  ;;  %v1914_v2 = vpop.f32.mrf.mxu2 }
 0x2f6   :  { %v2400_v19 = vsel %vm2397_vm12, %v2399_v16, %v2395_v23  ;;  %v4692_v9 = vpop.eup %4691  ;;  %vm2152_vm14 = vcmp.eq.f32.partialorder %v2151_v18, 8.507059e+37  ;;  %v2154_v56 = vor.u32 1.1754944e-38, %v2153_v52  ;;  %v7516_v43 = vadd.f32 %v1912_v1, %v5985_v63  ;;  %vm7520_vm15 = vmor %vm2407_vm13, %vm2408_vm10 }
 0x2f7   :  { %v2413_v61 = vand.u32 2147483648, %v7222_v39  ;;  %v2166_v11 = vand.u32 2147483647, %v7483_v13  ;;  %v2168_v22 = vand.u32 2147483648, %v7483_v13  ;;  %v2410_v10 = vsel %vm7520_vm15, %v7269_v3, %v2406_v21  ;;  %v1868_v39 = vpop.f32.mrf.mxu1 }
 0x2f8   :  { %v4694_v46 = vpop.eup %4693  ;;  %v2619_v1 = vsub.f32 1.0, %v2400_v19  ;;  %4699 = vtanh.f32 %v7446_v4  ;;  %v2155_v62 = vsel %vm2152_vm14, %v2154_v56, %v2150_v29  ;;  %v7535_v26 = vmul.f32 %v7493_v7, %v7438_v25  ;;  %v9705_v29 = vld [vmem:[#allocation82_spill] sm:$0xff] }
 0x2f9   :  { %v4696_v36 = vpop.eup %4695  ;;  %v7531_v37 = vadd.f32 1.0, %v4694_v46  ;;  %v2414_v59 = vor.u32 1.1754944e-38, %v2413_v61  ;;  %vm2162_vm0 = vweird.f32 %v7483_v13  ;;  %vm2412_vm1 = vcmp.eq.f32.partialorder %v2411_v48, 8.507059e+37  ;;  %v9706_v46 = vld [vmem:[#allocation37_spill] sm:$0xff] }
 0x2fa   :  { %v2635_v50 = vmul.f32 %v7367_v14, %v2619_v1  ;;  %v4698_v3 = vpop.eup %4697  ;;  %v7539_v6 = vadd.f32 1.0, %v4692_v9  ;;  %v2651_v35 = vmul.f32 %v2400_v19, %v9702_v17  ;;  %v2576_v47 = vmul.f32 %v2155_v62, %v1910_v33  ;;  %v1821_v17 = vpop.f32.mrf.mxu0 }
 0x2fb   :  { %4701 = vrcp.f32 %v7531_v37  ;;  %v2415_v4 = vsel %vm2412_vm1, %v2414_v59, %v2410_v10  ;;  %v2158_v18 = vmul.f32 %v4698_v3, %v7483_v13  ;;  %vm7544_vm2 = vcmp.eq.f32.partialorder %v2166_v11, 8.507059e+37  ;;  %v9707_v10 = vld [vmem:[#allocation34_spill] sm:$0xff] }
 0x2fc   :  { %v2169_v52 = vor.u32 1.1754944e-38, %v2168_v22  ;;  %v2620_v23 = vsub.f32 1.0, %v2415_v4  ;;  %v7548_v32 = vadd.f32 1.0, %v4696_v36  ;;  %v7550_v14 = vadd.f32 %v2651_v35, %v2635_v50  ;;  %v9708_v36 = vld [vmem:[#allocation38_spill] sm:$0xff] }
 0x2fd   :  { %v7553_v16 = vadd.f32 %v1914_v2, %v5985_v63  ;;  %v2181_v21 = vand.u32 2147483647, %v7531_v37  ;;  %v2159_v49 = vsub.f32 1.0, %v2158_v18  ;;  %v2652_v19 = vmul.f32 %v2415_v4, %v9705_v29  ;;  %v7576_v27 = vpop.f32.mrf.mxu2 }
 0x2fe   :  { %v2636_v33 = vmul.f32 %v7415_v60, %v2620_v23  ;;  %v1820_v48 = vadd.f32 %v1819_v30, %v5273_v45  ;;  %v7559_v9 = vpop.eup %4699  ;;  %4703 = vrcp.f32 %v7539_v6  ;;  %vm2163_vm3 = vweird.f32 %v4698_v3 }
 0x2ff   :  { %v1869_v56 = vadd.f32 %v1868_v39, %v5480_v28  ;;  %v2420_v15 = vmul.f32 %v7304_v5, %v2419_v51  ;;  %v2160_v61 = vmul.f32 %v4698_v3, %v2159_v49  ;;  %v2183_v60 = vand.u32 2147483648, %v7531_v37  ;;  %vm2164_vm7 = vmor %vm2162_vm0, %vm2163_vm3  ;;  %v1870_v35 = vpop.f32.mrf.mxu1 }
 0x300   :  { %v7566_v2 = vadd.f32 %v2652_v19, %v2636_v33  ;;  %v1939_v11 = vadd.f32 %v1820_v48, %v9706_v46  ;;  %v7571_v1 = vadd.f32 %v2576_v47, %v9707_v10  ;;  %4705 = vrcp.f32 %v7548_v32 }
 0x301   :  { %v4702_v22 = vpop.eup %4701  ;;  %vm2177_vm4 = vweird.f32 %v7531_v37  ;;  %v2259_v62 = vadd.f32 %v1869_v56, %v9708_v36  ;;  %v2161_v51 = vadd.f32 %v4698_v3, %v2160_v61  ;;  %vm7581_vm5 = vcmp.eq.f32.partialorder %v2181_v21, 8.507059e+37  ;;  %v9714_v61 = vld [vmem:[#allocation42_spill] sm:$0xff] }
 0x302   :  { %v2681_v59 = vpack.c.bf16 %v7566_v2, %v7550_v14  ;;  %v2173_v30 = vmul.f32 %v4702_v22, %v7531_v37  ;;  %vm2422_vm6 = vweird.f32 %v7242_v20  ;;  %v4230_v50 = vmul.f32 -1.442695, %v1939_v11  ;;  %v9715_v11 = vld [vmem:[#allocation36_spill] sm:$0xff] }
 0x303   :  { %v4246_v4 = vmul.f32 -1.442695, %v2259_v62  ;;  %v2421_v47 = vadd.f32 %v7304_v5, %v2420_v15  ;;  %vm2423_vm8 = vweird.f32 %v7304_v5  ;;  %v2165_v18 = vsel %vm2164_vm7, %v4698_v3, %v2161_v51 }
 0x304   :  { %2705 = vmatmul.bf16.gmra.mxu3 %v2681_v59  ;;  %2754 = vmatmul.bf16.gmra.mxu0 %v2681_v59  ;;  %v2174_v23 = vsub.f32 1.0, %v2173_v30  ;;  %v2184_v21 = vor.u32 1.1754944e-38, %v2183_v60  ;;  %v1822_v49 = vadd.f32 %v1821_v17, %v5273_v45  ;;  %v7592_v33 = vpop.eup %4703  ;;  %v2170_v13 = vsel %vm7544_vm2, %v2169_v52, %v2165_v18  ;;  %vm7603_vm10 = vmor %vm2422_vm6, %vm2423_vm8  ;;  %v9713_v52 = vld [vmem:[#allocation40_spill] sm:$0xff] }
 0x305   :  { %2803 = vmatmul.bf16.gmra.mxu1 %v2681_v59  ;;  %4707 = vpow2.f32 %v4230_v50  ;;  %v1871_v29 = vadd.f32 %v1870_v35, %v5480_v28  ;;  %v2426_v19 = vand.u32 2147483647, %v7242_v20  ;;  %v2577_v48 = vmul.f32 %v2170_v13, %v7516_v43  ;;  %v1919_v35 = vpop.f32.mrf.mxu2 }
 0x306   :  { %v2175_v3 = vmul.f32 %v4702_v22, %v2174_v23  ;;  %vm2178_vm9 = vweird.f32 %v4702_v22  ;;  %4709 = vpow2.f32 %v4246_v4  ;;  %v7607_v42 = vpop.eup %4705  ;;  %v1940_v15 = vadd.f32 %v1822_v49, %v9713_v52  ;;  %v1824_v23 = vpop.f32.mrf.mxu0 }
 0x307   :  { %v2260_v60 = vadd.f32 %v1871_v29, %v9714_v61  ;;  %v2425_v43 = vsel %vm7603_vm10, %v7304_v5, %v2421_v47  ;;  %v2428_v46 = vand.u32 2147483648, %v7242_v20  ;;  %v2593_v10 = vadd.f32 %v2577_v48, %v9715_v11  ;;  %vm2179_vm12 = vmor %vm2177_vm4, %vm2178_vm9 }
 0x308   :  { %v2176_v36 = vadd.f32 %v4702_v22, %v2175_v3  ;;  %vm2427_vm11 = vcmp.eq.f32.partialorder %v2426_v19, 8.507059e+37  ;;  %v2435_v62 = vmul.f32 %v7358_v0, %v2434_v58  ;;  %v4231_v51 = vmul.f32 -1.442695, %v1940_v15  ;;  %v9719_v15 = vld [vmem:[#allocation25_spill] sm:$0xff] }
 0x309   :  { %v4247_v59 = vmul.f32 -1.442695, %v2260_v60  ;;  %v2429_v30 = vor.u32 1.1754944e-38, %v2428_v46  ;;  %vm2438_vm13 = vweird.f32 %v7358_v0  ;;  %vm2437_vm14 = vweird.f32 %v7310_v55 }
 0x30a   :  { %v2180_v50 = vsel %vm2179_vm12, %v4702_v22, %v2176_v36  ;;  %v2436_v5 = vadd.f32 %v7358_v0, %v2435_v62  ;;  %v2441_v20 = vand.u32 2147483647, %v7310_v55  ;;  %4711 = vpow2.f32 %v4231_v51  ;;  %vm7627_vm15 = vmor %vm2437_vm14, %vm2438_vm13  ;;  %v9720_v62 = vld [vmem:[#allocation85_spill] sm:$0xff] }
 0x30b   :  { %v4708_v4 = vpop.eup %4707  ;;  %v2185_v38 = vsel %vm7581_vm5, %v2184_v21, %v2180_v50  ;;  %v2430_v58 = vsel %vm2427_vm11, %v2429_v30, %v2425_v43  ;;  %v2443_v17 = vand.u32 2147483648, %v7310_v55  ;;  %4713 = vpow2.f32 %v4247_v59  ;;  %v1873_v21 = vpop.f32.mrf.mxu1 }
 0x30c   :  { %v4710_v22 = vpop.eup %4709  ;;  %v2578_v47 = vmul.f32 %v2185_v38, %v7553_v16  ;;  %v7633_v18 = vadd.f32 1.0, %v4708_v4  ;;  %v2440_v39 = vsel %vm7627_vm15, %v7358_v0, %v2436_v5  ;;  %4715 = vtanh.f32 %v7571_v1  ;;  %v9722_v5 = vld [vmem:[#allocation41_spill] sm:$0xff] }
 0x30d   :  { %v7639_v49 = vadd.f32 1.0, %v4710_v22  ;;  %v2444_v13 = vor.u32 1.1754944e-38, %v2443_v17  ;;  %v2621_v29 = vsub.f32 1.0, %v2430_v58  ;;  %v2449_v55 = vsub.f32 1.0, %v7497_v54  ;;  %v9718_v54 = vld [vmem:[#allocation39_spill] sm:$0xff]  ;;  %v1922_v22 = vpop.f32.mrf.mxu2 }
 0x30e   :  { %v2464_v19 = vsub.f32 1.0, %v7535_v26  ;;  %4717 = vrcp.f32 %v7633_v18  ;;  %vm2442_vm0 = vcmp.eq.f32.partialorder %v2441_v20, 8.507059e+37  ;;  %v7646_v16 = vmul.f32 %v7592_v33, %v7539_v6  ;;  %v9735_v26 = vld [vmem:[#allocation45_spill] sm:$0xff] }
 0x30f   :  { %v7650_v0 = vadd.f32 %v7576_v27, %v5985_v63  ;;  %v2445_v1 = vsel %vm2442_vm0, %v2444_v13, %v2440_v39  ;;  %v2637_v48 = vmul.f32 %v7466_v8, %v2621_v29  ;;  %v7655_v3 = vmul.f32 %v7607_v42, %v7548_v32  ;;  %v1826_v13 = vpop.f32.mrf.mxu0 }
 0x310   :  { %v2594_v56 = vadd.f32 %v2578_v47, %v9718_v54  ;;  %v2622_v52 = vsub.f32 1.0, %v2445_v1  ;;  %v2653_v61 = vmul.f32 %v2430_v58, %v9719_v15  ;;  %v4712_v60 = vpop.eup %4711  ;;  %4719 = vrcp.f32 %v7639_v49 }
 0x311   :  { %v2196_v43 = vand.u32 2147483647, %v7633_v18  ;;  %v2198_v27 = vand.u32 2147483648, %v7633_v18  ;;  %v1825_v46 = vadd.f32 %v1824_v23, %v5273_v45  ;;  %v4714_v11 = vpop.eup %4713  ;;  %v7663_v8 = vadd.f32 1.0, %v4712_v60 }
 0x312   :  { %v2638_v36 = vmul.f32 %v7488_v31, %v2622_v52  ;;  %v2654_v51 = vmul.f32 %v2445_v1, %v9720_v62  ;;  %v7667_v59 = vadd.f32 %v2653_v61, %v2637_v48  ;;  %v7669_v30 = vpop.eup %4715  ;;  %v2479_v50 = vsub.f32 1.0, %v7646_v16  ;;  %v4375_v1 = vld [vmem:[%s9341_s5 + $0x38] sm:$0xff] }
 0x313   :  { %4721 = vtanh.f32 %v2593_v10  ;;  %v1941_v20 = vadd.f32 %v1825_v46, %v9722_v5  ;;  %v1874_v4 = vadd.f32 %v1873_v21, %v5480_v28  ;;  %v2494_v58 = vsub.f32 1.0, %v7655_v3  ;;  %v1875_v29 = vpop.f32.mrf.mxu1  ;;  %3730 = vmatpush.bf16.msra.mxu2 %v4375_v1 }
 0x314   :  { %9721 = vst [vmem:[#allocation47_spill] sm:$0xff] %v7667_v59  ;;  %v4718_v38 = vpop.eup %4717  ;;  %vm2192_vm1 = vweird.f32 %v7633_v18  ;;  %4723 = vrcp.f32 %v7663_v8  ;;  %v7677_v31 = vadd.f32 %v2654_v51, %v2638_v36  ;;  %vm7680_vm2 = vcmp.eq.f32.partialorder %v2196_v43, 8.507059e+37 }
 0x315   :  { %4725 = vtanh.f32 %v2594_v56  ;;  %v2188_v37 = vmul.f32 %v4718_v38, %v7633_v18  ;;  %v7684_v10 = vadd.f32 1.0, %v4714_v11  ;;  %v2199_v47 = vor.u32 1.1754944e-38, %v2198_v27  ;;  %v9726_v56 = vld [vmem:[#allocation44_spill] sm:$0xff]  ;;  %v9727_v11 = vld [vmem:[#allocation46_spill] sm:$0xff] }
 0x316   :  { %9723 = vst [vmem:[#allocation48_spill] sm:$0xff] %v7677_v31  ;;  %v2682_v39 = vpack.c.bf16 %v7677_v31, %v7667_v59  ;;  %v7689_v23 = vadd.f32 %v1919_v35, %v5985_v63  ;;  %v4232_v21 = vmul.f32 -1.442695, %v1941_v20  ;;  %v7694_v48 = vpop.eup %4719  ;;  %v2261_v52 = vadd.f32 %v1874_v4, %v9726_v56 }
 0x317   :  { %v2189_v54 = vsub.f32 1.0, %v2188_v37  ;;  %v1827_v15 = vadd.f32 %v1826_v13, %v5273_v45  ;;  %v2450_v61 = vmul.f32 %v7458_v44, %v2449_v55  ;;  %vm2193_vm3 = vweird.f32 %v4718_v38 }
 0x318   :  { %2710 = vmatmul.bf16.gmra.mxu3 %v2682_v39  ;;  %2759 = vmatmul.bf16.gmra.mxu0 %v2682_v39  ;;  %4727 = vpow2.f32 %v4232_v21  ;;  %v7700_v35 = vadd.f32 %v1922_v22, %v5985_v63  ;;  %v1876_v60 = vadd.f32 %v1875_v29, %v5480_v28  ;;  %vm2207_vm4 = vweird.f32 %v7663_v8  ;;  %vm2194_vm5 = vmor %vm2192_vm1, %vm2193_vm3 }
 0x319   :  { %v7703_v43 = vpop.eup %4721  ;;  %v2190_v27 = vmul.f32 %v4718_v38, %v2189_v54  ;;  %4729 = vrcp.f32 %v7684_v10  ;;  %2808 = vmatmul.bf16.gmra.mxu1 %v2682_v39  ;;  %v4248_v46 = vmul.f32 -1.442695, %v2261_v52  ;;  %v1942_v55 = vadd.f32 %v1827_v15, %v9727_v11 }
 0x31a   :  { %v4724_v36 = vpop.eup %4723  ;;  %v7710_v62 = vmul.f32 %v7694_v48, %v7639_v49  ;;  %v2211_v51 = vand.u32 2147483647, %v7663_v8  ;;  %v2213_v5 = vand.u32 2147483648, %v7663_v8  ;;  %v2262_v20 = vadd.f32 %v1876_v60, %v7190_v53 }
 0x31b   :  { %v7715_v4 = vpop.eup %4725  ;;  %v2191_v37 = vadd.f32 %v4718_v38, %v2190_v27  ;;  %v2203_v22 = vmul.f32 %v4724_v36, %v7663_v8  ;;  %4731 = vpow2.f32 %v4248_v46  ;;  %v2451_v39 = vadd.f32 %v7458_v44, %v2450_v61 }
 0x31c   :  { %v4233_v21 = vmul.f32 -1.442695, %v1942_v55  ;;  %v4249_v13 = vmul.f32 -1.442695, %v2262_v20  ;;  %vm2452_vm6 = vweird.f32 %v7413_v24  ;;  %vm2453_vm7 = vweird.f32 %v7458_v44 }
 0x31d   :  { %v2195_v29 = vsel %vm2194_vm5, %v4718_v38, %v2191_v37  ;;  %v2204_v53 = vsub.f32 1.0, %v2203_v22  ;;  %v2456_v1 = vand.u32 2147483647, %v7413_v24  ;;  %v2458_v54 = vand.u32 2147483648, %v7413_v24  ;;  %vm7744_vm10 = vmor %vm2452_vm6, %vm2453_vm7  ;;  %v4374_v24 = vld [vmem:[%s9341_s5 + $0x30] sm:$0xff] }
 0x31e   :  { %v4728_v56 = vpop.eup %4727  ;;  %v2200_v52 = vsel %vm7680_vm2, %v2199_v47, %v2195_v29  ;;  %vm2208_vm8 = vweird.f32 %v4724_v36  ;;  %4733 = vpow2.f32 %v4233_v21  ;;  %v2465_v18 = vmul.f32 %v7493_v7, %v2464_v19  ;;  %v9732_v47 = vld [vmem:[#allocation43_spill] sm:$0xff]  ;;  %3731 = vmatpush.bf16.msra.mxu2 %v4374_v24 }
 0x31f   :  { %v7731_v15 = vpop.eup %4729  ;;  %v2579_v61 = vmul.f32 %v2200_v52, %v7650_v0  ;;  %v2205_v38 = vmul.f32 %v4724_v36, %v2204_v53  ;;  %v7734_v60 = vadd.f32 1.0, %v4728_v56  ;;  %4735 = vpow2.f32 %v4249_v13  ;;  %vm2209_vm12 = vmor %vm2207_vm4, %vm2208_vm8 }
 0x320   :  { %vm7736_vm9 = vcmp.eq.f32.partialorder %v2211_v51, 8.507059e+37  ;;  %v2214_v17 = vor.u32 1.1754944e-38, %v2213_v5  ;;  %v2466_v19 = vadd.f32 %v7493_v7, %v2465_v18  ;;  %vm2468_vm11 = vweird.f32 %v7493_v7 }
 0x321   :  { %v4732_v0 = vpop.eup %4731  ;;  %v2595_v46 = vadd.f32 %v2579_v61, %v9732_v47  ;;  %v2206_v11 = vadd.f32 %v4724_v36, %v2205_v38  ;;  %4737 = vrcp.f32 %v7734_v60  ;;  %v2455_v55 = vsel %vm7744_vm10, %v7458_v44, %v2451_v39 }
 0x322   :  { %v7760_v51 = vmul.f32 %v7731_v15, %v7684_v10  ;;  %v7765_v5 = vadd.f32 1.0, %v4732_v0  ;;  %v2459_v20 = vor.u32 1.1754944e-38, %v2458_v54  ;;  %vm2467_vm13 = vweird.f32 %v7438_v25 }
 0x323   :  { %v2210_v37 = vsel %vm2209_vm12, %v4724_v36, %v2206_v11  ;;  %vm2457_vm14 = vcmp.eq.f32.partialorder %v2456_v1, 8.507059e+37  ;;  %vm7768_vm15 = vmor %vm2467_vm13, %vm2468_vm11  ;;  %v2471_v22 = vand.u32 2147483647, %v7438_v25  ;;  %v2473_v39 = vand.u32 2147483648, %v7438_v25  ;;  %v9738_v11 = vld [vmem:[#allocation31_spill] sm:$0xff] }
 0x324   :  { %v4734_v21 = vpop.eup %4733  ;;  %v2509_v8 = vsub.f32 1.0, %v7710_v62  ;;  %v2215_v13 = vsel %vm7736_vm9, %v2214_v17, %v2210_v37  ;;  %v2460_v29 = vsel %vm2457_vm14, %v2459_v20, %v2455_v55  ;;  %v2470_v36 = vsel %vm7768_vm15, %v7493_v7, %v2466_v19  ;;  %v9739_v37 = vld [vmem:[#allocation89_spill] sm:$0xff] }
 0x325   :  { %v4736_v53 = vpop.eup %4735  ;;  %v2580_v1 = vmul.f32 %v2215_v13, %v7689_v23  ;;  %v2226_v54 = vand.u32 2147483647, %v7734_v60  ;;  %v7782_v56 = vadd.f32 1.0, %v4734_v21  ;;  %v2474_v25 = vor.u32 1.1754944e-38, %v2473_v39 }
 0x326   :  { %v2524_v52 = vsub.f32 1.0, %v7760_v51  ;;  %4739 = vrcp.f32 %v7765_v5  ;;  %v2228_v18 = vand.u32 2147483648, %v7734_v60  ;;  %vm2472_vm0 = vcmp.eq.f32.partialorder %v2471_v22, 8.507059e+37 }
 0x327   :  { %v4738_v61 = vpop.eup %4737  ;;  %4741 = vrcp.f32 %v7782_v56  ;;  %v7788_v38 = vadd.f32 1.0, %v4736_v53  ;;  %v2475_v7 = vsel %vm2472_vm0, %v2474_v25, %v2470_v36  ;;  %v2623_v27 = vsub.f32 1.0, %v2460_v29 }
 0x328   :  { %4743 = vtanh.f32 %v2595_v46  ;;  %v2218_v23 = vmul.f32 %v4738_v61, %v7734_v60  ;;  %vm2222_vm1 = vweird.f32 %v7734_v60  ;;  %v2624_v17 = vsub.f32 1.0, %v2475_v7 }
 0x329   :  { %v2596_v19 = vadd.f32 %v2580_v1, %v9735_v26  ;;  %vm7793_vm2 = vcmp.eq.f32.partialorder %v2226_v54, 8.507059e+37  ;;  %v2639_v47 = vmul.f32 %v7559_v9, %v2623_v27  ;;  %v2655_v55 = vmul.f32 %v2460_v29, %v9738_v11 }
 0x32a   :  { %v2219_v24 = vsub.f32 1.0, %v2218_v23  ;;  %v2640_v20 = vmul.f32 %v7669_v30, %v2624_v17  ;;  %v2656_v46 = vmul.f32 %v2475_v7, %v9739_v37  ;;  %v2480_v44 = vmul.f32 %v7592_v33, %v2479_v50 }
 0x32b   :  { %vm2223_vm3 = vweird.f32 %v4738_v61  ;;  %v2229_v22 = vor.u32 1.1754944e-38, %v2228_v18  ;;  %4745 = vrcp.f32 %v7788_v38  ;;  %v7805_v39 = vadd.f32 %v2655_v55, %v2639_v47 }
 0x32c   :  { %v7807_v21 = vpop.eup %4739  ;;  %v2220_v9 = vmul.f32 %v4738_v61, %v2219_v24  ;;  %v7809_v13 = vadd.f32 %v2656_v46, %v2640_v20  ;;  %v2243_v29 = vand.u32 2147483648, %v7782_v56  ;;  %v2481_v30 = vadd.f32 %v7592_v33, %v2480_v44  ;;  %vm2224_vm7 = vmor %vm2222_vm1, %vm2223_vm3  ;;  %v9746_v44 = vld [vmem:[#allocation49_spill] sm:$0xff] }
 0x32d   :  { %9740 = vst [vmem:[#allocation53_spill] sm:$0xff] %v7805_v39  ;;  %v7813_v36 = vpop.eup %4741  ;;  %vm2482_vm4 = vweird.f32 %v7539_v6  ;;  %vm2483_vm5 = vweird.f32 %v7592_v33  ;;  %v2486_v16 = vand.u32 2147483647, %v7539_v6  ;;  %v2488_v50 = vand.u32 2147483648, %v7539_v6 }
 0x32e   :  { %9741 = vst [vmem:[#allocation54_spill] sm:$0xff] %v7809_v13  ;;  %v7819_v53 = vpop.eup %4743  ;;  %4747 = vtanh.f32 %v2596_v19  ;;  %v2221_v1 = vadd.f32 %v4738_v61, %v2220_v9  ;;  %v2683_v54 = vpack.c.bf16 %v7809_v13, %v7805_v39  ;;  %v2233_v25 = vmul.f32 %v7813_v36, %v7782_v56  ;;  %vm7825_vm6 = vmor %vm2482_vm4, %vm2483_vm5 }
 0x32f   :  { %v7831_v7 = vmul.f32 %v7807_v21, %v7765_v5  ;;  %v2241_v6 = vand.u32 2147483647, %v7782_v56  ;;  %v2485_v27 = vsel %vm7825_vm6, %v7592_v33, %v2481_v30  ;;  %v2489_v23 = vor.u32 1.1754944e-38, %v2488_v50  ;;  %v4373_v33 = vld [vmem:[%s9341_s5 + $0x28] sm:$0xff] }
 0x330   :  { %v2225_v17 = vsel %vm2224_vm7, %v4738_v61, %v2221_v1  ;;  %2715 = vmatmul.bf16.gmra.mxu3 %v2683_v54  ;;  %2764 = vmatmul.bf16.gmra.mxu0 %v2683_v54  ;;  %v2234_v26 = vsub.f32 1.0, %v2233_v25  ;;  %vm2487_vm8 = vcmp.eq.f32.partialorder %v2486_v16, 8.507059e+37  ;;  %v2495_v19 = vmul.f32 %v7607_v42, %v2494_v58  ;;  %v9747_v16 = vld [vmem:[#allocation92_spill] sm:$0xff] }
 0x331   :  { %v7843_v47 = vpop.eup %4745  ;;  %v2230_v60 = vsel %vm7793_vm2, %v2229_v22, %v2225_v17  ;;  %2813 = vmatmul.bf16.gmra.mxu1 %v2683_v54  ;;  %v7847_v11 = vor.u32 1.1754944e-38, %v2243_v29  ;;  %v2490_v55 = vsel %vm2487_vm8, %v2489_v23, %v2485_v27  ;;  %vm2498_vm9 = vweird.f32 %v7607_v42  ;;  %3732 = vmatpush.bf16.msra.mxu2 %v4373_v33  ;;  %v9751_v23 = vld [vmem:[#allocation94_spill] sm:$0xff] }
 0x332   :  { %v2581_v61 = vmul.f32 %v2230_v60, %v7700_v35  ;;  %vm2237_vm10 = vweird.f32 %v7782_v56  ;;  %v2496_v3 = vadd.f32 %v7607_v42, %v2495_v19  ;;  %vm2497_vm11 = vweird.f32 %v7548_v32 }
 0x333   :  { %v2501_v58 = vand.u32 2147483647, %v7548_v32  ;;  %v2539_v0 = vsub.f32 1.0, %v7831_v7  ;;  %vm7859_vm12 = vmor %vm2497_vm11, %vm2498_vm9  ;;  %v2503_v20 = vand.u32 2147483648, %v7548_v32  ;;  %v2625_v37 = vsub.f32 1.0, %v2490_v55 }
 0x334   :  { %v2510_v35 = vmul.f32 %v7694_v48, %v2509_v8  ;;  %v7867_v46 = vpop.eup %4747  ;;  %v2597_v22 = vadd.f32 %v2581_v61, %v9746_v44  ;;  %v2235_v9 = vmul.f32 %v7813_v36, %v2234_v26  ;;  %vm2238_vm13 = vweird.f32 %v7813_v36 }
 0x335   :  { %v2500_v29 = vsel %vm7859_vm12, %v7607_v42, %v2496_v3  ;;  %v2504_v30 = vor.u32 1.1754944e-38, %v2503_v20  ;;  %v2641_v32 = vmul.f32 %v7703_v43, %v2625_v37  ;;  %v2657_v62 = vmul.f32 %v2490_v55, %v9747_v16  ;;  %vm7906_vm5 = vmor %vm2237_vm10, %vm2238_vm13  ;;  %v9755_v20 = vld [vmem:[#allocation96_spill] sm:$0xff]  ;;  %v9760_v42 = vld [vmem:[#allocation50_spill] sm:$0xff] }
 0x336   :  { %v2511_v8 = vadd.f32 %v7694_v48, %v2510_v35  ;;  %vm2502_vm14 = vcmp.eq.f32.partialorder %v2501_v58, 8.507059e+37  ;;  %vm2512_vm15 = vweird.f32 %v7639_v49  ;;  %vm2513_vm0 = vweird.f32 %v7694_v48 }
 0x337   :  { %v2516_v50 = vand.u32 2147483647, %v7639_v49  ;;  %v2553_v1 = vmul.f32 %v7843_v47, %v7788_v38  ;;  %v2505_v54 = vsel %vm2502_vm14, %v2504_v30, %v2500_v29  ;;  %v7883_v25 = vadd.f32 %v2657_v62, %v2641_v32  ;;  %vm7885_vm1 = vmor %vm2512_vm15, %vm2513_vm0  ;;  %v4372_v62 = vld [vmem:[%s9341_s5 + $0x20] sm:$0xff] }
 0x338   :  { %v2518_v43 = vand.u32 2147483648, %v7639_v49  ;;  %4749 = vtanh.f32 %v2597_v22  ;;  %v2236_v18 = vadd.f32 %v7813_v36, %v2235_v9  ;;  %v2626_v7 = vsub.f32 1.0, %v2505_v54  ;;  %3733 = vmatpush.bf16.msra.mxu2 %v4372_v62 }
 0x339   :  { %9748 = vst [vmem:[#allocation51_spill] sm:$0xff] %v7883_v25  ;;  %v2515_v27 = vsel %vm7885_vm1, %v7694_v48, %v2511_v8  ;;  %v2658_v17 = vmul.f32 %v2505_v54, %v9751_v23  ;;  %vm2517_vm2 = vcmp.eq.f32.partialorder %v2516_v50, 8.507059e+37  ;;  %v2525_v19 = vmul.f32 %v7731_v15, %v2524_v52  ;;  %v9759_v54 = vld [vmem:[#allocation65_spill] sm:$0xff] }
 0x33a   :  { %v2519_v26 = vor.u32 1.1754944e-38, %v2518_v43  ;;  %v2642_v60 = vmul.f32 %v7715_v4, %v2626_v7  ;;  %vm2527_vm3 = vweird.f32 %v7684_v10  ;;  %vm2528_vm4 = vweird.f32 %v7731_v15 }
 0x33b   :  { %v2531_v49 = vand.u32 2147483647, %v7684_v10  ;;  %v2526_v51 = vadd.f32 %v7731_v15, %v2525_v19  ;;  %v2533_v52 = vand.u32 2147483648, %v7684_v10  ;;  %v2540_v4 = vmul.f32 %v7807_v21, %v2539_v0  ;;  %vm2529_vm6 = vmor %vm2527_vm3, %vm2528_vm4  ;;  %v1924_v10 = vpop.f32.mrf.mxu2 }
 0x33c   :  { %v2520_v55 = vsel %vm2517_vm2, %v2519_v26, %v2515_v27  ;;  %v2240_v33 = vsel %vm7906_vm5, %v7813_v36, %v2236_v18  ;;  %v7916_v61 = vadd.f32 %v2658_v17, %v2642_v60  ;;  %vm2542_vm8 = vweird.f32 %v7765_v5  ;;  %v9761_v18 = vld [vmem:[#allocation98_spill] sm:$0xff]  ;;  %v4371_v27 = vld [vmem:[%s9341_s5 + $0x18] sm:$0xff]  ;;  %v9762_v26 = vld [vmem:[#allocation101_spill] sm:$0xff] }
 0x33d   :  { %vm2532_vm7 = vcmp.eq.f32.partialorder %v2531_v49, 8.507059e+37  ;;  %v2627_v3 = vsub.f32 1.0, %v2520_v55  ;;  %v2530_v58 = vsel %vm2529_vm6, %v7731_v15, %v2526_v51  ;;  %v2534_v24 = vor.u32 1.1754944e-38, %v2533_v52  ;;  %3734 = vmatpush.bf16.msra.mxu2 %v4371_v27 }
 0x33e   :  { %9754 = vst [vmem:[#allocation58_spill] sm:$0xff] %v7916_v61  ;;  %v2659_v37 = vmul.f32 %v2520_v55, %v9755_v20  ;;  %v2541_v35 = vadd.f32 %v7807_v21, %v2540_v4  ;;  %v4750_v44 = vpop.eup %4749  ;;  %v2684_v0 = vpack.c.bf16 %v7916_v61, %v7883_v25  ;;  %vm2543_vm9 = vweird.f32 %v7807_v21 }
 0x33f   :  { %v2643_v22 = vmul.f32 %v7819_v53, %v2627_v3  ;;  %vm2242_vm10 = vcmp.eq.f32.partialorder %v2241_v6, 8.507059e+37  ;;  %v2535_v15 = vsel %vm2532_vm7, %v2534_v24, %v2530_v58  ;;  %vm7928_vm11 = vmor %vm2542_vm8, %vm2543_vm9  ;;  %v2546_v9 = vand.u32 2147483647, %v7765_v5  ;;  %v9765_v3 = vld [vmem:[#allocation17_spill] sm:$0xff]  ;;  %v9766_v58 = vld [vmem:[#allocation20_spill] sm:$0xff] }
 0x340   :  { %v2548_v29 = vand.u32 2147483648, %v7765_v5  ;;  %v2554_v30 = vsub.f32 1.0, %v2553_v1  ;;  %v2245_v32 = vsel %vm2242_vm10, %v7847_v11, %v2240_v33  ;;  %2720 = vmatmul.bf16.gmra.mxu3 %v2684_v0  ;;  %2769 = vmatmul.bf16.gmra.mxu0 %v2684_v0  ;;  %v2545_v56 = vsel %vm7928_vm11, %v7807_v21, %v2541_v35 }
 0x341   :  { %v7935_v53 = vadd.f32 %v2659_v37, %v2643_v22  ;;  %v1925_v6 = vadd.f32 %v1924_v10, %v5985_v63  ;;  %2818 = vmatmul.bf16.gmra.mxu1 %v2684_v0  ;;  %v2628_v5 = vsub.f32 1.0, %v2535_v15  ;;  %vm2547_vm12 = vcmp.eq.f32.partialorder %v2546_v9, 8.507059e+37  ;;  %v9768_v9 = vld [vmem:[#allocation105_spill] sm:$0xff] }
 0x342   :  { %v2549_v16 = vor.u32 1.1754944e-38, %v2548_v29  ;;  %v2555_v1 = vmul.f32 %v7843_v47, %v2554_v30  ;;  %v696_v21 = vadd.f32 %v9760_v42, %v9759_v54  ;;  %v2660_v7 = vmul.f32 %v2535_v15, %v9761_v18  ;;  %v9767_v15 = vld [vmem:[#allocation57_spill] sm:$0xff]  ;;  %v9771_v18 = vld [vmem:[#allocation79_spill] sm:$0xff] }
 0x343   :  { %9758 = vst [vmem:[#allocation56_spill] sm:$0xff] %v7935_v53  ;;  %v2582_v8 = vmul.f32 %v2245_v32, %v1925_v6  ;;  %v2644_v50 = vmul.f32 %v7867_v46, %v2628_v5  ;;  %vm2558_vm13 = vweird.f32 %v7843_v47  ;;  %v2563_v49 = vand.u32 2147483648, %v7788_v38 }
 0x344   :  { %v2550_v11 = vsel %vm2547_vm12, %v2549_v16, %v2545_v56  ;;  %v2556_v46 = vadd.f32 %v7843_v47, %v2555_v1  ;;  %vm2557_vm14 = vweird.f32 %v7788_v38  ;;  %v2561_v55 = vand.u32 2147483647, %v7788_v38 }
 0x345   :  { %v2629_v43 = vsub.f32 1.0, %v2550_v11  ;;  %v2598_v23 = vadd.f32 %v2582_v8, %v696_v21  ;;  %v2661_v19 = vmul.f32 %v2550_v11, %v9762_v26  ;;  %v7953_v60 = vadd.f32 %v2660_v7, %v2644_v50  ;;  %vm2559_vm15 = vmor %vm2557_vm14, %vm2558_vm13  ;;  %v9770_v8 = vld [vmem:[#allocation52_spill] sm:$0xff] }
 0x346   :  { %v2560_v52 = vsel %vm2559_vm15, %v7843_v47, %v2556_v46  ;;  %v2564_v4 = vor.u32 1.1754944e-38, %v2563_v49  ;;  %v441_v24 = vadd.f32 %v9766_v58, %v9765_v3  ;;  %vm2562_vm0 = vcmp.eq.f32.partialorder %v2561_v55, 8.507059e+37  ;;  %v2745_v35 = vpop.f32.mrf.mxu0  ;;  %v4370_v55 = vld [vmem:[%s9341_s5 + $0x10] sm:$0xff] }
 0x347   :  { %v2645_v17 = vmul.f32 %v4750_v44, %v2629_v43  ;;  %9763 = vst [vmem:[#allocation55_spill] sm:$0xff] %v7953_v60  ;;  %4751 = vtanh.f32 %v2598_v23  ;;  %v2685_v51 = vpack.c.bf16 %v7953_v60, %v7935_v53  ;;  %v443_v36 = vadd.f32 %v9767_v15, %v9765_v3  ;;  %v2794_v43 = vpop.f32.mrf.mxu1  ;;  %3735 = vmatpush.bf16.msra.mxu2 %v4370_v55  ;;  %v9783_v55 = vld [vmem:[#allocation9_spill] sm:$0xff]  ;;  %v9814_v60 = vld [vmem:[#allocation24_spill] sm:$0xff]  ;;  %v9815_v53 = vld [vmem:[#allocation26_spill] sm:$0xff] }
 0x348   :  { %v2565_v37 = vsel %vm2562_vm0, %v2564_v4, %v2560_v52  ;;  %v2746_v6 = vadd.f32 %v2745_v35, %v5480_v28  ;;  %v570_v11 = vadd.f32 %v9770_v8, %v5483_v40  ;;  %v572_v7 = vadd.f32 %v9771_v18, %v5483_v40  ;;  %v9778_v18 = vld [vmem:[#allocation81_spill] sm:$0xff] }
 0x349   :  { %v7958_v48 = vadd.f32 %v2661_v19, %v2645_v17  ;;  %v2630_v10 = vsub.f32 1.0, %v2565_v37  ;;  %v2662_v29 = vmul.f32 %v2565_v37, %v9768_v9 }
 0x34a   :  { %v3154_v42 = vadd.f32 %v2746_v6, %v570_v11 }
 0x34b   :  { %9764 = vst [vmem:[#allocation62_spill] sm:$0xff] %v7958_v48 }
 0x34c   :  { %v2696_v33 = vpop.f32.mrf.mxu3  ;;  %v4266_v27 = vmul.f32 -1.442695, %v3154_v42 }
 0x34d   :  { %v2697_v20 = vadd.f32 %v2696_v33, %v5273_v45  ;;  %v4752_v44 = vpop.eup %4751 }
 0x34e   :  { %v2646_v22 = vmul.f32 %v4752_v44, %v2630_v10  ;;  %v2747_v62 = vpop.f32.mrf.mxu0 }
 0x34f   :  { %v2834_v38 = vadd.f32 %v2697_v20, %v441_v24  ;;  %v2748_v21 = vadd.f32 %v2747_v62, %v5480_v28  ;;  %v7988_v58 = vpop.f32.mrf.mxu1 }
 0x350   :  { %2725 = vmatmul.bf16.gmra.mxu3 %v2685_v51  ;;  %2774 = vmatmul.bf16.gmra.mxu0 %v2685_v51  ;;  %v7972_v32 = vadd.f32 %v2662_v29, %v2646_v22 }
 0x351   :  { %2823 = vmatmul.bf16.gmra.mxu1 %v2685_v51  ;;  %v4250_v0 = vmul.f32 -1.442695, %v2834_v38  ;;  %v3155_v23 = vadd.f32 %v2748_v21, %v572_v7  ;;  %v2795_v38 = vadd.f32 %v2794_v43, %v5985_v63  ;;  %v9776_v21 = vld [vmem:[#allocation6_spill] sm:$0xff]  ;;  %v446_v7 = vadd.f32 %v9778_v18, %v9765_v3 }
 0x352   :  { %9769 = vst [vmem:[#allocation61_spill] sm:$0xff] %v7972_v32  ;;  %v2686_v1 = vpack.c.bf16 %v7972_v32, %v7958_v48  ;;  %v8015_v43 = vadd.f32 %v9776_v21, %v9765_v3  ;;  %v9800_v18 = vld [vmem:[#allocation22_spill] sm:$0xff] }
 0x353   :  { %4753 = vpow2.f32 %v4250_v0  ;;  %v4267_v49 = vmul.f32 -1.442695, %v3155_v23  ;;  %v9772_v0 = vld [vmem:[#allocation80_spill] sm:$0xff]  ;;  %v9810_v48 = vld [vmem:[#allocation90_spill] sm:$0xff] }
 0x354   :  { %v2698_v47 = vpop.f32.mrf.mxu3  ;;  %v575_v22 = vadd.f32 %v9772_v0, %v5483_v40  ;;  %9777 = vst [vmem:[#allocation59_spill] sm:$0xff] %v8015_v43  ;;  %v9791_v0 = vld [vmem:[#allocation13_spill] sm:$0xff] }
 0x355   :  { %v2699_v30 = vadd.f32 %v2698_v47, %v5273_v45 }
 0x357   :  { %v2835_v56 = vadd.f32 %v2699_v30, %v443_v36  ;;  %v9773_v36 = vld [vmem:[#allocation18_spill] sm:$0xff] }
 0x358   :  { %v699_v9 = vadd.f32 %v9773_v36, %v9759_v54 }
 0x359   :  { %v4754_v16 = vpop.eup %4753  ;;  %v4251_v5 = vmul.f32 -1.442695, %v2835_v56 }
 0x35a   :  { %v2898_v50 = vadd.f32 1.0, %v4754_v16 }
 0x35b   :  { %4755 = vpow2.f32 %v4251_v5  ;;  %v9774_v5 = vld [vmem:[#allocation5_spill] sm:$0xff] }
 0x35c   :  { %4757 = vrcp.f32 %v2898_v50  ;;  %v2925_v52 = vand.u32 2147483648, %v2898_v50  ;;  %v2923_v33 = vand.u32 2147483647, %v2898_v50  ;;  %vm2919_vm2 = vweird.f32 %v2898_v50 }
 0x35d   :  { %4759 = vpow2.f32 %v4266_v27  ;;  %v8006_v8 = vadd.f32 %v9774_v5, %v9765_v3 }
 0x35e   :  { %v2926_v37 = vor.u32 1.1754944e-38, %v2925_v52  ;;  %vm2924_vm4 = vcmp.eq.f32.partialorder %v2923_v33, 8.507059e+37  ;;  %v9785_v52 = vld [vmem:[#allocation10_spill] sm:$0xff] }
 0x35f   :  { %9775 = vst [vmem:[#allocation64_spill] sm:$0xff] %v8006_v8 }
 0x360   :  { %2730 = vmatmul.bf16.gmra.mxu3 %v2686_v1  ;;  %2779 = vmatmul.bf16.gmra.mxu0 %v2686_v1 }
 0x361   :  { %2828 = vmatmul.bf16.gmra.mxu1 %v2686_v1  ;;  %v4756_v17 = vpop.eup %4755 }
 0x362   :  { %v4758_v26 = vpop.eup %4757  ;;  %v7982_v46 = vadd.f32 1.0, %v4756_v17  ;;  %v9779_v17 = vld [vmem:[#allocation7_spill] sm:$0xff] }
 0x363   :  { %v2915_v19 = vmul.f32 %v4758_v26, %v2898_v50  ;;  %vm2920_vm1 = vweird.f32 %v4758_v26  ;;  %v4760_v20 = vpop.eup %4759 }
 0x364   :  { %4761 = vrcp.f32 %v7982_v46  ;;  %vm2921_vm3 = vmor %vm2919_vm2, %vm2920_vm1  ;;  %v7998_v29 = vadd.f32 1.0, %v4760_v20  ;;  %vm2934_vm6 = vweird.f32 %v7982_v46 }
 0x365   :  { %v2916_v51 = vsub.f32 1.0, %v2915_v19  ;;  %4763 = vpow2.f32 %v4267_v49  ;;  %v9781_v19 = vld [vmem:[#allocation8_spill] sm:$0xff] }
 0x366   :  { %4765 = vrcp.f32 %v7998_v29  ;;  %v8026_v49 = vadd.f32 %v9781_v19, %v9765_v3  ;;  %v9802_v19 = vld [vmem:[#allocation23_spill] sm:$0xff]  ;;  %vm3239_vm9 = vweird.f32 %v7998_v29 }
 0x367   :  { %v2917_v4 = vmul.f32 %v4758_v26, %v2916_v51  ;;  %v8030_v51 = vadd.f32 %v9783_v55, %v5483_v40  ;;  %v8075_v55 = vadd.f32 %v9802_v19, %v9759_v54 }
 0x368   :  { %9782 = vst [vmem:[#allocation69_spill] sm:$0xff] %v8026_v49  ;;  %v9827_v49 = vld [vmem:[#allocation102_spill] sm:$0xff] }
 0x369   :  { %v2918_v24 = vadd.f32 %v4758_v26, %v2917_v4  ;;  %9784 = vst [vmem:[#allocation63_spill] sm:$0xff] %v8030_v51  ;;  %v8034_v4 = vadd.f32 %v9785_v52, %v5483_v40 }
 0x36a   :  { %v7990_v35 = vpop.eup %4761 }
 0x36b   :  { %v2922_v44 = vsel %vm2921_vm3, %v4758_v26, %v2918_v24  ;;  %v2930_v56 = vmul.f32 %v7990_v35, %v7982_v46  ;;  %v4764_v6 = vpop.eup %4763  ;;  %v8022_v26 = vadd.f32 %v9779_v17, %v9765_v3  ;;  %9786 = vst [vmem:[#allocation67_spill] sm:$0xff] %v8034_v4  ;;  %v9787_v24 = vld [vmem:[#allocation11_spill] sm:$0xff]  ;;  %vm2935_vm5 = vweird.f32 %v7990_v35 }
 0x36c   :  { %v2750_v10 = vpop.f32.mrf.mxu0  ;;  %v2927_v47 = vsel %vm2924_vm4, %v2926_v37, %v2922_v44  ;;  %v8009_v11 = vadd.f32 1.0, %v4764_v6  ;;  %v8038_v20 = vadd.f32 %v9787_v24, %v5483_v40  ;;  %v9789_v37 = vld [vmem:[#allocation12_spill] sm:$0xff]  ;;  %v8061_v5 = vpop.eup %4765  ;;  %vm8130_vm7 = vmor %vm2934_vm6, %vm2935_vm5 }
 0x36d   :  { %v2751_v15 = vadd.f32 %v2750_v10, %v5480_v28  ;;  %v3474_v30 = vmul.f32 %v2927_v47, %v2795_v38  ;;  %v2931_v50 = vsub.f32 1.0, %v2930_v56  ;;  %v8011_v1 = vpop.f32.mrf.mxu1  ;;  %9780 = vst [vmem:[#allocation66_spill] sm:$0xff] %v8022_v26  ;;  %v8042_v38 = vadd.f32 %v9789_v37, %v5483_v40  ;;  %v9793_v47 = vld [vmem:[#allocation27_spill] sm:$0xff]  ;;  %v9805_v37 = vld [vmem:[#allocation88_spill] sm:$0xff] }
 0x36e   :  { %9788 = vst [vmem:[#allocation68_spill] sm:$0xff] %v8038_v20  ;;  %4767 = vrcp.f32 %v8009_v11  ;;  %v9796_v56 = vld [vmem:[#allocation15_spill] sm:$0xff]  ;;  %vm3240_vm10 = vweird.f32 %v8061_v5  ;;  %vm3254_vm14 = vweird.f32 %v8009_v11 }
 0x36f   :  { %v3156_v16 = vadd.f32 %v2751_v15, %v575_v22  ;;  %v8002_v62 = vadd.f32 %v3474_v30, %v699_v9  ;;  %9790 = vst [vmem:[#allocation70_spill] sm:$0xff] %v8042_v38  ;;  %v8047_v22 = vadd.f32 %v9791_v0, %v9759_v54  ;;  %v577_v15 = vadd.f32 %v9793_v47, %v5483_v40  ;;  %v9794_v9 = vld [vmem:[#allocation14_spill] sm:$0xff]  ;;  %v9806_v0 = vld [vmem:[#allocation19_spill] sm:$0xff]  ;;  %vm8244_vm13 = vmor %vm3239_vm9, %vm3240_vm10 }
 0x370   :  { %v2932_v36 = vmul.f32 %v7990_v35, %v2931_v50  ;;  %v8055_v30 = vadd.f32 %v9794_v9, %v9759_v54  ;;  %v8059_v6 = vadd.f32 %v9796_v56, %v9759_v54  ;;  %v9801_v50 = vld [vmem:[#allocation83_spill] sm:$0xff] }
 0x371   :  { %v4268_v27 = vmul.f32 -1.442695, %v3156_v16  ;;  %9792 = vst [vmem:[#allocation73_spill] sm:$0xff] %v8047_v22  ;;  %v9807_v9 = vld [vmem:[#allocation87_spill] sm:$0xff] }
 0x372   :  { %v2701_v42 = vpop.f32.mrf.mxu3  ;;  %9795 = vst [vmem:[#allocation71_spill] sm:$0xff] %v8055_v30  ;;  %v2933_v47 = vadd.f32 %v7990_v35, %v2932_v36  ;;  %v8097_v56 = vadd.f32 %v9807_v9, %v9759_v54  ;;  %v9808_v36 = vld [vmem:[#allocation21_spill] sm:$0xff] }
 0x373   :  { %v2702_v23 = vadd.f32 %v2701_v42, %v5273_v45  ;;  %9797 = vst [vmem:[#allocation72_spill] sm:$0xff] %v8059_v6  ;;  %4769 = vpow2.f32 %v4268_v27  ;;  %v9798_v42 = vld [vmem:[#allocation16_spill] sm:$0xff]  ;;  %v9803_v27 = vld [vmem:[#allocation86_spill] sm:$0xff]  ;;  %v9811_v6 = vld [vmem:[#allocation95_spill] sm:$0xff] }
 0x374   :  { %v2752_v33 = vpop.f32.mrf.mxu0  ;;  %v8065_v21 = vadd.f32 %v9798_v42, %v9759_v54  ;;  %v8079_v52 = vadd.f32 %v9803_v27, %v9765_v3  ;;  %v2940_v42 = vand.u32 2147483648, %v7982_v46  ;;  %v8106_v19 = vpop.eup %4767  ;;  %v8110_v27 = vadd.f32 %v9808_v36, %v5483_v40  ;;  %v9817_v30 = vld [vmem:[#allocation93_spill] sm:$0xff] }
 0x375   :  { %v2836_v44 = vadd.f32 %v2702_v23, %v446_v7  ;;  %v2753_v10 = vadd.f32 %v2752_v33, %v5480_v28  ;;  %v8069_v7 = vadd.f32 %v9800_v18, %v9759_v54  ;;  %v448_v23 = vadd.f32 %v9801_v50, %v9765_v3  ;;  %v9804_v33 = vld [vmem:[#allocation84_spill] sm:$0xff]  ;;  %v4369_v50 = vld [vmem:[%s9341_s5 + $0x8] sm:$0xff] }
 0x376   :  { %9799 = vst [vmem:[#allocation74_spill] sm:$0xff] %v8065_v21  ;;  %v8083_v24 = vadd.f32 %v9804_v33, %v9759_v54  ;;  %v2938_v33 = vand.u32 2147483647, %v7982_v46  ;;  %v8122_v21 = vadd.f32 %v9810_v48, %v9759_v54  ;;  %v8126_v36 = vadd.f32 %v9811_v6, %v9765_v3  ;;  %3736 = vmatpush.bf16.msra.mxu2 %v4369_v50  ;;  %v9819_v46 = vld [vmem:[#allocation28_spill] sm:$0xff] }
 0x377   :  { %v4252_v16 = vmul.f32 -1.442695, %v2836_v44  ;;  %v3157_v17 = vadd.f32 %v2753_v10, %v577_v15  ;;  %v8087_v44 = vadd.f32 %v9805_v37, %v9765_v3  ;;  %v8091_v10 = vadd.f32 %v9806_v0, %v5483_v40  ;;  %v8114_v0 = vpop.f32.mrf.mxu1 }
 0x378   :  { %v8140_v48 = vadd.f32 %v9815_v53, %v9759_v54  ;;  %v8144_v6 = vadd.f32 %v9817_v30, %v5483_v40  ;;  %v2937_v22 = vsel %vm8130_vm7, %v7990_v35, %v2933_v47  ;;  %vm2939_vm8 = vcmp.eq.f32.partialorder %v2938_v33, 8.507059e+37  ;;  %v9818_v30 = vld [vmem:[#allocation29_spill] sm:$0xff] }
 0x379   :  { %4771 = vpow2.f32 %v4252_v16  ;;  %v3235_v16 = vmul.f32 %v8061_v5, %v7998_v29  ;;  %v4269_v37 = vmul.f32 -1.442695, %v3157_v17  ;;  %v4770_v9 = vpop.eup %4769  ;;  %v8157_v13 = vadd.f32 %v9818_v30, %v9765_v3  ;;  %v9822_v33 = vld [vmem:[#allocation97_spill] sm:$0xff] }
 0x37a   :  { %v2703_v15 = vpop.f32.mrf.mxu3  ;;  %9816 = vst [vmem:[#allocation75_spill] sm:$0xff] %v8140_v48  ;;  %v8151_v50 = vadd.f32 1.0, %v4770_v9  ;;  %v8161_v35 = vadd.f32 %v9819_v46, %v9759_v54  ;;  %v9823_v9 = vld [vmem:[#allocation99_spill] sm:$0xff]  ;;  %vm3255_vm12 = vweird.f32 %v8106_v19 }
 0x37b   :  { %v2704_v18 = vadd.f32 %v2703_v15, %v5273_v45  ;;  %v9809_v15 = vld [vmem:[#allocation91_spill] sm:$0xff]  ;;  %v3236_v25 = vsub.f32 1.0, %v3235_v16  ;;  %4773 = vpow2.f32 %v4269_v37  ;;  %v2797_v37 = vadd.f32 %v7988_v58, %v5985_v63  ;;  %vm8263_vm15 = vmor %vm3254_vm14, %vm3255_vm12 }
 0x37c   :  { %v8118_v32 = vadd.f32 %v9809_v15, %v9765_v3  ;;  %v8136_v15 = vadd.f32 %v9814_v60, %v5483_v40  ;;  %9820 = vst [vmem:[#allocation76_spill] sm:$0xff] %v8161_v35  ;;  %v8176_v30 = vadd.f32 %v9823_v9, %v9759_v54  ;;  %v8191_v9 = vadd.f32 %v9827_v49, %v9759_v54  ;;  %v9833_v49 = vld [vmem:[#allocation107_spill] sm:$0xff] }
 0x37d   :  { %v2837_v17 = vadd.f32 %v2704_v18, %v448_v23  ;;  %v3250_v23 = vmul.f32 %v8106_v19, %v8009_v11  ;;  %v2941_v18 = vor.u32 1.1754944e-38, %v2940_v42  ;;  %v9821_v42 = vld [vmem:[#allocation100_spill] sm:$0xff]  ;;  %v3258_v35 = vand.u32 2147483647, %v8009_v11 }
 0x37e   :  { %9824 = vst [vmem:[#allocation77_spill] sm:$0xff] %v8176_v30  ;;  %v9829_v30 = vld [vmem:[#allocation108_spill] sm:$0xff]  ;;  %vm3269_vm3 = vweird.f32 %v8151_v50 }
 0x37f   :  { %v4772_v61 = vpop.eup %4771  ;;  %v4253_v60 = vmul.f32 -1.442695, %v2837_v17  ;;  %v2942_v47 = vsel %vm2939_vm8, %v2941_v18, %v2937_v22  ;;  %v8165_v17 = vadd.f32 %v9821_v42, %v9765_v3  ;;  %v9825_v22 = vld [vmem:[#allocation104_spill] sm:$0xff]  ;;  %v3251_v46 = vsub.f32 1.0, %v3250_v23  ;;  %9828 = vst [vmem:[#allocation78_spill] sm:$0xff] %v8191_v9 }
 0x380   :  { %v8153_v53 = vadd.f32 1.0, %v4772_v61  ;;  %v8169_v61 = vadd.f32 %v9822_v33, %v5483_v40  ;;  %v8180_v18 = vadd.f32 %v9825_v22, %v9765_v3  ;;  %v9826_v42 = vld [vmem:[#allocation32_spill] sm:$0xff]  ;;  %v3475_v39 = vmul.f32 %v2942_v47, %v2797_v37  ;;  %v9831_v37 = vld [vmem:[#allocation106_spill] sm:$0xff] }
 0x381   :  { %4775 = vpow2.f32 %v4253_v60  ;;  %v2755_v16 = vpop.f32.mrf.mxu0  ;;  %v3237_v60 = vmul.f32 %v8061_v5, %v3236_v25  ;;  %v8185_v33 = vadd.f32 %v9826_v42, %v5483_v40  ;;  %v8195_v22 = vadd.f32 %v9829_v30, %v9765_v3  ;;  %v4774_v38 = vpop.eup %4773  ;;  %v9830_v42 = vld [vmem:[#allocation103_spill] sm:$0xff]  ;;  %v9834_v3 = vld [vmem:[#allocation109_spill] sm:$0xff] }
 0x382   :  { %4777 = vrcp.f32 %v8153_v53  ;;  %v2756_v58 = vadd.f32 %v2755_v16, %v5480_v28  ;;  %v3243_v25 = vand.u32 2147483647, %v7998_v29  ;;  %v3245_v23 = vand.u32 2147483648, %v7998_v29  ;;  %v2804_v31 = vpop.f32.mrf.mxu1 }
 0x383   :  { %4779 = vrcp.f32 %v8151_v50  ;;  %v8201_v47 = vadd.f32 %v9830_v42, %v5483_v40  ;;  %v8205_v16 = vadd.f32 %v9831_v37, %v9759_v54  ;;  %v8209_v9 = vadd.f32 %v9833_v49, %v5483_v40 }
 0x384   :  { %v8213_v30 = vadd.f32 %v9834_v3, %v9759_v54  ;;  %v3238_v26 = vadd.f32 %v8061_v5, %v3237_v60  ;;  %v3252_v42 = vmul.f32 %v8106_v19, %v3251_v46  ;;  %v3491_v40 = vadd.f32 %v3475_v39, %v8069_v7 }
 0x385   :  { %9832 = vst [vmem:[#allocation33_spill] sm:$0xff] %v8205_v16  ;;  %v3158_v54 = vadd.f32 %v2756_v58, %v8091_v10  ;;  %vm8226_vm11 = vcmp.eq.f32.partialorder %v3243_v25, 8.507059e+37  ;;  %v3246_v60 = vor.u32 1.1754944e-38, %v3245_v23  ;;  %v8237_v39 = vadd.f32 1.0, %v4774_v38 }
 0x386   :  { %9835 = vst [vmem:[#allocation30_spill] sm:$0xff] %v8213_v30  ;;  %v8250_v10 = vadd.f32 %v8106_v19, %v3252_v42  ;;  %v3242_v25 = vsel %vm8244_vm13, %v8061_v5, %v3238_v26  ;;  %v8269_v26 = vadd.f32 %v8011_v1, %v5985_v63  ;;  %vm8277_vm0 = vcmp.eq.f32.partialorder %v3258_v35, 8.507059e+37  ;;  %v4368_v1 = vld [vmem:[%s9341_s5] sm:$0xff] }
 0x387   :  { %v4776_v59 = vpop.eup %4775  ;;  %v2706_v37 = vpop.f32.mrf.mxu3  ;;  %v4270_v29 = vmul.f32 -1.442695, %v3158_v54  ;;  %vm2949_vm1 = vweird.f32 %v8153_v53  ;;  %3737 = vmatpush.bf16.msra.mxu2 %v4368_v1  ;;  %vm3284_vm14 = vweird.f32 %v8237_v39 }
 0x388   :  { %v8219_v16 = vpop.eup %4777  ;;  %v8222_v49 = vadd.f32 1.0, %v4776_v59  ;;  %v2707_v3 = vadd.f32 %v2706_v37, %v5273_v45  ;;  %v3260_v59 = vand.u32 2147483648, %v8009_v11  ;;  %v2955_v11 = vand.u32 2147483648, %v8153_v53 }
 0x389   :  { %v2945_v46 = vmul.f32 %v8219_v16, %v8153_v53  ;;  %v2757_v48 = vpop.f32.mrf.mxu0  ;;  %v8233_v20 = vpop.eup %4779  ;;  %v3257_v5 = vsel %vm8263_vm15, %v8106_v19, %v8250_v10  ;;  %v8292_v19 = vadd.f32 %v8114_v0, %v5985_v63  ;;  %vm2950_vm4 = vweird.f32 %v8219_v16 }
 0x38a   :  { %4781 = vrcp.f32 %v8222_v49  ;;  %v2838_v58 = vadd.f32 %v2707_v3, %v8079_v52  ;;  %v2758_v38 = vadd.f32 %v2757_v48, %v5480_v28  ;;  %v3265_v23 = vmul.f32 %v8233_v20, %v8151_v50  ;;  %v2806_v35 = vpop.f32.mrf.mxu1  ;;  %vm8331_vm6 = vmor %vm2949_vm1, %vm2950_vm4 }
 0x38b   :  { %4783 = vtanh.f32 %v8002_v62  ;;  %v2946_v37 = vsub.f32 1.0, %v2945_v46  ;;  %v3261_v48 = vor.u32 1.1754944e-38, %v3260_v59  ;;  %v3247_v3 = vsel %vm8226_vm11, %v3246_v60, %v3242_v25 }
 0x38c   :  { %4785 = vtanh.f32 %v3491_v40  ;;  %v4254_v62 = vmul.f32 -1.442695, %v2838_v58  ;;  %v3159_v42 = vadd.f32 %v2758_v38, %v8110_v27  ;;  %v2953_v40 = vand.u32 2147483647, %v8153_v53 }
 0x38d   :  { %4787 = vrcp.f32 %v8237_v39  ;;  %v3266_v10 = vsub.f32 1.0, %v3265_v23  ;;  %v2947_v58 = vmul.f32 %v8219_v16, %v2946_v37  ;;  %v2956_v25 = vor.u32 1.1754944e-38, %v2955_v11 }
 0x38e   :  { %4789 = vpow2.f32 %v4254_v62  ;;  %v4271_v60 = vmul.f32 -1.442695, %v3159_v42  ;;  %v8301_v62 = vadd.f32 %v2804_v31, %v5985_v63  ;;  %vm8304_vm2 = vcmp.eq.f32.partialorder %v2953_v40, 8.507059e+37 }
 0x38f   :  { %v2708_v54 = vpop.f32.mrf.mxu3  ;;  %4791 = vpow2.f32 %v4270_v29  ;;  %v3522_v29 = vsub.f32 1.0, %v3247_v3  ;;  %v3554_v37 = vmul.f32 %v3247_v3, %v7185_v41  ;;  %v3275_v42 = vand.u32 2147483648, %v8151_v50 }
 0x390   :  { %v8287_v46 = vpop.eup %4781  ;;  %v2709_v59 = vadd.f32 %v2708_v54, %v5273_v45  ;;  %v2968_v31 = vand.u32 2147483647, %v8222_v49  ;;  %v2948_v1 = vadd.f32 %v8219_v16, %v2947_v58  ;;  %4793 = vpow2.f32 %v4271_v60 }
 0x391   :  { %v4784_v7 = vpop.eup %4783  ;;  %v2960_v30 = vmul.f32 %v8287_v46, %v8222_v49  ;;  %v3267_v3 = vmul.f32 %v8233_v20, %v3266_v10  ;;  %vm2964_vm5 = vweird.f32 %v8222_v49  ;;  %v8325_v51 = vadd.f32 %v2806_v35, %v5985_v63 }
 0x392   :  { %v8298_v38 = vpop.eup %4785  ;;  %v2839_v0 = vadd.f32 %v2709_v59, %v8087_v44  ;;  %v3273_v44 = vand.u32 2147483647, %v8151_v50  ;;  %v3538_v8 = vmul.f32 %v4784_v7, %v3522_v29  ;;  %v3276_v58 = vor.u32 1.1754944e-38, %v3275_v42 }
 0x393   :  { %v2961_v23 = vsub.f32 1.0, %v2960_v30  ;;  %v8311_v54 = vpop.eup %4787  ;;  %vm8337_vm7 = vcmp.eq.f32.partialorder %v2968_v31, 8.507059e+37  ;;  %v3262_v35 = vsel %vm8277_vm0, %v3261_v48, %v3257_v5  ;;  %v2952_v53 = vsel %vm8331_vm6, %v8219_v16, %v2948_v1 }
 0x394   :  { %v4255_v11 = vmul.f32 -1.442695, %v2839_v0  ;;  %v4790_v40 = vpop.eup %4789  ;;  %v2970_v0 = vand.u32 2147483648, %v8222_v49  ;;  %v3280_v60 = vmul.f32 %v8311_v54, %v8237_v39  ;;  %vm3270_vm8 = vweird.f32 %v8233_v20 }
 0x395   :  { %v2962_v59 = vmul.f32 %v8287_v46, %v2961_v23  ;;  %v2760_v41 = vpop.f32.mrf.mxu0  ;;  %v4792_v30 = vpop.eup %4791  ;;  %v8319_v43 = vadd.f32 1.0, %v4790_v40  ;;  %vm8351_vm9 = vcmp.eq.f32.partialorder %v3273_v44, 8.507059e+37  ;;  %vm2965_vm10 = vweird.f32 %v8287_v46  ;;  %vm8367_vm11 = vmor %vm3269_vm3, %vm3270_vm8 }
 0x396   :  { %4795 = vpow2.f32 %v4255_v11  ;;  %v2761_v4 = vadd.f32 %v2760_v41, %v5480_v28  ;;  %v8347_v29 = vadd.f32 1.0, %v4792_v30  ;;  %v2809_v27 = vpop.f32.mrf.mxu1  ;;  %v3570_v48 = vadd.f32 %v3554_v37, %v3538_v8  ;;  %v4794_v11 = vpop.eup %4793  ;;  %vm8375_vm12 = vmor %vm2964_vm5, %vm2965_vm10 }
 0x397   :  { %4797 = vrcp.f32 %v8319_v43  ;;  %v2963_v31 = vadd.f32 %v8287_v46, %v2962_v59  ;;  %v3268_v5 = vadd.f32 %v8233_v20, %v3267_v3  ;;  %v2971_v16 = vor.u32 1.1754944e-38, %v2970_v0 }
 0x398   :  { %v3160_v23 = vadd.f32 %v2761_v4, %v8136_v15  ;;  %v3523_v1 = vsub.f32 1.0, %v3262_v35  ;;  %v3555_v4 = vmul.f32 %v3262_v35, %v7230_v12  ;;  %v3288_v15 = vand.u32 2147483647, %v8237_v39 }
 0x399   :  { %v2957_v41 = vsel %vm8304_vm2, %v2956_v25, %v2952_v53  ;;  %v3281_v30 = vsub.f32 1.0, %v3280_v60  ;;  %4799 = vrcp.f32 %v8347_v29  ;;  %vm3285_vm13 = vweird.f32 %v8311_v54 }
 0x39a   :  { %v4272_v59 = vmul.f32 -1.442695, %v3160_v23  ;;  %v3290_v50 = vand.u32 2147483648, %v8237_v39  ;;  %v2967_v3 = vsel %vm8375_vm12, %v8287_v46, %v2963_v31  ;;  %v3539_v0 = vmul.f32 %v8298_v38, %v3523_v1  ;;  %vm8438_vm0 = vmor %vm3284_vm14, %vm3285_vm13 }
 0x39b   :  { %v2711_v40 = vpop.f32.mrf.mxu3  ;;  %v3272_v60 = vsel %vm8367_vm11, %v8233_v20, %v3268_v5  ;;  %v8397_v53 = vadd.f32 1.0, %v4794_v11  ;;  %v3303_v23 = vand.u32 2147483647, %v8347_v29  ;;  %v3282_v38 = vmul.f32 %v8311_v54, %v3281_v30 }
 0x39c   :  { %v4796_v44 = vpop.eup %4795  ;;  %v2712_v10 = vadd.f32 %v2711_v40, %v5273_v45  ;;  %v2972_v20 = vsel %vm8337_vm7, %v2971_v16, %v2967_v3  ;;  %v3571_v31 = vadd.f32 %v3555_v4, %v3539_v0  ;;  %v3586_v5 = vpack.c.bf16 %v3570_v48, %v3570_v48 }
 0x39d   :  { %v8380_v25 = vadd.f32 1.0, %v4796_v44  ;;  %v2762_v52 = vpop.f32.mrf.mxu0  ;;  %v8384_v37 = vpop.eup %4797  ;;  %v3476_v40 = vmul.f32 %v2957_v41, %v8269_v26  ;;  %v8408_v11 = vsel %vm8351_vm9, %v3276_v58, %v3272_v60  ;;  %vm8410_vm15 = vcmp.eq.f32.partialorder %v3288_v15, 8.507059e+37 }
 0x39e   :  { %v2840_v49 = vadd.f32 %v2712_v10, %v8118_v32  ;;  %v2975_v35 = vmul.f32 %v8384_v37, %v8319_v43  ;;  %v2763_v32 = vadd.f32 %v2762_v52, %v5480_v28  ;;  %v3291_v44 = vor.u32 1.1754944e-38, %v3290_v50  ;;  %v2811_v42 = vpop.f32.mrf.mxu1 }
 0x39f   :  { %4801 = vrcp.f32 %v8380_v25  ;;  %v8415_v30 = vpop.eup %4799  ;;  %v3587_v4 = vpack.c.bf16 %v3571_v31, %v3571_v31  ;;  %v4379_v26 = vpack.c.bf16 %v3571_v31, %v3570_v48  ;;  %v3283_v15 = vadd.f32 %v8311_v54, %v3282_v38 }
 0x3a0   :  { %4803 = vpow2.f32 %v4272_v59  ;;  %v4256_v46 = vmul.f32 -1.442695, %v2840_v49  ;;  %v3305_v59 = vand.u32 2147483648, %v8347_v29  ;;  %v2976_v7 = vsub.f32 1.0, %v2975_v35 }
 0x3a1   :  { %v3161_v41 = vadd.f32 %v2763_v32, %v8144_v6  ;;  %v3477_v10 = vmul.f32 %v2972_v20, %v8292_v19  ;;  %v8425_v12 = vadd.f32 %v2809_v27, %v5985_v63  ;;  %4380 = vst [vmem:[#allocation2] sm:$0xff] %v4379_v26   ;;  %v3650_v52 = vunpack.c.l.b16 %v3586_v5 }
 0x3a2   :  { %4805 = vpow2.f32 %v4256_v46  ;;  %v3651_v50 = vunpack.c.l.b16 %v3587_v4  ;;  %v3492_v3 = vadd.f32 %v3476_v40, %v8075_v55  ;;  %v2983_v6 = vand.u32 2147483647, %v8319_v43 }
 0x3a3   :  { %4807 = vrcp.f32 %v8397_v53  ;;  %v2713_v16 = vpop.f32.mrf.mxu3  ;;  %v2985_v49 = vand.u32 2147483648, %v8319_v43  ;;  %v2977_v60 = vmul.f32 %v8384_v37, %v2976_v7  ;;  %v3493_v55 = vadd.f32 %v3477_v10, %v8083_v24 }
 0x3a4   :  { %v2714_v58 = vadd.f32 %v2713_v16, %v5273_v45  ;;  %v3666_v35 = vpack.c.b16 %v3651_v50, %v3650_v52  ;;  %4809 = vtanh.f32 %v3492_v3  ;;  %v3295_v32 = vmul.f32 %v8415_v30, %v8347_v29 }
 0x3a5   :  { %v8422_v8 = vpop.eup %4801  ;;  %v4273_v38 = vmul.f32 -1.442695, %v3161_v41  ;;  %v3287_v20 = vsel %vm8438_vm0, %v8311_v54, %v3283_v15  ;;  %4811 = vtanh.f32 %v3493_v55  ;;  %v3524_v24 = vsub.f32 1.0, %v8408_v11 }
 0x3a6   :  { %v4804_v48 = vpop.eup %4803  ;;  %v2990_v0 = vmul.f32 %v8422_v8, %v8380_v25  ;;  %v2841_v19 = vadd.f32 %v2714_v58, %v8126_v36  ;;  %3738 = vmatmul.bf16.vlgmr.msra.gmra.mxu2 %v3666_v35  ;;  %vm2979_vm1 = vweird.f32 %v8319_v43  ;;  %vm8456_vm2 = vcmp.eq.f32.partialorder %v2983_v6, 8.507059e+37 }
 0x3a7   :  { %v8450_v39 = vadd.f32 1.0, %v4804_v48  ;;  %v2978_v54 = vadd.f32 %v8384_v37, %v2977_v60  ;;  %vm2980_vm3 = vweird.f32 %v8384_v37  ;;  %v3292_v16 = vsel %vm8410_vm15, %v3291_v44, %v3287_v20 }
 0x3a8   :  { %v4806_v46 = vpop.eup %4805  ;;  %v4257_v36 = vmul.f32 -1.442695, %v2841_v19  ;;  %v2991_v7 = vsub.f32 1.0, %v2990_v0  ;;  %v3296_v4 = vsub.f32 1.0, %v3295_v32  ;;  %v2986_v26 = vor.u32 1.1754944e-38, %v2985_v49  ;;  %vm8474_vm4 = vmor %vm2979_vm1, %vm2980_vm3 }
 0x3a9   :  { %v8448_v31 = vpop.eup %4807  ;;  %v8452_v5 = vadd.f32 1.0, %v4806_v46  ;;  %v2998_v41 = vand.u32 2147483647, %v8380_v25  ;;  %v3000_v10 = vand.u32 2147483648, %v8380_v25  ;;  %v3556_v50 = vmul.f32 %v8408_v11, %v7433_v34 }
 0x3aa   :  { %4813 = vpow2.f32 %v4257_v36  ;;  %v4810_v58 = vpop.eup %4809  ;;  %v3310_v15 = vmul.f32 %v8448_v31, %v8397_v53  ;;  %v2992_v44 = vmul.f32 %v8422_v8, %v2991_v7  ;;  %v3525_v6 = vsub.f32 1.0, %v3292_v16 }
 0x3ab   :  { %4815 = vrcp.f32 %v8452_v5  ;;  %v3540_v49 = vmul.f32 %v4810_v58, %v3524_v24  ;;  %v4812_v0 = vpop.eup %4811  ;;  %v2982_v19 = vsel %vm8474_vm4, %v8384_v37, %v2978_v54  ;;  %vm2994_vm5 = vweird.f32 %v8380_v25 }
 0x3ac   :  { %4817 = vpow2.f32 %v4273_v38  ;;  %v8487_v34 = vadd.f32 %v2811_v42, %v5985_v63  ;;  %vm3300_vm6 = vweird.f32 %v8415_v30  ;;  %vm8490_vm7 = vcmp.eq.f32.partialorder %v2998_v41, 8.507059e+37 }
 0x3ad   :  { %4819 = vrcp.f32 %v8450_v39  ;;  %v2765_v52 = vpop.f32.mrf.mxu0  ;;  %v3541_v35 = vmul.f32 %v4812_v0, %v3525_v6  ;;  %v3557_v27 = vmul.f32 %v3292_v16, %v7440_v57  ;;  %v3572_v55 = vadd.f32 %v3556_v50, %v3540_v49 }
 0x3ae   :  { %v2766_v3 = vadd.f32 %v2765_v52, %v5480_v28  ;;  %v8480_v48 = vpop.f32.mrf.mxu1  ;;  %vm3299_vm8 = vweird.f32 %v8347_v29  ;;  %v3311_v46 = vsub.f32 1.0, %v3310_v15  ;;  %v3001_v42 = vor.u32 1.1754944e-38, %v3000_v10 }
 0x3af   :  { %v3297_v38 = vmul.f32 %v8415_v30, %v3296_v4  ;;  %v2987_v20 = vsel %vm8456_vm2, %v2986_v26, %v2982_v19  ;;  %vm2995_vm9 = vweird.f32 %v8422_v8  ;;  %v3573_v57 = vadd.f32 %v3557_v27, %v3541_v35  ;;  %vm8555_vm12 = vmor %vm3299_vm8, %vm3300_vm6 }
 0x3b0   :  { %v4814_v43 = vpop.eup %4813  ;;  %v3162_v60 = vadd.f32 %v2766_v3, %v8169_v61  ;;  %v2993_v61 = vadd.f32 %v8422_v8, %v2992_v44  ;;  %v3013_v54 = vand.u32 2147483647, %v8452_v5  ;;  %v3306_v4 = vor.u32 1.1754944e-38, %v3305_v59  ;;  %vm8524_vm11 = vmor %vm2994_vm5, %vm2995_vm9 }
 0x3b1   :  { %v8497_v37 = vpop.eup %4815  ;;  %v8499_v32 = vadd.f32 1.0, %v4814_v43  ;;  %v3015_v40 = vand.u32 2147483648, %v8452_v5  ;;  %v3588_v58 = vpack.c.bf16 %v3572_v55, %v3572_v55  ;;  %vm8518_vm10 = vcmp.eq.f32.partialorder %v3303_v23, 8.507059e+37 }
 0x3b2   :  { %v4818_v36 = vpop.eup %4817  ;;  %v3005_v7 = vmul.f32 %v8497_v37, %v8452_v5  ;;  %v4274_v26 = vmul.f32 -1.442695, %v3162_v60  ;;  %v3589_v50 = vpack.c.bf16 %v3573_v57, %v3573_v57  ;;  %v3298_v1 = vadd.f32 %v8415_v30, %v3297_v38 }
 0x3b3   :  { %v8506_v24 = vpop.eup %4819  ;;  %4821 = vrcp.f32 %v8499_v32  ;;  %v2716_v16 = vpop.f32.mrf.mxu3  ;;  %v8528_v52 = vadd.f32 1.0, %v4818_v36  ;;  %v3312_v44 = vmul.f32 %v8448_v31, %v3311_v46  ;;  %v2997_v23 = vsel %vm8524_vm11, %v8422_v8, %v2993_v61 }
 0x3b4   :  { %v2717_v41 = vadd.f32 %v2716_v16, %v5273_v45  ;;  %v4384_v49 = vpack.c.bf16 %v3573_v57, %v3572_v55  ;;  %v8541_v0 = vmul.f32 %v8506_v24, %v8450_v39  ;;  %v3006_v19 = vsub.f32 1.0, %v3005_v7 }
 0x3b5   :  { %v2767_v59 = vpop.f32.mrf.mxu0  ;;  %v3652_v43 = vunpack.c.l.b16 %v3588_v58  ;;  %v3653_v60 = vunpack.c.l.b16 %v3589_v50  ;;  %v8543_v35 = vor.u32 1.1754944e-38, %v3015_v40  ;;  %4823 = vpow2.f32 %v4274_v26 }
 0x3b6   :  { %v2842_v3 = vadd.f32 %v2717_v41, %v8157_v13  ;;  %v2768_v25 = vadd.f32 %v2767_v59, %v5480_v28  ;;  %v8537_v6 = vpop.f32.mrf.mxu1  ;;  %4416 = vst [vmem:[#allocation2 + $0x8] sm:$0xff] %v4384_v49   ;;  %v3002_v46 = vsel %vm8490_vm7, %v3001_v42, %v2997_v23  ;;  %4825 = vrcp.f32 %v8528_v52 }
 0x3b7   :  { %v3667_v55 = vpack.c.b16 %v3653_v60, %v3652_v43  ;;  %v3478_v36 = vmul.f32 %v2987_v20, %v8301_v62  ;;  %vm3009_vm13 = vweird.f32 %v8452_v5  ;;  %v3302_v11 = vsel %vm8555_vm12, %v8415_v30, %v3298_v1 }
 0x3b8   :  { %v4258_v27 = vmul.f32 -1.442695, %v2842_v3  ;;  %v3163_v8 = vadd.f32 %v2768_v25, %v8185_v33  ;;  %vm3314_vm14 = vweird.f32 %v8397_v53  ;;  %v3326_v29 = vsub.f32 1.0, %v8541_v0 }
 0x3b9   :  { %v8546_v13 = vpop.eup %4821  ;;  %v3007_v42 = vmul.f32 %v8497_v37, %v3006_v19  ;;  %3743 = vmatmul.bf16.gmra.mxu2 %v3667_v55  ;;  %v3313_v62 = vadd.f32 %v8448_v31, %v3312_v44  ;;  %vm3315_vm15 = vweird.f32 %v8448_v31  ;;  %v3479_v7 = vmul.f32 %v3002_v46, %v8325_v51 }
 0x3ba   :  { %v3020_v33 = vmul.f32 %v8546_v13, %v8499_v32  ;;  %4827 = vpow2.f32 %v4258_v27  ;;  %v4275_v20 = vmul.f32 -1.442695, %v3163_v8  ;;  %v3494_v16 = vadd.f32 %v3478_v36, %v8097_v56  ;;  %vm8601_vm2 = vmor %vm3314_vm14, %vm3315_vm15 }
 0x3bb   :  { %v2718_v61 = vpop.f32.mrf.mxu3  ;;  %v8576_v40 = vadd.f32 %v8480_v48, %v5985_v63  ;;  %v3307_v41 = vsel %vm8518_vm10, %v3306_v4, %v3302_v11  ;;  %v3318_v58 = vand.u32 2147483647, %v8397_v53  ;;  %v4824_v10 = vpop.eup %4823  ;;  %vm3010_vm0 = vweird.f32 %v8497_v37 }
 0x3bc   :  { %v2719_v57 = vadd.f32 %v2718_v61, %v5273_v45  ;;  %v3021_v30 = vsub.f32 1.0, %v3020_v33  ;;  %v3320_v56 = vand.u32 2147483648, %v8397_v53  ;;  %v8587_v1 = vpop.eup %4825  ;;  %v3008_v48 = vadd.f32 %v8497_v37, %v3007_v42  ;;  %vm8620_vm3 = vmor %vm3009_vm13, %vm3010_vm0  ;;  %v9882_v42 = vld [vmem:[#allocation63_spill] sm:$0xff] }
 0x3bd   :  { %v2770_v26 = vpop.f32.mrf.mxu0  ;;  %vm8592_vm1 = vcmp.eq.f32.partialorder %v3013_v54, 8.507059e+37  ;;  %v3028_v15 = vand.u32 2147483647, %v8499_v32  ;;  %v3495_v44 = vadd.f32 %v3479_v7, %v8122_v21  ;;  %4829 = vtanh.f32 %v3494_v16 }
 0x3be   :  { %v2843_v59 = vadd.f32 %v2719_v57, %v8165_v17  ;;  %v2771_v51 = vadd.f32 %v2770_v26, %v5480_v28  ;;  %v8584_v50 = vpop.f32.mrf.mxu1  ;;  %4831 = vpow2.f32 %v4275_v20  ;;  %v3317_v25 = vsel %vm8601_vm2, %v8448_v31, %v3313_v62 }
 0x3bf   :  { %v3022_v49 = vmul.f32 %v8546_v13, %v3021_v30  ;;  %v8611_v19 = vadd.f32 1.0, %v4824_v10  ;;  %4833 = vtanh.f32 %v3495_v44  ;;  %v3030_v43 = vand.u32 2147483648, %v8499_v32 }
 0x3c0   :  { %v4828_v23 = vpop.eup %4827  ;;  %v4259_v3 = vmul.f32 -1.442695, %v2843_v59  ;;  %v3164_v54 = vadd.f32 %v2771_v51, %v8201_v47  ;;  %v3321_v60 = vor.u32 1.1754944e-38, %v3320_v56  ;;  %v8626_v31 = vmul.f32 %v8587_v1, %v8528_v52 }
 0x3c1   :  { %v8613_v53 = vadd.f32 1.0, %v4828_v23  ;;  %vm3024_vm4 = vweird.f32 %v8499_v32  ;;  %vm3319_vm5 = vcmp.eq.f32.partialorder %v3318_v58, 8.507059e+37  ;;  %v3012_v8 = vsel %vm8620_vm3, %v8497_v37, %v3008_v48 }
 0x3c2   :  { %4835 = vpow2.f32 %v4259_v3  ;;  %v4276_v21 = vmul.f32 -1.442695, %v3164_v54  ;;  %v3322_v46 = vsel %vm3319_vm5, %v3321_v60, %v3317_v25  ;;  %v3023_v38 = vadd.f32 %v8546_v13, %v3022_v49 }
 0x3c3   :  { %4837 = vrcp.f32 %v8613_v53  ;;  %v2721_v27 = vpop.f32.mrf.mxu3  ;;  %v4830_v55 = vpop.eup %4829  ;;  %vm3025_vm6 = vweird.f32 %v8546_v13  ;;  %v3526_v33 = vsub.f32 1.0, %v3307_v41  ;;  %vm8637_vm7 = vcmp.eq.f32.partialorder %v3028_v15, 8.507059e+37 }
 0x3c4   :  { %4839 = vpow2.f32 %v4276_v21  ;;  %v2722_v5 = vadd.f32 %v2721_v27, %v5273_v45  ;;  %v4832_v11 = vpop.eup %4831  ;;  %v3031_v61 = vor.u32 1.1754944e-38, %v3030_v43  ;;  %v3341_v7 = vsub.f32 1.0, %v8626_v31  ;;  %vm8656_vm8 = vmor %vm3024_vm4, %vm3025_vm6 }
 0x3c5   :  { %4841 = vrcp.f32 %v8611_v19  ;;  %v2772_v36 = vpop.f32.mrf.mxu0  ;;  %v4834_v57 = vpop.eup %4833  ;;  %v3527_v16 = vsub.f32 1.0, %v3322_v46  ;;  %v3542_v30 = vmul.f32 %v4830_v55, %v3526_v33  ;;  %v3558_v26 = vmul.f32 %v3307_v41, %v7550_v14 }
 0x3c6   :  { %v2844_v37 = vadd.f32 %v2722_v5, %v8180_v18  ;;  %v2773_v62 = vadd.f32 %v2772_v36, %v5480_v28  ;;  %v8643_v20 = vpop.f32.mrf.mxu1  ;;  %v8650_v10 = vsel %vm8592_vm1, %v8543_v35, %v3012_v8  ;;  %v8662_v59 = vadd.f32 %v8537_v6, %v5985_v63 }
 0x3c7   :  { %v3027_v35 = vsel %vm8656_vm8, %v8546_v13, %v3023_v38  ;;  %v3543_v32 = vmul.f32 %v4834_v57, %v3527_v16  ;;  %v3574_v48 = vadd.f32 %v3558_v26, %v3542_v30  ;;  %v8674_v17 = vadd.f32 1.0, %v4832_v11 }
 0x3c8   :  { %v4836_v58 = vpop.eup %4835  ;;  %v4260_v51 = vmul.f32 -1.442695, %v2844_v37  ;;  %v3165_v14 = vadd.f32 %v2773_v62, %v8209_v9  ;;  %v8681_v9 = vadd.f32 %v8584_v50, %v5985_v63  ;;  %v3559_v23 = vmul.f32 %v3322_v46, %v7566_v2 }
 0x3c9   :  { %v8665_v41 = vpop.eup %4837  ;;  %v8670_v56 = vadd.f32 1.0, %v4836_v58  ;;  %v3327_v3 = vmul.f32 %v8506_v24, %v3326_v29  ;;  %vm3329_vm9 = vweird.f32 %v8450_v39  ;;  %v8693_v43 = vsel %vm8637_vm7, %v3031_v61, %v3027_v35 }
 0x3ca   :  { %v4840_v4 = vpop.eup %4839  ;;  %v3035_v15 = vmul.f32 %v8665_v41, %v8613_v53  ;;  %4843 = vpow2.f32 %v4260_v51  ;;  %v4277_v6 = vmul.f32 -1.442695, %v3165_v14  ;;  %v3575_v21 = vadd.f32 %v3559_v23, %v3543_v32 }
 0x3cb   :  { %v8676_v44 = vpop.eup %4841  ;;  %4845 = vrcp.f32 %v8670_v56  ;;  %v2723_v13 = vpop.f32.mrf.mxu3  ;;  %v8687_v25 = vadd.f32 1.0, %v4840_v4  ;;  %vm3330_vm10 = vweird.f32 %v8506_v24  ;;  %v3045_v0 = vand.u32 2147483648, %v8613_v53 }
 0x3cc   :  { %v3036_v54 = vsub.f32 1.0, %v3035_v15  ;;  %v2724_v49 = vadd.f32 %v2723_v13, %v5273_v45  ;;  %4847 = vpow2.f32 %v4277_v6  ;;  %v8698_v2 = vmul.f32 %v8676_v44, %v8611_v19  ;;  %vm8734_vm14 = vmor %vm3329_vm9, %vm3330_vm10 }
 0x3cd   :  { %v2775_v50 = vpop.f32.mrf.mxu0  ;;  %4849 = vrcp.f32 %v8674_v17  ;;  %v3590_v47 = vpack.c.bf16 %v3574_v48, %v3574_v48  ;;  %v3591_v27 = vpack.c.bf16 %v3575_v21, %v3575_v21  ;;  %v4389_v8 = vpack.c.bf16 %v3575_v21, %v3574_v48 }
 0x3ce   :  { %v2845_v29 = vadd.f32 %v2724_v49, %v8195_v22  ;;  %v2776_v60 = vadd.f32 %v2775_v50, %v5480_v28  ;;  %v3037_v46 = vmul.f32 %v8665_v41, %v3036_v54  ;;  %v3043_v55 = vand.u32 2147483647, %v8613_v53  ;;  %v2824_v36 = vpop.f32.mrf.mxu1 }
 0x3cf   :  { %4851 = vrcp.f32 %v8687_v25  ;;  %4417 = vst [vmem:[#allocation2 + $0x10] sm:$0xff] %v4389_v8   ;;  %v3655_v61 = vunpack.c.l.b16 %v3591_v27  ;;  %v8713_v37 = vadd.f32 %v8506_v24, %v3327_v3  ;;  %vm3039_vm11 = vweird.f32 %v8613_v53 }
 0x3d0   :  { %v4844_v5 = vpop.eup %4843  ;;  %v4261_v38 = vmul.f32 -1.442695, %v2845_v29  ;;  %v3166_v22 = vadd.f32 %v2776_v60, %v9882_v42  ;;  %v3333_v57 = vand.u32 2147483647, %v8450_v39  ;;  %v3356_v30 = vsub.f32 1.0, %v8698_v2  ;;  %v9891_v60 = vld [vmem:[#allocation64_spill] sm:$0xff] }
 0x3d1   :  { %v8707_v33 = vpop.eup %4845  ;;  %v8709_v11 = vadd.f32 1.0, %v4844_v5  ;;  %v3046_v26 = vor.u32 1.1754944e-38, %v3045_v0  ;;  %v3654_v58 = vunpack.c.l.b16 %v3590_v47  ;;  %v3038_v14 = vadd.f32 %v8665_v41, %v3037_v46  ;;  %v9892_v46 = vld [vmem:[#allocation67_spill] sm:$0xff]  ;;  %v9898_v0 = vld [vmem:[#allocation68_spill] sm:$0xff] }
 0x3d2   :  { %v3050_v62 = vmul.f32 %v8707_v33, %v8670_v56  ;;  %4853 = vpow2.f32 %v4261_v38  ;;  %v4848_v16 = vpop.eup %4847  ;;  %vm3040_vm12 = vweird.f32 %v8665_v41  ;;  %vm8725_vm13 = vcmp.eq.f32.partialorder %v3043_v55, 8.507059e+37  ;;  %v9895_v29 = vld [vmem:[#allocation59_spill] sm:$0xff] }
 0x3d3   :  { %4855 = vrcp.f32 %v8709_v11  ;;  %v2726_v18 = vpop.f32.mrf.mxu3  ;;  %v8721_v51 = vpop.eup %4849  ;;  %v3060_v32 = vand.u32 2147483648, %v8670_v56  ;;  %v4278_v48 = vmul.f32 -1.442695, %v3166_v22  ;;  %v8740_v15 = vadd.f32 %v8643_v20, %v5985_v63  ;;  %vm8761_vm0 = vmor %vm3039_vm11, %vm3040_vm12 }
 0x3d4   :  { %v3668_v6 = vpack.c.b16 %v3655_v61, %v3654_v58  ;;  %v2727_v13 = vadd.f32 %v2726_v18, %v5273_v45  ;;  %v3332_v3 = vsel %vm8734_vm14, %v8506_v24, %v8713_v37  ;;  %v3051_v49 = vsub.f32 1.0, %v3050_v62 }
 0x3d5   :  { %v2777_v23 = vpop.f32.mrf.mxu0  ;;  %v8747_v54 = vpop.eup %4851  ;;  %v8749_v50 = vadd.f32 1.0, %v4848_v16  ;;  %vm8752_vm15 = vcmp.eq.f32.partialorder %v3333_v57, 8.507059e+37  ;;  %v3335_v20 = vand.u32 2147483648, %v8450_v39  ;;  %v8767_v24 = vmul.f32 %v8721_v51, %v8674_v17 }
 0x3d6   :  { %v2778_v21 = vadd.f32 %v2777_v23, %v5480_v28  ;;  %4857 = vpow2.f32 %v4278_v48  ;;  %3748 = vmatmul.bf16.gmra.mxu2 %v3668_v6  ;;  %v2846_v47 = vadd.f32 %v2727_v13, %v9891_v60  ;;  %v3342_v39 = vmul.f32 %v8587_v1, %v3341_v7  ;;  %v2826_v62 = vpop.f32.mrf.mxu1 }
 0x3d7   :  { %v3042_v53 = vsel %vm8761_vm0, %v8665_v41, %v3038_v14  ;;  %vm3054_vm1 = vweird.f32 %v8670_v56  ;;  %v3058_v8 = vand.u32 2147483647, %v8670_v56  ;;  %v8778_v5 = vor.u32 1.1754944e-38, %v3060_v32  ;;  %v9909_v56 = vld [vmem:[#allocation66_spill] sm:$0xff] }
 0x3d8   :  { %v4854_v27 = vpop.eup %4853  ;;  %v3167_v55 = vadd.f32 %v2778_v21, %v9892_v46  ;;  %v8785_v31 = vmul.f32 %v8747_v54, %v8687_v25  ;;  %v3075_v7 = vand.u32 2147483648, %v8709_v11  ;;  %v4262_v22 = vmul.f32 -1.442695, %v2846_v47 }
 0x3d9   :  { %v8781_v38 = vpop.eup %4855  ;;  %v8788_v42 = vadd.f32 1.0, %v4854_v27  ;;  %v3052_v41 = vmul.f32 %v8707_v33, %v3051_v49  ;;  %4859 = vrcp.f32 %v8749_v50  ;;  %v3371_v57 = vsub.f32 1.0, %v8767_v24 }
 0x3da   :  { %v3065_v61 = vmul.f32 %v8781_v38, %v8709_v11  ;;  %v4279_v37 = vmul.f32 -1.442695, %v3167_v55  ;;  %v8797_v16 = vadd.f32 %v2824_v36, %v5985_v63  ;;  %v3336_v18 = vor.u32 1.1754944e-38, %v3335_v20 }
 0x3db   :  { %4861 = vrcp.f32 %v8788_v42  ;;  %v2728_v58 = vpop.f32.mrf.mxu3  ;;  %vm3055_vm2 = vweird.f32 %v8707_v33  ;;  %vm8800_vm3 = vcmp.eq.f32.partialorder %v3058_v8, 8.507059e+37  ;;  %v8807_v6 = vsel %vm8725_vm13, %v3046_v26, %v3042_v53 }
 0x3dc   :  { %v3066_v32 = vsub.f32 1.0, %v3065_v61  ;;  %4863 = vpow2.f32 %v4262_v22  ;;  %v2729_v48 = vadd.f32 %v2728_v58, %v5273_v45  ;;  %v4858_v4 = vpop.eup %4857  ;;  %v3073_v36 = vand.u32 2147483647, %v8709_v11  ;;  %vm8838_vm7 = vmor %vm3054_vm1, %vm3055_vm2 }
 0x3dd   :  { %v8810_v13 = vor.u32 1.1754944e-38, %v3075_v7  ;;  %4865 = vpow2.f32 %v4279_v37  ;;  %v2780_v23 = vpop.f32.mrf.mxu0  ;;  %v3053_v49 = vadd.f32 %v8707_v33, %v3052_v41  ;;  %v3386_v21 = vsub.f32 1.0, %v8785_v31 }
 0x3de   :  { %vm3069_vm4 = vweird.f32 %v8709_v11  ;;  %v8815_v20 = vadd.f32 1.0, %v4858_v4  ;;  %v2847_v60 = vadd.f32 %v2729_v48, %v9895_v29  ;;  %v8819_v35 = vadd.f32 %v2826_v62, %v5985_v63  ;;  %v9901_v4 = vld [vmem:[#allocation75_spill] sm:$0xff] }
 0x3df   :  { %v2781_v26 = vadd.f32 %v2780_v23, %v5480_v28  ;;  %v8824_v47 = vsel %vm8752_vm15, %v3336_v18, %v3332_v3  ;;  %v3343_v27 = vadd.f32 %v8587_v1, %v3342_v39  ;;  %v8827_v53 = vpop.eup %4859  ;;  %v3067_v8 = vmul.f32 %v8781_v38, %v3066_v32  ;;  %v2829_v32 = vpop.f32.mrf.mxu1 }
 0x3e0   :  { %v4263_v46 = vmul.f32 -1.442695, %v2847_v60  ;;  %vm3344_vm5 = vweird.f32 %v8528_v52  ;;  %vm3345_vm6 = vweird.f32 %v8587_v1  ;;  %4867 = vrcp.f32 %v8815_v20  ;;  %v9904_v60 = vld [vmem:[#allocation76_spill] sm:$0xff] }
 0x3e1   :  { %v8832_v55 = vpop.eup %4861  ;;  %v3168_v39 = vadd.f32 %v2781_v26, %v9898_v0  ;;  %v3480_v7 = vmul.f32 %v8650_v10, %v8425_v12  ;;  %v3481_v22 = vmul.f32 %v8693_v43, %v8487_v34  ;;  %v3057_v61 = vsel %vm8838_vm7, %v8707_v33, %v3053_v49  ;;  %vm8878_vm10 = vmor %vm3344_vm5, %vm3345_vm6 }
 0x3e2   :  { %v4864_v41 = vpop.eup %4863  ;;  %vm3070_vm8 = vweird.f32 %v8781_v38  ;;  %vm8852_vm9 = vcmp.eq.f32.partialorder %v3073_v36, 8.507059e+37  ;;  %v3080_v37 = vmul.f32 %v8832_v55, %v8788_v42  ;;  %4869 = vpow2.f32 %v4263_v46 }
 0x3e3   :  { %v4866_v62 = vpop.eup %4865  ;;  %v8860_v12 = vmul.f32 %v8827_v53, %v8749_v50  ;;  %v3090_v34 = vand.u32 2147483648, %v8788_v42  ;;  %v8863_v10 = vadd.f32 1.0, %v4864_v41  ;;  %v4280_v43 = vmul.f32 -1.442695, %v3168_v39  ;;  %v2731_v33 = vpop.f32.mrf.mxu3  ;;  %vm8897_vm12 = vmor %vm3069_vm4, %vm3070_vm8 }
 0x3e4   :  { %v3068_v58 = vadd.f32 %v8781_v38, %v3067_v8  ;;  %v3081_v18 = vsub.f32 1.0, %v3080_v37  ;;  %v3350_v48 = vand.u32 2147483648, %v8528_v52  ;;  %v3496_v36 = vadd.f32 %v3480_v7, %v9901_v4 }
 0x3e5   :  { %v8871_v23 = vsel %vm8800_vm3, %v8778_v5, %v3057_v61  ;;  %4871 = vrcp.f32 %v8863_v10  ;;  %v3348_v29 = vand.u32 2147483647, %v8528_v52  ;;  %v3497_v26 = vadd.f32 %v3481_v22, %v9904_v60  ;;  %v9910_v60 = vld [vmem:[#allocation47_spill] sm:$0xff] }
 0x3e6   :  { %vm3084_vm11 = vweird.f32 %v8788_v42  ;;  %v3088_v14 = vand.u32 2147483647, %v8788_v42  ;;  %v8886_v5 = vadd.f32 1.0, %v4866_v62  ;;  %v3347_v8 = vsel %vm8878_vm10, %v8587_v1, %v3343_v27  ;;  %v8891_v46 = vpop.eup %4867 }
 0x3e7   :  { %v3401_v3 = vsub.f32 1.0, %v8860_v12  ;;  %v8902_v0 = vor.u32 1.1754944e-38, %v3090_v34  ;;  %4873 = vpow2.f32 %v4280_v43  ;;  %v8905_v39 = vadd.f32 %v2829_v32, %v5985_v63 }
 0x3e8   :  { %v4870_v7 = vpop.eup %4869  ;;  %v3072_v1 = vsel %vm8897_vm12, %v8781_v38, %v3068_v58  ;;  %v3082_v27 = vmul.f32 %v8832_v55, %v3081_v18  ;;  %v3351_v11 = vor.u32 1.1754944e-38, %v3350_v48  ;;  %4875 = vtanh.f32 %v3496_v36  ;;  %v2782_v38 = vpop.f32.mrf.mxu0 }
 0x3e9   :  { %v3105_v22 = vand.u32 2147483648, %v8863_v10  ;;  %v8912_v41 = vadd.f32 1.0, %v4870_v7  ;;  %vm3349_vm13 = vcmp.eq.f32.partialorder %v3348_v29, 8.507059e+37  ;;  %4877 = vtanh.f32 %v3497_v26 }
 0x3ea   :  { %v8916_v61 = vmul.f32 %v8891_v46, %v8815_v20  ;;  %4879 = vrcp.f32 %v8886_v5  ;;  %v3352_v37 = vsel %vm3349_vm13, %v3351_v11, %v3347_v8  ;;  %v2732_v62 = vadd.f32 %v2731_v33, %v5273_v45 }
 0x3eb   :  { %v8920_v34 = vpop.eup %4871  ;;  %v8925_v43 = vsel %vm8852_vm9, %v8810_v13, %v3072_v1  ;;  %vm3085_vm14 = vweird.f32 %v8832_v55  ;;  %v3103_v58 = vand.u32 2147483647, %v8863_v10  ;;  %4881 = vrcp.f32 %v8912_v41  ;;  %v2733_v4 = vpop.f32.mrf.mxu3 }
 0x3ec   :  { %v3083_v18 = vadd.f32 %v8832_v55, %v3082_v27  ;;  %vm8931_vm15 = vcmp.eq.f32.partialorder %v3088_v14, 8.507059e+37  ;;  %v3095_v33 = vmul.f32 %v8920_v34, %v8863_v10  ;;  %v3528_v48 = vsub.f32 1.0, %v8824_v47  ;;  %vm8952_vm1 = vmor %vm3084_vm11, %vm3085_vm14 }
 0x3ed   :  { %v2848_v13 = vadd.f32 %v2732_v62, %v9909_v56  ;;  %v4874_v36 = vpop.eup %4873  ;;  %vm3099_vm0 = vweird.f32 %v8863_v10  ;;  %v8940_v49 = vor.u32 1.1754944e-38, %v3105_v22  ;;  %v3529_v29 = vsub.f32 1.0, %v3352_v37 }
 0x3ee   :  { %v3560_v26 = vmul.f32 %v8824_v47, %v9910_v60  ;;  %v2783_v14 = vadd.f32 %v2782_v38, %v5480_v28  ;;  %v4876_v8 = vpop.eup %4875  ;;  %v3096_v7 = vsub.f32 1.0, %v3095_v33  ;;  %v8946_v1 = vadd.f32 1.0, %v4874_v36  ;;  %v9913_v47 = vld [vmem:[#allocation48_spill] sm:$0xff]  ;;  %v9914_v28 = vld [vmem:[#allocation70_spill] sm:$0xff] }
 0x3ef   :  { %v4264_v27 = vmul.f32 -1.442695, %v2848_v13  ;;  %v4878_v11 = vpop.eup %4877  ;;  %v3544_v62 = vmul.f32 %v4876_v8, %v3528_v48  ;;  %v3561_v56 = vmul.f32 %v3352_v37, %v9913_v47  ;;  %v2734_v60 = vadd.f32 %v2733_v4, %v5273_v45 }
 0x3f0   :  { %v3169_v38 = vadd.f32 %v2783_v14, %v9914_v28  ;;  %v8959_v33 = vpop.eup %4879  ;;  %v3087_v13 = vsel %vm8952_vm1, %v8832_v55, %v3083_v18  ;;  %v3097_v36 = vmul.f32 %v8920_v34, %v3096_v7  ;;  %v3545_v42 = vmul.f32 %v4878_v11, %v3529_v29  ;;  %v9917_v14 = vld [vmem:[#allocation69_spill] sm:$0xff]  ;;  %v2831_v28 = vpop.f32.mrf.mxu1 }
 0x3f1   :  { %v3357_v52 = vmul.f32 %v8676_v44, %v3356_v30  ;;  %v8968_v48 = vpop.eup %4881  ;;  %vm8970_vm2 = vcmp.eq.f32.partialorder %v3103_v58, 8.507059e+37  ;;  %v3576_v45 = vadd.f32 %v3560_v26, %v3544_v62  ;;  %4883 = vpow2.f32 %v4264_v27 }
 0x3f2   :  { %v4281_v4 = vmul.f32 -1.442695, %v3169_v38  ;;  %v2849_v8 = vadd.f32 %v2734_v60, %v9917_v14  ;;  %vm3100_vm3 = vweird.f32 %v8920_v34  ;;  %v3110_v55 = vmul.f32 %v8968_v48, %v8912_v41 }
 0x3f3   :  { %4885 = vrcp.f32 %v8946_v1  ;;  %v3577_v2 = vadd.f32 %v3561_v56, %v3545_v42  ;;  %v3098_v30 = vadd.f32 %v8920_v34, %v3097_v36  ;;  %v3592_v18 = vpack.c.bf16 %v3576_v45, %v3576_v45  ;;  %vm8992_vm5 = vmor %vm3099_vm0, %vm3100_vm3  ;;  %v9929_v36 = vld [vmem:[#allocation78_spill] sm:$0xff] }
 0x3f4   :  { %4887 = vpow2.f32 %v4281_v4  ;;  %v4265_v58 = vmul.f32 -1.442695, %v2849_v8  ;;  %v3111_v29 = vsub.f32 1.0, %v3110_v55  ;;  %v3118_v26 = vand.u32 2147483647, %v8912_v41 }
 0x3f5   :  { %v3593_v7 = vpack.c.bf16 %v3577_v2, %v3577_v2  ;;  %v4394_v27 = vpack.c.bf16 %v3577_v2, %v3576_v45  ;;  %v8984_v11 = vsel %vm8931_vm15, %v8902_v0, %v3087_v13  ;;  %v3120_v22 = vand.u32 2147483648, %v8912_v41 }
 0x3f6   :  { %4889 = vpow2.f32 %v4265_v58  ;;  %vm3359_vm4 = vweird.f32 %v8611_v19  ;;  %v8998_v47 = vmul.f32 %v8959_v33, %v8886_v5  ;;  %v3112_v0 = vmul.f32 %v8968_v48, %v3111_v29 }
 0x3f7   :  { %4418 = vst [vmem:[#allocation2 + $0x18] sm:$0xff] %v4394_v27   ;;  %v3656_v32 = vunpack.c.l.b16 %v3592_v18  ;;  %v3657_v56 = vunpack.c.l.b16 %v3593_v7  ;;  %v4884_v38 = vpop.eup %4883  ;;  %v3102_v60 = vsel %vm8992_vm5, %v8920_v34, %v3098_v30  ;;  %vm3114_vm6 = vweird.f32 %v8912_v41 }
 0x3f8   :  { %v3358_v10 = vadd.f32 %v8676_v44, %v3357_v52  ;;  %vm3360_vm7 = vweird.f32 %v8676_v44  ;;  %vm9009_vm8 = vcmp.eq.f32.partialorder %v3118_v26, 8.507059e+37  ;;  %v9013_v45 = vadd.f32 1.0, %v4884_v38 }
 0x3f9   :  { %v9007_v13 = vpop.eup %4885  ;;  %v3669_v42 = vpack.c.b16 %v3657_v56, %v3656_v32  ;;  %v3365_v4 = vand.u32 2147483648, %v8611_v19  ;;  %v3113_v34 = vadd.f32 %v8968_v48, %v3112_v0  ;;  %vm3115_vm9 = vweird.f32 %v8968_v48  ;;  %vm9035_vm10 = vmor %vm3359_vm4, %vm3360_vm7  ;;  %v9926_v0 = vld [vmem:[#allocation77_spill] sm:$0xff] }
 0x3fa   :  { %v4888_v14 = vpop.eup %4887  ;;  %v9019_v52 = vadd.f32 %v2831_v28, %v5985_v63  ;;  %v3372_v8 = vmul.f32 %v8721_v51, %v3371_v57  ;;  %v9027_v55 = vsel %vm8970_vm2, %v8940_v49, %v3102_v60  ;;  %v3431_v2 = vsub.f32 1.0, %v8998_v47  ;;  %vm9051_vm11 = vmor %vm3114_vm6, %vm3115_vm9 }
 0x3fb   :  { %v3121_v30 = vor.u32 1.1754944e-38, %v3120_v22  ;;  %3753 = vmatmul.bf16.gmra.mxu2 %v3669_v42  ;;  %4891 = vrcp.f32 %v9013_v45  ;;  %v9041_v57 = vmul.f32 %v9007_v13, %v8946_v1  ;;  %v9043_v49 = vadd.f32 1.0, %v4888_v14 }
 0x3fc   :  { %v4890_v24 = vpop.eup %4889  ;;  %v3362_v37 = vsel %vm9035_vm10, %v8676_v44, %v3358_v10  ;;  %v3363_v18 = vand.u32 2147483647, %v8611_v19  ;;  %v3366_v26 = vor.u32 1.1754944e-38, %v3365_v4  ;;  %vm3374_vm12 = vweird.f32 %v8674_v17 }
 0x3fd   :  { %v9055_v29 = vadd.f32 1.0, %v4890_v24  ;;  %vm3375_vm13 = vweird.f32 %v8721_v51  ;;  %v3117_v7 = vsel %vm9051_vm11, %v8968_v48, %v3113_v34  ;;  %4893 = vrcp.f32 %v9043_v49 }
 0x3fe   :  { %v3373_v19 = vadd.f32 %v8721_v51, %v3372_v8  ;;  %v3482_v44 = vmul.f32 %v8807_v6, %v8576_v40  ;;  %v3135_v41 = vand.u32 2147483648, %v9013_v45  ;;  %v3378_v27 = vand.u32 2147483647, %v8674_v17  ;;  %vm9085_vm15 = vmor %vm3374_vm12, %vm3375_vm13 }
 0x3ff   :  { %4895 = vrcp.f32 %v9055_v29  ;;  %v3380_v22 = vand.u32 2147483648, %v8674_v17  ;;  %v3446_v62 = vsub.f32 1.0, %v9041_v57  ;;  %vm3364_vm14 = vcmp.eq.f32.partialorder %v3363_v18, 8.507059e+37 }
 0x400   :  { %v3483_v48 = vmul.f32 %v8871_v23, %v8662_v59  ;;  %v3498_v32 = vadd.f32 %v3482_v44, %v9926_v0  ;;  %v9078_v40 = vsel %vm9009_vm8, %v3121_v30, %v3117_v7  ;;  %v3133_v6 = vand.u32 2147483647, %v9013_v45  ;;  %v9930_v7 = vld [vmem:[#allocation53_spill] sm:$0xff] }
 0x401   :  { %v9074_v56 = vpop.eup %4891  ;;  %v3367_v28 = vsel %vm3364_vm14, %v3366_v26, %v3362_v37  ;;  %v3387_v59 = vmul.f32 %v8747_v54, %v3386_v21  ;;  %v3150_v60 = vand.u32 2147483648, %v9055_v29  ;;  %v3377_v10 = vsel %vm9085_vm15, %v8721_v51, %v3373_v19 }
 0x402   :  { %v3125_v23 = vmul.f32 %v9074_v56, %v9013_v45  ;;  %v3499_v42 = vadd.f32 %v3483_v48, %v9929_v36  ;;  %v9099_v17 = vor.u32 1.1754944e-38, %v3135_v41  ;;  %vm3379_vm0 = vcmp.eq.f32.partialorder %v3378_v27, 8.507059e+37  ;;  %v9931_v41 = vld [vmem:[#allocation54_spill] sm:$0xff] }
 0x403   :  { %v3381_v4 = vor.u32 1.1754944e-38, %v3380_v22  ;;  %4897 = vtanh.f32 %v3498_v32  ;;  %v9101_v14 = vpop.eup %4893  ;;  %v3148_v21 = vand.u32 2147483647, %v9055_v29  ;;  %v3530_v34 = vsub.f32 1.0, %v3367_v28 }
 0x404   :  { %v3126_v31 = vsub.f32 1.0, %v3125_v23  ;;  %4899 = vtanh.f32 %v3499_v42  ;;  %vm3129_vm1 = vweird.f32 %v9013_v45  ;;  %v3388_v51 = vadd.f32 %v8747_v54, %v3387_v59 }
 0x405   :  { %v9104_v8 = vpop.eup %4895  ;;  %v3382_v30 = vsel %vm3379_vm0, %v3381_v4, %v3377_v10  ;;  %vm3390_vm2 = vweird.f32 %v8747_v54  ;;  %v3402_v63 = vmul.f32 %v8827_v53, %v3401_v3  ;;  %v9114_v37 = vor.u32 1.1754944e-38, %v3150_v60  ;;  %v9936_v4 = vld [vmem:[#allocation33_spill] sm:$0xff] }
 0x406   :  { %v3140_v24 = vmul.f32 %v9104_v8, %v9055_v29  ;;  %v3393_v18 = vand.u32 2147483647, %v8687_v25  ;;  %v3395_v58 = vand.u32 2147483648, %v8687_v25  ;;  %v3127_v26 = vmul.f32 %v9074_v56, %v3126_v31 }
 0x407   :  { %vm3130_vm3 = vweird.f32 %v9074_v56  ;;  %v3562_v19 = vmul.f32 %v3367_v28, %v9930_v7  ;;  %vm3389_vm4 = vweird.f32 %v8687_v25  ;;  %v9124_v12 = vmul.f32 %v9101_v14, %v9043_v49 }
 0x408   :  { %v3141_v3 = vsub.f32 1.0, %v3140_v24  ;;  %v3531_v44 = vsub.f32 1.0, %v3382_v30  ;;  %v3563_v27 = vmul.f32 %v3382_v30, %v9931_v41  ;;  %vm9127_vm5 = vmor %vm3389_vm4, %vm3390_vm2  ;;  %v3403_v32 = vadd.f32 %v8827_v53, %v3402_v63  ;;  %v9939_v24 = vld [vmem:[#allocation30_spill] sm:$0xff] }
 0x409   :  { %v4898_v48 = vpop.eup %4897  ;;  %v3392_v0 = vsel %vm9127_vm5, %v8747_v54, %v3388_v51  ;;  %vm3405_vm6 = vweird.f32 %v8827_v53  ;;  %v3484_v25 = vmul.f32 %v8925_v43, %v8681_v9  ;;  %vm3394_vm7 = vcmp.eq.f32.partialorder %v3393_v18, 8.507059e+37  ;;  %vm9161_vm11 = vmor %vm3129_vm1, %vm3130_vm3 }
 0x40a   :  { %v4900_v28 = vpop.eup %4899  ;;  %v3546_v38 = vmul.f32 %v4898_v48, %v3530_v34  ;;  %v3396_v59 = vor.u32 1.1754944e-38, %v3395_v58  ;;  %v3410_v23 = vand.u32 2147483648, %v8749_v50  ;;  %v9140_v60 = vadd.f32 %v9074_v56, %v3127_v26  ;;  %v9943_v48 = vld [vmem:[#allocation51_spill] sm:$0xff] }
 0x40b   :  { %v3547_v10 = vmul.f32 %v4900_v28, %v3531_v44  ;;  %vm3404_vm8 = vweird.f32 %v8749_v50  ;;  %v3408_v54 = vand.u32 2147483647, %v8749_v50  ;;  %v3142_v36 = vmul.f32 %v9104_v8, %v3141_v3 }
 0x40c   :  { %vm3145_vm9 = vweird.f32 %v9104_v8  ;;  %v3578_v42 = vadd.f32 %v3562_v19, %v3546_v38  ;;  %vm9146_vm10 = vmor %vm3404_vm8, %vm3405_vm6  ;;  %v3485_v43 = vmul.f32 %v8984_v11, %v8740_v15  ;;  %v3500_v31 = vadd.f32 %v3484_v25, %v9936_v4 }
 0x40d   :  { %v3461_v34 = vsub.f32 1.0, %v9124_v12  ;;  %v3579_v30 = vadd.f32 %v3563_v27, %v3547_v10  ;;  %v3397_v51 = vsel %vm3394_vm7, %v3396_v59, %v3392_v0  ;;  %v3407_v50 = vsel %vm9146_vm10, %v8827_v53, %v3403_v32 }
 0x40e   :  { %vm3144_vm12 = vweird.f32 %v9055_v29  ;;  %v3594_v15 = vpack.c.bf16 %v3578_v42, %v3578_v42  ;;  %v3411_v11 = vor.u32 1.1754944e-38, %v3410_v23  ;;  %v3501_v18 = vadd.f32 %v3485_v43, %v9939_v24 }
 0x40f   :  { %4901 = vtanh.f32 %v3500_v31  ;;  %v3132_v53 = vsel %vm9161_vm11, %v9074_v56, %v9140_v60  ;;  %v3595_v58 = vpack.c.bf16 %v3579_v30, %v3579_v30  ;;  %v4399_v26 = vpack.c.bf16 %v3579_v30, %v3578_v42  ;;  %v9948_v42 = vld [vmem:[#allocation58_spill] sm:$0xff]  ;;  %vm9218_vm5 = vmor %vm3144_vm12, %vm3145_vm9  ;;  %v9952_v30 = vld [vmem:[#allocation71_spill] sm:$0xff] }
 0x410   :  { %vm3409_vm13 = vcmp.eq.f32.partialorder %v3408_v54, 8.507059e+37  ;;  %v3143_v7 = vadd.f32 %v9104_v8, %v3142_v36  ;;  %4903 = vtanh.f32 %v3501_v18  ;;  %v9940_v3 = vsub.f32 1.0, %v8916_v61 }
 0x411   :  { %v3412_v19 = vsel %vm3409_vm13, %v3411_v11, %v3407_v50  ;;  %4419 = vst [vmem:[#allocation2 + $0x20] sm:$0xff] %v4399_v26   ;;  %v3658_v41 = vunpack.c.l.b16 %v3594_v15  ;;  %v3659_v27 = vunpack.c.l.b16 %v3595_v58  ;;  %v3532_v22 = vsub.f32 1.0, %v3397_v51 }
 0x412   :  { %v3417_v44 = vmul.f32 %v8891_v46, %v9940_v3  ;;  %vm3420_vm14 = vweird.f32 %v8891_v46  ;;  %vm9178_vm15 = vcmp.eq.f32.partialorder %v3133_v6, 8.507059e+37  ;;  %v3564_v0 = vmul.f32 %v3397_v51, %v9943_v48 }
 0x413   :  { %v3425_v61 = vand.u32 2147483648, %v8815_v20  ;;  %v3432_v25 = vmul.f32 %v8959_v33, %v3431_v2  ;;  %v3670_v28 = vpack.c.b16 %v3659_v27, %v3658_v41  ;;  %v3533_v38 = vsub.f32 1.0, %v3412_v19 }
 0x414   :  { %v3418_v32 = vadd.f32 %v8891_v46, %v3417_v44  ;;  %vm3419_vm0 = vweird.f32 %v8815_v20  ;;  %vm3435_vm1 = vweird.f32 %v8959_v33  ;;  %v3423_v59 = vand.u32 2147483647, %v8815_v20  ;;  %v9954_v44 = vld [vmem:[#allocation55_spill] sm:$0xff] }
 0x415   :  { %v4902_v45 = vpop.eup %4901  ;;  %vm9190_vm2 = vmor %vm3419_vm0, %vm3420_vm14  ;;  %v3433_v23 = vadd.f32 %v8959_v33, %v3432_v25  ;;  %vm3434_vm3 = vweird.f32 %v8886_v5  ;;  %v3440_v47 = vand.u32 2147483648, %v8886_v5  ;;  %3758 = vmatmul.bf16.gmra.mxu2 %v3670_v28  ;;  %v3438_v10 = vand.u32 2147483647, %v8886_v5  ;;  %v9957_v28 = vld [vmem:[#allocation72_spill] sm:$0xff] }
 0x416   :  { %v3548_v2 = vmul.f32 %v4902_v45, %v3532_v22  ;;  %vm9198_vm4 = vmor %vm3434_vm3, %vm3435_vm1  ;;  %v3486_v54 = vmul.f32 %v9027_v55, %v8797_v16  ;;  %v3487_v20 = vmul.f32 %v9078_v40, %v8819_v35  ;;  %v4904_v36 = vpop.eup %4903  ;;  %v3565_v9 = vmul.f32 %v3412_v19, %v9948_v42  ;;  %v9951_v55 = vld [vmem:[#allocation73_spill] sm:$0xff]  ;;  %v9959_v16 = vld [vmem:[#allocation62_spill] sm:$0xff] }
 0x417   :  { %v3422_v43 = vsel %vm9190_vm2, %v8891_v46, %v3418_v32  ;;  %v3426_v4 = vor.u32 1.1754944e-38, %v3425_v61  ;;  %v3437_v31 = vsel %vm9198_vm4, %v8959_v33, %v3433_v23  ;;  %v3549_v35 = vmul.f32 %v4904_v36, %v3533_v38  ;;  %v9958_v38 = vld [vmem:[#allocation74_spill] sm:$0xff] }
 0x418   :  { %v3580_v5 = vadd.f32 %v3564_v0, %v3548_v2  ;;  %v3502_v40 = vadd.f32 %v3486_v54, %v9951_v55  ;;  %v3503_v51 = vadd.f32 %v3487_v20, %v9952_v30  ;;  %v3147_v46 = vsel %vm9218_vm5, %v9104_v8, %v3143_v7  ;;  %v9960_v55 = vld [vmem:[#allocation61_spill] sm:$0xff] }
 0x419   :  { %vm3424_vm6 = vcmp.eq.f32.partialorder %v3423_v59, 8.507059e+37  ;;  %v3441_v33 = vor.u32 1.1754944e-38, %v3440_v47  ;;  %v3447_v50 = vmul.f32 %v9007_v13, %v3446_v62  ;;  %v3581_v63 = vadd.f32 %v3565_v9, %v3549_v35  ;;  %v9953_v62 = vld [vmem:[#allocation56_spill] sm:$0xff] }
 0x41a   :  { %v3427_v15 = vsel %vm3424_vm6, %v3426_v4, %v3422_v43  ;;  %vm3439_vm7 = vcmp.eq.f32.partialorder %v3438_v10, 8.507059e+37  ;;  %4905 = vtanh.f32 %v3502_v40  ;;  %vm3149_vm8 = vcmp.eq.f32.partialorder %v3148_v21, 8.507059e+37 }
 0x41b   :  { %v3596_v11 = vpack.c.bf16 %v3580_v5, %v3580_v5  ;;  %v3442_v24 = vsel %vm3439_vm7, %v3441_v33, %v3437_v31  ;;  %4907 = vtanh.f32 %v3503_v51  ;;  %v3137_v8 = vsel %vm9178_vm15, %v9099_v17, %v3132_v53 }
 0x41c   :  { %v3152_v18 = vsel %vm3149_vm8, %v9114_v37, %v3147_v46  ;;  %v3597_v58 = vpack.c.bf16 %v3581_v63, %v3581_v63  ;;  %v4404_v57 = vpack.c.bf16 %v3581_v63, %v3580_v5  ;;  %v3534_v26 = vsub.f32 1.0, %v3427_v15 }
 0x41d   :  { %v3566_v7 = vmul.f32 %v3427_v15, %v9953_v62  ;;  %v3448_v19 = vadd.f32 %v9007_v13, %v3447_v50  ;;  %v3462_v29 = vmul.f32 %v9101_v14, %v3461_v34  ;;  %v3535_v3 = vsub.f32 1.0, %v3442_v24 }
 0x41e   :  { %4420 = vst [vmem:[#allocation2 + $0x28] sm:$0xff] %v4404_v57   ;;  %v3661_v21 = vunpack.c.l.b16 %v3597_v58  ;;  %v3567_v41 = vmul.f32 %v3442_v24, %v9954_v44  ;;  %vm3449_vm9 = vweird.f32 %v8946_v1  ;;  %v3660_v17 = vunpack.c.l.b16 %v3596_v11 }
 0x41f   :  { %vm3450_vm10 = vweird.f32 %v9007_v13  ;;  %v3453_v37 = vand.u32 2147483647, %v8946_v1  ;;  %v3488_v53 = vmul.f32 %v3137_v8, %v8905_v39  ;;  %v3455_v22 = vand.u32 2147483648, %v8946_v1 }
 0x420   :  { %v4906_v27 = vpop.eup %4905  ;;  %v3463_v12 = vadd.f32 %v9101_v14, %v3462_v29  ;;  %vm3465_vm11 = vweird.f32 %v9101_v14  ;;  %v3489_v34 = vmul.f32 %v3152_v18, %v9019_v52  ;;  %vm3464_vm12 = vweird.f32 %v9043_v49  ;;  %vm9257_vm13 = vmor %vm3449_vm9, %vm3450_vm10 }
 0x421   :  { %v4908_v56 = vpop.eup %4907  ;;  %v3550_v48 = vmul.f32 %v4906_v27, %v3534_v26  ;;  %v3468_v0 = vand.u32 2147483647, %v9043_v49  ;;  %v3470_v32 = vand.u32 2147483648, %v9043_v49  ;;  %v3671_v61 = vpack.c.b16 %v3661_v21, %v3660_v17  ;;  %vm3466_vm14 = vmor %vm3464_vm12, %vm3465_vm11 }
 0x422   :  { %v3551_v25 = vmul.f32 %v4908_v56, %v3535_v3  ;;  %v3504_v52 = vadd.f32 %v3488_v53, %v9957_v28  ;;  %v3505_v45 = vadd.f32 %v3489_v34, %v9958_v38  ;;  %v3452_v59 = vsel %vm9257_vm13, %v9007_v13, %v3448_v19 }
 0x423   :  { %v3582_v6 = vadd.f32 %v3566_v7, %v3550_v48  ;;  %v3456_v23 = vor.u32 1.1754944e-38, %v3455_v22  ;;  %v3467_v47 = vsel %vm3466_vm14, %v9101_v14, %v3463_v12  ;;  %vm3454_vm15 = vcmp.eq.f32.partialorder %v3453_v37, 8.507059e+37 }
 0x424   :  { %v3583_v49 = vadd.f32 %v3567_v41, %v3551_v25  ;;  %4909 = vtanh.f32 %v3504_v52  ;;  %v3471_v2 = vor.u32 1.1754944e-38, %v3470_v32  ;;  %vm3469_vm0 = vcmp.eq.f32.partialorder %v3468_v0, 8.507059e+37 }
 0x425   :  { %v3598_v1 = vpack.c.bf16 %v3582_v6, %v3582_v6  ;;  %4911 = vtanh.f32 %v3505_v45  ;;  %3763 = vmatmul.bf16.gmra.mxu2 %v3671_v61  ;;  %v3457_v54 = vsel %vm3454_vm15, %v3456_v23, %v3452_v59  ;;  %vm3827_vm2 = vcmask 64512  }
 0x426   :  { %v3599_v60 = vpack.c.bf16 %v3583_v49, %v3583_v49  ;;  %v4409_v10 = vpack.c.bf16 %v3583_v49, %v3582_v6  ;;  %v3472_v20 = vsel %vm3469_vm0, %v3471_v2, %v3467_v47  ;;  %v3536_v13 = vsub.f32 1.0, %v3457_v54 }
 0x427   :  { %v3662_v36 = vunpack.c.l.b16 %v3598_v1  ;;  %v3537_v4 = vsub.f32 1.0, %v3472_v20  ;;  %v3568_v35 = vmul.f32 %v3457_v54, %v9959_v16  ;;  %v3569_v40 = vmul.f32 %v3472_v20, %v9960_v55 }
 0x428   :  { %4421 = vst [vmem:[#allocation2 + $0x30] sm:$0xff] %v4409_v10   ;;  %v3663_v42 = vunpack.c.l.b16 %v3599_v60 }
 0x429   :  { %v3739_v46 = vpop.f32.mrf.mxu2 }
 0x42a   :  { %v4910_v9 = vpop.eup %4909  ;;  %v3672_v43 = vpack.c.b16 %v3663_v42, %v3662_v36  ;;  %vm3779_vm1 = vcmp.gt.f32.partialorder %v3739_v46, 0.0  ;;  %v3795_v50 = vmul.f32 0.01, %v3739_v46 }
 0x42b   :  { %v4912_v31 = vpop.eup %4911  ;;  %v3552_v14 = vmul.f32 %v4910_v9, %v3536_v13 }
 0x42c   :  { %v3553_v5 = vmul.f32 %v4912_v31, %v3537_v4  ;;  %v3811_v11 = vsel %vm3779_vm1, %v3739_v46, %v3795_v50 }
 0x42d   :  { %v3584_v30 = vadd.f32 %v3568_v35, %v3552_v14  ;;  %3828 = vst.msk [vmem:[%s9343_s7] sm:$0xff] %vm3827_vm2, %v3811_v11 }
 0x42e   :  { %v3585_v51 = vadd.f32 %v3569_v40, %v3553_v5 }
 0x42f   :  { %v3600_v33 = vpack.c.bf16 %v3584_v30, %v3584_v30 }
 0x430   :  { %v3601_v63 = vpack.c.bf16 %v3585_v51, %v3585_v51  ;;  %v4414_v15 = vpack.c.bf16 %v3585_v51, %v3584_v30 }
 0x431   :  { %v3664_v24 = vunpack.c.l.b16 %v3600_v33  ;;  %v3741_v58 = vpop.f32.mrf.mxu2 }
 0x432   :  { %4422 = vst [vmem:[#allocation2 + $0x38] sm:$0xff] %v4414_v15   ;;  %v3665_v8 = vunpack.c.l.b16 %v3601_v63  ;;  %vm3780_vm3 = vcmp.gt.f32.partialorder %v3741_v58, 0.0  ;;  %v3796_v57 = vmul.f32 0.01, %v3741_v58 }
 0x433   :  { %3856 = dma.vmem_to_hbm [thread:$0]  %s3849_s23, 1024, %s3851_s21, [#allocation3], %s4941_s0, %s4941_s0, %s4942_s24  }
 0x434   :  { %v3673_v18 = vpack.c.b16 %v3665_v8, %v3664_v24  ;;  %v3812_v26 = vsel %vm3780_vm3, %v3741_v58, %v3796_v57 }
 0x435   :  { %3768 = vmatmul.bf16.gmra.mxu2 %v3672_v43  ;;  %3829 = vst.msk [vmem:[%s9343_s7 + $0x8] sm:$0xff] %vm3827_vm2, %v3812_v26 }
 0x43c   :  { %v3744_v62 = vpop.f32.mrf.mxu2 }
 0x43d   :  { %vm3781_vm4 = vcmp.gt.f32.partialorder %v3744_v62, 0.0  ;;  %v3797_v7 = vmul.f32 0.01, %v3744_v62 }
 0x43f   :  { %v3813_v19 = vsel %vm3781_vm4, %v3744_v62, %v3797_v7 }
 0x440   :  { %3830 = vst.msk [vmem:[%s9343_s7 + $0x10] sm:$0xff] %vm3827_vm2, %v3813_v19 }
 0x444   :  { %v3746_v29 = vpop.f32.mrf.mxu2 }
 0x445   :  { %3773 = vmatmul.bf16.gmra.mxu2 %v3673_v18  ;;  %vm3782_vm5 = vcmp.gt.f32.partialorder %v3746_v29, 0.0  ;;  %v3798_v21 = vmul.f32 0.01, %v3746_v29 }
 0x447   :  { %v3814_v3 = vsel %vm3782_vm5, %v3746_v29, %v3798_v21 }
 0x448   :  { %3831 = vst.msk [vmem:[%s9343_s7 + $0x18] sm:$0xff] %vm3827_vm2, %v3814_v3 }
 0x459   :  { %v3749_v44 = vpop.f32.mrf.mxu2 }
 0x45a   :  { %vm3783_vm6 = vcmp.gt.f32.partialorder %v3749_v44, 0.0  ;;  %v3799_v41 = vmul.f32 0.01, %v3749_v44 }
 0x45c   :  { %v3815_v17 = vsel %vm3783_vm6, %v3749_v44, %v3799_v41 }
 0x45d   :  { %3832 = vst.msk [vmem:[%s9343_s7 + $0x20] sm:$0xff] %vm3827_vm2, %v3815_v17 }
 0x461   :  { %v3751_v37 = vpop.f32.mrf.mxu2 }
 0x462   :  { %vm3784_vm7 = vcmp.gt.f32.partialorder %v3751_v37, 0.0  ;;  %v3800_v53 = vmul.f32 0.01, %v3751_v37 }
 0x464   :  { %v3816_v27 = vsel %vm3784_vm7, %v3751_v37, %v3800_v53 }
 0x465   :  { %3833 = vst.msk [vmem:[%s9343_s7 + $0x28] sm:$0xff] %vm3827_vm2, %v3816_v27 }
 0x47e   :  { %v3754_v22 = vpop.f32.mrf.mxu2 }
 0x47f   :  { %vm3785_vm8 = vcmp.gt.f32.partialorder %v3754_v22, 0.0  ;;  %v3801_v12 = vmul.f32 0.01, %v3754_v22 }
 0x481   :  { %v3817_v34 = vsel %vm3785_vm8, %v3754_v22, %v3801_v12 }
 0x482   :  { %3834 = vst.msk [vmem:[%s9343_s7 + $0x30] sm:$0xff] %vm3827_vm2, %v3817_v34 }
 0x486   :  { %v3756_v56 = vpop.f32.mrf.mxu2 }
 0x487   :  { %vm3786_vm9 = vcmp.gt.f32.partialorder %v3756_v56, 0.0  ;;  %v3802_v48 = vmul.f32 0.01, %v3756_v56 }
 0x489   :  { %v3818_v0 = vsel %vm3786_vm9, %v3756_v56, %v3802_v48 }
 0x48a   :  { %3835 = vst.msk [vmem:[%s9343_s7 + $0x38] sm:$0xff] %vm3827_vm2, %v3818_v0 }
 0x498   :  { %v3759_v32 = vpop.f32.mrf.mxu2 }
 0x499   :  { %vm3787_vm10 = vcmp.gt.f32.partialorder %v3759_v32, 0.0  ;;  %v3803_v61 = vmul.f32 0.01, %v3759_v32 }
 0x49b   :  { %v3819_v25 = vsel %vm3787_vm10, %v3759_v32, %v3803_v61 }
 0x49c   :  { %3836 = vst.msk [vmem:[%s9343_s7 + $0x40] sm:$0xff] %vm3827_vm2, %v3819_v25 }
 0x4a0   :  { %v3761_v39 = vpop.f32.mrf.mxu2 }
 0x4a1   :  { %vm3788_vm11 = vcmp.gt.f32.partialorder %v3761_v39, 0.0  ;;  %v3804_v28 = vmul.f32 0.01, %v3761_v39 }
 0x4a3   :  { %v3820_v52 = vsel %vm3788_vm11, %v3761_v39, %v3804_v28 }
 0x4a4   :  { %3837 = vst.msk [vmem:[%s9343_s7 + $0x48] sm:$0xff] %vm3827_vm2, %v3820_v52 }
 0x4a8   :  { %v3764_v38 = vpop.f32.mrf.mxu2 }
 0x4a9   :  { %vm3789_vm12 = vcmp.gt.f32.partialorder %v3764_v38, 0.0  ;;  %v3805_v45 = vmul.f32 0.01, %v3764_v38 }
 0x4ab   :  { %v3821_v6 = vsel %vm3789_vm12, %v3764_v38, %v3805_v45 }
 0x4ac   :  { %3838 = vst.msk [vmem:[%s9343_s7 + $0x50] sm:$0xff] %vm3827_vm2, %v3821_v6 }
 0x4b0   :  { %v3766_v59 = vpop.f32.mrf.mxu2 }
 0x4b1   :  { %vm3790_vm13 = vcmp.gt.f32.partialorder %v3766_v59, 0.0  ;;  %v3806_v49 = vmul.f32 0.01, %v3766_v59 }
 0x4b3   :  { %v3822_v23 = vsel %vm3790_vm13, %v3766_v59, %v3806_v49 }
 0x4b4   :  { %3839 = vst.msk [vmem:[%s9343_s7 + $0x58] sm:$0xff] %vm3827_vm2, %v3822_v23 }
 0x4b8   :  { %v3769_v47 = vpop.f32.mrf.mxu2 }
 0x4b9   :  { %vm3791_vm14 = vcmp.gt.f32.partialorder %v3769_v47, 0.0  ;;  %v3807_v1 = vmul.f32 0.01, %v3769_v47 }
 0x4bb   :  { %v3823_v2 = vsel %vm3791_vm14, %v3769_v47, %v3807_v1 }
 0x4bc   :  { %3840 = vst.msk [vmem:[%s9343_s7 + $0x60] sm:$0xff] %vm3827_vm2, %v3823_v2 }
 0x4c0   :  { %v3771_v60 = vpop.f32.mrf.mxu2 }
 0x4c1   :  { %vm3792_vm15 = vcmp.gt.f32.partialorder %v3771_v60, 0.0  ;;  %v3808_v10 = vmul.f32 0.01, %v3771_v60 }
 0x4c3   :  { %v3824_v54 = vsel %vm3792_vm15, %v3771_v60, %v3808_v10 }
 0x4c4   :  { %3841 = vst.msk [vmem:[%s9343_s7 + $0x68] sm:$0xff] %vm3827_vm2, %v3824_v54 }
 0x4c8   :  { %v3774_v20 = vpop.f32.mrf.mxu2 }
 0x4c9   :  { %vm3793_vm0 = vcmp.gt.f32.partialorder %v3774_v20, 0.0  ;;  %v3809_v36 = vmul.f32 0.01, %v3774_v20 }
 0x4cb   :  { %v3825_v42 = vsel %vm3793_vm0, %v3774_v20, %v3809_v36 }
 0x4cc   :  { %3842 = vst.msk [vmem:[%s9343_s7 + $0x70] sm:$0xff] %vm3827_vm2, %v3825_v42 }
 0x4d0   :  { %v3776_v13 = vpop.f32.mrf.mxu2 }
 0x4d1   :  { %vm3794_vm1 = vcmp.gt.f32.partialorder %v3776_v13, 0.0  ;;  %v3810_v9 = vmul.f32 0.01, %v3776_v13 }
 0x4d3   :  { %v3826_v43 = vsel %vm3794_vm1, %v3776_v13, %v3810_v9 }
 0x4d4   :  { %3843 = vst.msk [vmem:[%s9343_s7 + $0x78] sm:$0xff] %vm3827_vm2, %v3826_v43 }
 0x4d5   :  { %4937 = dma.done.wait [#allocation3], 1024  }
 0x4d6   :  { %4938 = vsyncadd [#allocation3], 4294966272 }
 0x4d7   :  { %3865 = vsyncpa [#allocation3], 1 }

</bundles_post_ra>
